<compile_context>
chip_gen: v7x
topology: tpu7x:2x2x1
jax: 0.10.0
libtpu: 0.0.40
codegen_flags: <defaults>
</compile_context>

<pallas_src>
import functools

import jax
import jax.numpy as jnp
from jax import lax
from jax.experimental import pallas as pl
from jax.experimental.pallas import tpu as pltpu


# ---------------------------------------------------------------------------
# Fused bottleneck kernel: one grid step == one image (all H*W pixels).
# ---------------------------------------------------------------------------
def _bottleneck_kernel(x_ref, w1_ref, w2_ref, w3_ref,
                       b1_ref, b2_ref, b3_ref, o_ref, *, H, W):
    f32 = jnp.float32
    bf16 = jnp.bfloat16
    HW = H * W
    Cmid = w1_ref.shape[1]

    # --- conv1: 1x1 (BN scale folded into w1) + bias + ReLU -----------------------
    h1 = jnp.dot(x_ref[0], w1_ref[...], preferred_element_type=f32)      # (HW, Cmid)
    h1 = jnp.maximum(h1 + b1_ref[...], 0.0).astype(bf16)

    # --- conv2: 3x3, pad=1, stride=1 as ONE matmul with K = 9*Cmid ----------------
    # Shifted patches come from a zero-row-padded buffer via static sublane slices;
    # left/right edge taps are masked with hoisted column masks.
    col = lax.broadcasted_iota(jnp.int32, (HW, 1), 0) % W
    not_left = col > 0            # source col x-1 valid
    not_right = col < (W - 1)     # source col x+1 valid

    zpad = jnp.zeros((2 * W, Cmid), bf16)
    padded = jnp.concatenate([zpad, h1, zpad], axis=0)                   # (HW+4W, Cmid)

    taps = []
    for ky in range(3):                                                  # static unroll
        for kx in range(3):
            dy, dx = ky - 1, kx - 1
            start = 2 * W + dy * W + dx                                  # >= W-1 >= 0
            p = lax.slice(padded, (start, 0), (start + HW, Cmid))        # (HW, Cmid)
            if dx == -1:
                p = jnp.where(not_left, p, jnp.zeros_like(p))
            elif dx == 1:
                p = jnp.where(not_right, p, jnp.zeros_like(p))
            taps.append(p)
    patches = jnp.concatenate(taps, axis=-1)                             # (HW, 9*Cmid)

    h2 = jnp.dot(patches, w2_ref[...], preferred_element_type=f32)       # (HW, Cmid)
    h2 = jnp.maximum(h2 + b2_ref[...], 0.0).astype(bf16)

    # --- conv3: 1x1 + bias + identity residual + ReLU -----------------------------
    h3 = jnp.dot(h2, w3_ref[...], preferred_element_type=f32) + b3_ref[...]
    h3 = h3 + x_ref[0].astype(f32)          # residual re-read here (bounded live range)
    o_ref[0] = jnp.maximum(h3, 0.0).astype(o_ref.dtype)


# ---------------------------------------------------------------------------
# Wrapper: layout glue, BN-scale folding, pallas_call
# ---------------------------------------------------------------------------
def bottleneck_block(x_nchw, p):
    """x_nchw: (N, Cin, H, W) f32. Identity shortcut (stride=1, downsample=None)."""
    N, Cin, H, W = x_nchw.shape
    w1, w2, w3 = p["w1"], p["w2"], p["w3"]
    Cmid = w1.shape[1]
    Cout = w3.shape[1]
    if Cin != Cout:
        raise ValueError("identity shortcut requires in_channels == 4*out_channels")

    HW = H * W
    # bf16 activation I/O; NCHW -> NHWC-flat boundary relayout.
    x_nhwc = jnp.transpose(x_nchw, (0, 2, 3, 1)).reshape(N, HW, Cin).astype(jnp.bfloat16)

    # Fold BN scale into the conv weights in f32, THEN round to bf16 (MXU-native).
    w1b = (w1 * p["s1"][None, :]).astype(jnp.bfloat16)                       # (Cin, Cmid)
    w2b = (w2 * p["s2"][None, None, None, :]).reshape(9 * Cmid, Cmid).astype(jnp.bfloat16)
    w3b = (w3 * p["s3"][None, :]).astype(jnp.bfloat16)                       # (Cmid, Cout)
    b1 = p["b1"].reshape(1, Cmid).astype(jnp.float32)
    b2 = p["b2"].reshape(1, Cmid).astype(jnp.float32)
    b3 = p["b3"].reshape(1, Cout).astype(jnp.float32)

    def const_spec(shape):
        nd = len(shape)
        return pl.BlockSpec(shape, lambda n, _nd=nd: (0,) * _nd)

    flops = 2 * N * HW * (Cin * Cmid + 9 * Cmid * Cmid + Cmid * Cout)
    bytes_accessed = (
        2 * (N * HW * Cin + N * HW * Cout)                        # bf16 activations
        + 2 * (w1b.size + w2b.size + w3b.size)                    # bf16 folded weights
        + 4 * (b1.size + b2.size + b3.size)                       # f32 biases
    )

    out = pl.pallas_call(
        functools.partial(_bottleneck_kernel, H=H, W=W),
        out_shape=jax.ShapeDtypeStruct((N, HW, Cout), jnp.bfloat16),
        grid=(N,),
        in_specs=[
            pl.BlockSpec((1, HW, Cin), lambda n: (n, 0, 0)),      # x (per-image tile)
            const_spec((Cin, Cmid)),                              # w1 (scale-folded)
            const_spec((9 * Cmid, Cmid)),                         # w2 (9 taps, folded)
            const_spec((Cmid, Cout)),                             # w3 (scale-folded)
            const_spec((1, Cmid)),                                # b1
            const_spec((1, Cmid)),                                # b2
            const_spec((1, Cout)),                                # b3
        ],
        out_specs=pl.BlockSpec((1, HW, Cout), lambda n: (n, 0, 0)),
        compiler_params=pltpu.CompilerParams(
            dimension_semantics=("parallel",),
        ),
        cost_estimate=pl.CostEstimate(
            flops=flops, transcendentals=0, bytes_accessed=bytes_accessed),
    )(x_nhwc, w1b, w2b, w3b, b1, b2, b3)

    return (out.reshape(N, H, W, Cout).transpose(0, 3, 1, 2)).astype(jnp.float32)


# ---------------------------------------------------------------------------
# Precision-matched pure-JAX reference (lax conv, identical bf16-rounded folded weights)
# ---------------------------------------------------------------------------
def bottleneck_reference(x_nchw, p):
    f32 = jnp.float32
    bf = lambda a: a.astype(jnp.bfloat16).astype(f32)
    dn = ("NHWC", "HWIO", "NHWC")
    hp = lax.Precision.HIGHEST

    x = jnp.transpose(x_nchw, (0, 2, 3, 1))
    xb = bf(x)                                           # kernel sees bf16 x (residual too)
    Cin = x.shape[-1]
    Cmid = p["w1"].shape[-1]
    Cout = p["w3"].shape[-1]

    w1f = p["w1"] * p["s1"][None, :]
    w2f = p["w2"] * p["s2"][None, None, None, :]
    w3f = p["w3"] * p["s3"][None, :]

    h = lax.conv_general_dilated(xb, bf(w1f).reshape(1, 1, Cin, Cmid), (1, 1), "VALID",
                                 dimension_numbers=dn, precision=hp) + p["b1"]
    h = jax.nn.relu(h)
    h = lax.conv_general_dilated(bf(h), bf(w2f), (1, 1), ((1, 1), (1, 1)),
                                 dimension_numbers=dn, precision=hp) + p["b2"]
    h = jax.nn.relu(h)
    h = lax.conv_general_dilated(bf(h), bf(w3f).reshape(1, 1, Cmid, Cout), (1, 1), "VALID",
                                 dimension_numbers=dn, precision=hp) + p["b3"]
    h = jax.nn.relu(h + xb)
    return jnp.transpose(h, (0, 3, 1, 2))


# ---------------------------------------------------------------------------
def make_params(key, in_channels, out_channels):
    expansion = 4
    Cin, Cmid, Cout = in_channels, out_channels, expansion * out_channels
    ks = jax.random.split(key, 16)
    eps = 1e-5

    def bn_fold(kg, kb, km, kv, C):
        gamma = 1.0 + 0.1 * jax.random.normal(kg, (C,), jnp.float32)
        beta = 0.1 * jax.random.normal(kb, (C,), jnp.float32)
        mean = 0.1 * jax.random.normal(km, (C,), jnp.float32)
        var = jnp.abs(jax.random.normal(kv, (C,), jnp.float32)) + 0.5
        scale = gamma / jnp.sqrt(var + eps)
        bias = beta - mean * scale
        return scale, bias

    w1 = jax.random.normal(ks[0], (Cin, Cmid), jnp.float32) / jnp.sqrt(Cin)
    w2 = jax.random.normal(ks[1], (3, 3, Cmid, Cmid), jnp.float32) / jnp.sqrt(9 * Cmid)
    w3 = jax.random.normal(ks[2], (Cmid, Cout), jnp.float32) / jnp.sqrt(Cmid)

    s1, b1 = bn_fold(ks[3], ks[4], ks[5], ks[6], Cmid)
    s2, b2 = bn_fold(ks[7], ks[8], ks[9], ks[10], Cmid)
    s3, b3 = bn_fold(ks[11], ks[12], ks[13], ks[14], Cout)

    return {"w1": w1, "w2": w2, "w3": w3,
            "s1": s1, "b1": b1, "s2": s2, "b2": b2, "s3": s3, "b3": b3}


if __name__ == "__main__":
    # BottleneckBlock(in_channels=16, out_channels=4, stride=1, downsample=None)
    # (identity residual requires in_channels == 4 * out_channels and stride == 1)
    N, H, W = 2, 16, 16
    in_channels, out_channels = 16, 4

    key = jax.random.PRNGKey(0)
    kx, kp = jax.random.split(key)
    x = jax.random.normal(kx, (N, in_channels, H, W), jnp.float32)   # NCHW like PyTorch
    params = make_params(kp, in_channels, out_channels)

    fwd = jax.jit(bottleneck_block)
    out = jax.block_until_ready(fwd(x, params))
    ref = jax.block_until_ready(bottleneck_reference(x, params))

    assert out.shape == (N, 4 * out_channels, H, W)
    # bf16 matmul operands / bf16 output store with f32 accumulate => 5e-3 is realistic.
    if not jnp.allclose(out, ref, atol=5e-3, rtol=5e-3):
        err = float(jnp.max(jnp.abs(out - ref)))
        raise AssertionError(f"Pallas kernel output mismatch vs reference, max|err|={err}")

    print("KERNEL_OK")
</pallas_src>

<mosaic_0001>
module attributes {stable_mosaic.version = 11 : i64} {
  func.func @_bottleneck_kernel(%arg0: i32, %arg1: memref<1x256x16xbf16, #tpu.memory_space<vmem>>, %arg2: memref<16x4xbf16, #tpu.memory_space<vmem>>, %arg3: memref<36x4xbf16, #tpu.memory_space<vmem>>, %arg4: memref<4x16xbf16, #tpu.memory_space<vmem>>, %arg5: memref<1x4xf32, #tpu.memory_space<vmem>>, %arg6: memref<1x4xf32, #tpu.memory_space<vmem>>, %arg7: memref<1x16xf32, #tpu.memory_space<vmem>>, %arg8: memref<1x256x16xbf16, #tpu.memory_space<vmem>>) attributes {dimension_semantics = [#tpu.dimension_semantics<parallel>], iteration_bounds = array<i64: 2>, scalar_prefetch = 0 : i64, scratch_operands = 0 : i64, tpu.core_type = #tpu.core_type<tc>, window_params = [{transform_indices = @transform_0, window_bounds = array<i64: 1, 256, 16>}, {pipeline_mode = #tpu.pipeline_mode<synchronous>, transform_indices = @transform_1, window_bounds = array<i64: 16, 4>}, {pipeline_mode = #tpu.pipeline_mode<synchronous>, transform_indices = @transform_2, window_bounds = array<i64: 36, 4>}, {pipeline_mode = #tpu.pipeline_mode<synchronous>, transform_indices = @transform_3, window_bounds = array<i64: 4, 16>}, {pipeline_mode = #tpu.pipeline_mode<synchronous>, transform_indices = @transform_4, window_bounds = array<i64: 1, 4>}, {pipeline_mode = #tpu.pipeline_mode<synchronous>, transform_indices = @transform_5, window_bounds = array<i64: 1, 4>}, {pipeline_mode = #tpu.pipeline_mode<synchronous>, transform_indices = @transform_6, window_bounds = array<i64: 1, 16>}, {transform_indices = @transform_7, window_bounds = array<i64: 1, 256, 16>}]} {
    %c0 = arith.constant 0 : index
    %c0_0 = arith.constant 0 : index
    %c0_1 = arith.constant 0 : index
    %0 = vector.load %arg1[%c0, %c0_0, %c0_1] : memref<1x256x16xbf16, #tpu.memory_space<vmem>>, vector<1x256x16xbf16>
    %1 = vector.shape_cast %0 : vector<1x256x16xbf16> to vector<256x16xbf16>
    %c0_2 = arith.constant 0 : index
    %c0_3 = arith.constant 0 : index
    %2 = vector.load %arg2[%c0_2, %c0_3] : memref<16x4xbf16, #tpu.memory_space<vmem>>, vector<16x4xbf16>
    %cst = arith.constant dense<0.000000e+00> : vector<256x4xf32>
    %3 = tpu.matmul %1, %2, %cst {dimension_numbers = #tpu.dot_dimension_numbers<[1], [0], [0], [1], [0, 0, 1, 1], [], []>} : vector<256x16xbf16>, vector<16x4xbf16>, vector<256x4xf32> -> vector<256x4xf32>
    %c0_4 = arith.constant 0 : index
    %c0_5 = arith.constant 0 : index
    %4 = vector.load %arg5[%c0_4, %c0_5] : memref<1x4xf32, #tpu.memory_space<vmem>>, vector<1x4xf32>
    %5 = vector.broadcast %4 : vector<1x4xf32> to vector<256x4xf32>
    %6 = arith.addf %3, %5 : vector<256x4xf32>
    %cst_6 = arith.constant 0.000000e+00 : f32
    %7 = vector.broadcast %cst_6 : f32 to vector<256x4xf32>
    %8 = arith.maximumf %6, %7 : vector<256x4xf32>
    %9 = arith.truncf %8 : vector<256x4xf32> to vector<256x4xbf16>
    %10 = tpu.iota {dimensions = array<i32: 0>} : vector<256x1xi32>
    %c16_i32 = arith.constant 16 : i32
    %c0_i32 = arith.constant 0 : i32
    %11 = arith.cmpi eq, %c16_i32, %c0_i32 : i32
    %c1_i32 = arith.constant 1 : i32
    %12 = arith.select %11, %c1_i32, %c16_i32 : i32
    %13 = vector.broadcast %12 : i32 to vector<256x1xi32>
    %14 = arith.remsi %10, %13 : vector<256x1xi32>
    %c0_i32_7 = arith.constant 0 : i32
    %15 = vector.broadcast %c0_i32_7 : i32 to vector<256x1xi32>
    %16 = arith.cmpi ne, %14, %15 : vector<256x1xi32>
    %c0_i32_8 = arith.constant 0 : i32
    %17 = vector.broadcast %c0_i32_8 : i32 to vector<256x1xi32>
    %18 = arith.cmpi slt, %14, %17 : vector<256x1xi32>
    %c0_i32_9 = arith.constant 0 : i32
    %19 = arith.cmpi slt, %12, %c0_i32_9 : i32
    %20 = vector.broadcast %19 : i1 to vector<256x1xi1>
    %21 = vector.broadcast %20 : vector<256x1xi1> to vector<256x1xi1>
    %22 = arith.xori %18, %21 : vector<256x1xi1>
    %23 = arith.andi %22, %16 : vector<256x1xi1>
    %24 = vector.broadcast %12 : i32 to vector<256x1xi32>
    %25 = arith.addi %14, %24 : vector<256x1xi32>
    %26 = arith.select %23, %25, %14 : vector<256x1xi1>, vector<256x1xi32>
    %c0_i32_10 = arith.constant 0 : i32
    %27 = vector.broadcast %c0_i32_10 : i32 to vector<256x1xi32>
    %28 = arith.cmpi sgt, %26, %27 : vector<256x1xi32>
    %c15_i32 = arith.constant 15 : i32
    %29 = vector.broadcast %c15_i32 : i32 to vector<256x1xi32>
    %30 = arith.cmpi slt, %26, %29 : vector<256x1xi32>
    %cst_11 = arith.constant 0.000000e+00 : bf16
    %31 = vector.broadcast %cst_11 : bf16 to vector<32x4xbf16>
    %32 = tpu.concatenate %31, %9, %31 in 0 : vector<32x4xbf16>, vector<256x4xbf16>, vector<32x4xbf16> -> vector<320x4xbf16>
    %33 = vector.extract_strided_slice %32 {offsets = [15, 0], sizes = [256, 4], strides = [1, 1]} : vector<320x4xbf16> to vector<256x4xbf16>
    %cst_12 = arith.constant 0.000000e+00 : bf16
    %34 = vector.broadcast %cst_12 : bf16 to vector<256x4xbf16>
    %35 = vector.shape_cast %28 : vector<256x1xi1> to vector<256x1xi1>
    %36 = vector.broadcast %35 : vector<256x1xi1> to vector<256x4xi1>
    %37 = arith.select %36, %33, %34 : vector<256x4xi1>, vector<256x4xbf16>
    %38 = vector.extract_strided_slice %32 {offsets = [16, 0], sizes = [256, 4], strides = [1, 1]} : vector<320x4xbf16> to vector<256x4xbf16>
    %39 = vector.extract_strided_slice %32 {offsets = [17, 0], sizes = [256, 4], strides = [1, 1]} : vector<320x4xbf16> to vector<256x4xbf16>
    %cst_13 = arith.constant 0.000000e+00 : bf16
    %40 = vector.broadcast %cst_13 : bf16 to vector<256x4xbf16>
    %41 = vector.shape_cast %30 : vector<256x1xi1> to vector<256x1xi1>
    %42 = vector.broadcast %41 : vector<256x1xi1> to vector<256x4xi1>
    %43 = arith.select %42, %39, %40 : vector<256x4xi1>, vector<256x4xbf16>
    %44 = vector.extract_strided_slice %32 {offsets = [31, 0], sizes = [256, 4], strides = [1, 1]} : vector<320x4xbf16> to vector<256x4xbf16>
    %cst_14 = arith.constant 0.000000e+00 : bf16
    %45 = vector.broadcast %cst_14 : bf16 to vector<256x4xbf16>
    %46 = vector.shape_cast %28 : vector<256x1xi1> to vector<256x1xi1>
    %47 = vector.broadcast %46 : vector<256x1xi1> to vector<256x4xi1>
    %48 = arith.select %47, %44, %45 : vector<256x4xi1>, vector<256x4xbf16>
    %49 = vector.extract_strided_slice %32 {offsets = [32, 0], sizes = [256, 4], strides = [1, 1]} : vector<320x4xbf16> to vector<256x4xbf16>
    %50 = vector.extract_strided_slice %32 {offsets = [33, 0], sizes = [256, 4], strides = [1, 1]} : vector<320x4xbf16> to vector<256x4xbf16>
    %cst_15 = arith.constant 0.000000e+00 : bf16
    %51 = vector.broadcast %cst_15 : bf16 to vector<256x4xbf16>
    %52 = vector.shape_cast %30 : vector<256x1xi1> to vector<256x1xi1>
    %53 = vector.broadcast %52 : vector<256x1xi1> to vector<256x4xi1>
    %54 = arith.select %53, %50, %51 : vector<256x4xi1>, vector<256x4xbf16>
    %55 = vector.extract_strided_slice %32 {offsets = [47, 0], sizes = [256, 4], strides = [1, 1]} : vector<320x4xbf16> to vector<256x4xbf16>
    %cst_16 = arith.constant 0.000000e+00 : bf16
    %56 = vector.broadcast %cst_16 : bf16 to vector<256x4xbf16>
    %57 = vector.shape_cast %28 : vector<256x1xi1> to vector<256x1xi1>
    %58 = vector.broadcast %57 : vector<256x1xi1> to vector<256x4xi1>
    %59 = arith.select %58, %55, %56 : vector<256x4xi1>, vector<256x4xbf16>
    %60 = vector.extract_strided_slice %32 {offsets = [48, 0], sizes = [256, 4], strides = [1, 1]} : vector<320x4xbf16> to vector<256x4xbf16>
    %61 = vector.extract_strided_slice %32 {offsets = [49, 0], sizes = [256, 4], strides = [1, 1]} : vector<320x4xbf16> to vector<256x4xbf16>
    %cst_17 = arith.constant 0.000000e+00 : bf16
    %62 = vector.broadcast %cst_17 : bf16 to vector<256x4xbf16>
    %63 = vector.shape_cast %30 : vector<256x1xi1> to vector<256x1xi1>
    %64 = vector.broadcast %63 : vector<256x1xi1> to vector<256x4xi1>
    %65 = arith.select %64, %61, %62 : vector<256x4xi1>, vector<256x4xbf16>
    %66 = tpu.concatenate %37, %38, %43, %48, %49, %54, %59, %60, %65 in 1 : vector<256x4xbf16>, vector<256x4xbf16>, vector<256x4xbf16>, vector<256x4xbf16>, vector<256x4xbf16>, vector<256x4xbf16>, vector<256x4xbf16>, vector<256x4xbf16>, vector<256x4xbf16> -> vector<256x36xbf16>
    %c0_18 = arith.constant 0 : index
    %c0_19 = arith.constant 0 : index
    %67 = vector.load %arg3[%c0_18, %c0_19] : memref<36x4xbf16, #tpu.memory_space<vmem>>, vector<36x4xbf16>
    %cst_20 = arith.constant dense<0.000000e+00> : vector<256x4xf32>
    %68 = tpu.matmul %66, %67, %cst_20 {dimension_numbers = #tpu.dot_dimension_numbers<[1], [0], [0], [1], [0, 0, 1, 1], [], []>} : vector<256x36xbf16>, vector<36x4xbf16>, vector<256x4xf32> -> vector<256x4xf32>
    %c0_21 = arith.constant 0 : index
    %c0_22 = arith.constant 0 : index
    %69 = vector.load %arg6[%c0_21, %c0_22] : memref<1x4xf32, #tpu.memory_space<vmem>>, vector<1x4xf32>
    %70 = vector.broadcast %69 : vector<1x4xf32> to vector<256x4xf32>
    %71 = arith.addf %68, %70 : vector<256x4xf32>
    %cst_23 = arith.constant 0.000000e+00 : f32
    %72 = vector.broadcast %cst_23 : f32 to vector<256x4xf32>
    %73 = arith.maximumf %71, %72 : vector<256x4xf32>
    %74 = arith.truncf %73 : vector<256x4xf32> to vector<256x4xbf16>
    %c0_24 = arith.constant 0 : index
    %c0_25 = arith.constant 0 : index
    %75 = vector.load %arg4[%c0_24, %c0_25] : memref<4x16xbf16, #tpu.memory_space<vmem>>, vector<4x16xbf16>
    %cst_26 = arith.constant dense<0.000000e+00> : vector<256x16xf32>
    %76 = tpu.matmul %74, %75, %cst_26 {dimension_numbers = #tpu.dot_dimension_numbers<[1], [0], [0], [1], [0, 0, 1, 1], [], []>} : vector<256x4xbf16>, vector<4x16xbf16>, vector<256x16xf32> -> vector<256x16xf32>
    %c0_27 = arith.constant 0 : index
    %c0_28 = arith.constant 0 : index
    %77 = vector.load %arg7[%c0_27, %c0_28] : memref<1x16xf32, #tpu.memory_space<vmem>>, vector<1x16xf32>
    %78 = vector.broadcast %77 : vector<1x16xf32> to vector<256x16xf32>
    %79 = arith.addf %76, %78 : vector<256x16xf32>
    %c0_29 = arith.constant 0 : index
    %c0_30 = arith.constant 0 : index
    %c0_31 = arith.constant 0 : index
    %80 = vector.load %arg1[%c0_29, %c0_30, %c0_31] : memref<1x256x16xbf16, #tpu.memory_space<vmem>>, vector<1x256x16xbf16>
    %81 = vector.shape_cast %80 : vector<1x256x16xbf16> to vector<256x16xbf16>
    %82 = arith.extf %81 : vector<256x16xbf16> to vector<256x16xf32>
    %83 = arith.addf %79, %82 : vector<256x16xf32>
    %cst_32 = arith.constant 0.000000e+00 : f32
    %84 = vector.broadcast %cst_32 : f32 to vector<256x16xf32>
    %85 = arith.maximumf %83, %84 : vector<256x16xf32>
    %86 = arith.truncf %85 : vector<256x16xf32> to vector<256x16xbf16>
    %c0_33 = arith.constant 0 : index
    %c0_34 = arith.constant 0 : index
    %c0_35 = arith.constant 0 : index
    %87 = vector.load %arg8[%c0_33, %c0_34, %c0_35] : memref<1x256x16xbf16, #tpu.memory_space<vmem>>, vector<1x256x16xbf16>
    %88 = vector.shape_cast %87 : vector<1x256x16xbf16> to vector<256x16xbf16>
    %89 = vector.shape_cast %86 : vector<256x16xbf16> to vector<1x256x16xbf16>
    tpu.vector_store %arg8[%c0_33, %c0_34, %c0_35], %89 {strides = array<i32>} : memref<1x256x16xbf16, #tpu.memory_space<vmem>>, vector<1x256x16xbf16>,
    return
  }
  func.func @transform_0(%arg0: i32) -> (i32, i32, i32) {
    %c0_i32 = arith.constant 0 : i32
    %c0_i32_0 = arith.constant 0 : i32
    %c0_i32_1 = arith.constant 0 : i32
    return %arg0, %c0_i32, %c0_i32_0 : i32, i32, i32
  }
  func.func @transform_1(%arg0: i32) -> (i32, i32) {
    %c0_i32 = arith.constant 0 : i32
    %c0_i32_0 = arith.constant 0 : i32
    %c0_i32_1 = arith.constant 0 : i32
    return %c0_i32, %c0_i32_0 : i32, i32
  }
  func.func @transform_2(%arg0: i32) -> (i32, i32) {
    %c0_i32 = arith.constant 0 : i32
    %c0_i32_0 = arith.constant 0 : i32
    %c0_i32_1 = arith.constant 0 : i32
    return %c0_i32, %c0_i32_0 : i32, i32
  }
  func.func @transform_3(%arg0: i32) -> (i32, i32) {
    %c0_i32 = arith.constant 0 : i32
    %c0_i32_0 = arith.constant 0 : i32
    %c0_i32_1 = arith.constant 0 : i32
    return %c0_i32, %c0_i32_0 : i32, i32
  }
  func.func @transform_4(%arg0: i32) -> (i32, i32) {
    %c0_i32 = arith.constant 0 : i32
    %c0_i32_0 = arith.constant 0 : i32
    %c0_i32_1 = arith.constant 0 : i32
    return %c0_i32, %c0_i32_0 : i32, i32
  }
  func.func @transform_5(%arg0: i32) -> (i32, i32) {
    %c0_i32 = arith.constant 0 : i32
    %c0_i32_0 = arith.constant 0 : i32
    %c0_i32_1 = arith.constant 0 : i32
    return %c0_i32, %c0_i32_0 : i32, i32
  }
  func.func @transform_6(%arg0: i32) -> (i32, i32) {
    %c0_i32 = arith.constant 0 : i32
    %c0_i32_0 = arith.constant 0 : i32
    %c0_i32_1 = arith.constant 0 : i32
    return %c0_i32, %c0_i32_0 : i32, i32
  }
  func.func @transform_7(%arg0: i32) -> (i32, i32, i32) {
    %c0_i32 = arith.constant 0 : i32
    %c0_i32_0 = arith.constant 0 : i32
    %c0_i32_1 = arith.constant 0 : i32
    return %arg0, %c0_i32, %c0_i32_0 : i32, i32, i32
  }
}

</mosaic_0001>

<bundles_post_ra>
// kernel: bottleneck_block.1
= control target key start
LH: loop header
LB: loop body
LE: loop exit
PB: predicated region body
PF: predicated region fallthrough
CT: control target
= control target key end

     0   :  { %s4175_s24 = smov 0   ;;  %s6464_s0 = inlined_call_operand.vmem [shape: bf16[2,256,16], index: 0, kind: input, shape index: {}]   ;;  %s6465_s1 = inlined_call_operand.vmem [shape: bf16[16,4], index: 1, kind: input, shape index: {}]   ;;  %s6466_s2 = inlined_call_operand.vmem [shape: bf16[36,4], index: 2, kind: input, shape index: {}]   ;;  %s6467_s3 = inlined_call_operand.vmem [shape: bf16[4,16], index: 3, kind: input, shape index: {}]   ;;  %s6468_s4 = inlined_call_operand.vmem [shape: f32[1,4], index: 4, kind: input, shape index: {}]   ;;  %s6469_s5 = inlined_call_operand.vmem [shape: f32[1,4], index: 5, kind: input, shape index: {}]   ;;  %s6470_s6 = inlined_call_operand.vmem [shape: f32[1,16], index: 6, kind: input, shape index: {}]   ;;  %s6471_s7 = inlined_call_operand.vmem [shape: bf16[2,256,16], index: 7, kind: output, shape index: {}]  }
   0x1 LB: > { %s3699_s25 = sadd.s32 4294967295, %s4123_s24   ;;  %p3703_p0 = scmp.ge.s32.totalorder %s4123_s24, 1  ;;  %s4123_s24 = sphi %s4175_s24, %s17_s24  }
   0x2   : > { %p237_p1 = scmp.lt.s32.totalorder %s4123_s24, 3 }
   0x4   : > { %p238_p2 = pnand %p3703_p0, %p237_p1 }
   0x6   : > { %241 = sbr.rel (%p238_p2) target bundleno = 1084 (0x43c), region = 48 }
   0xd   : > { %v4065_v0 = vld [vmem:[%s6465_s1] sm:$0xff]   ;;  %p269_p3 = scmp.lt.s32.totalorder %s3699_s25, 1  ;;  %vm6493_vm0 = vcmask 130048   ;;  %v6472_v17 = vmov 0   ;;  %s4126_s9 = smov 12   ;;  %v667_v19 = vlaneseq  ;;  %vm4128_vm3 = vmmov 1  }
   0xe   : > { %3932 = vmatprep.subr.bf16.mxu0 %v4065_v0  ;;  %4038 = vmatprep.subr.bf16.mxu1 %v4065_v0  ;;  %v4229_v18 = vrot.slane %v6472_v17, 1  ;;  %s4127_s10 = smov 8   ;;  %vm1213_vm4 = vmpackc.low %vm4128_vm3, %vm4128_vm3  ;;  %s4129_s13 = smov 24  }
   0xf   : > { %s6836_s25 = smov (!%p269_p3, %s3699_s25), 1  ;;  %3933 = vmatpush3.bf16.msra.mxu0 %v4065_v0  ;;  %4039 = vmatpush3.bf16.msra.mxu1 %v4065_v0  ;;  %v4235_v20 = vshrl.u32 %v667_v19, 7  ;;  %v4240_v24 = vsel %vm1213_vm4, 65537, %v6472_v17  ;;  %s4130_s14 = smov 32  }
  0x10   : > { %s3845_s28 = sshll.u32 %s6836_s25, 7  ;;  %6539 = vst [vmem:[#allocation2_spill] sm:$0xff] %v4229_v18  ;;  %2146 = vrot.lane.b32.xlu0 %v6472_v17, %s4126_s9  ;;  %2096 = vrot.lane.b32.xlu1 %v4229_v18, %s4127_s10  ;;  %6541 = vst [vmem:[#allocation4_spill] sm:$0xff] %v4240_v24  ;;  %s4131_s15 = smov 20  }
  0x11   : > { %s4194_s8 = scalar_lea.vmem %s6464_s0, %s3845_s28  ;;  %6540 = vst [vmem:[#allocation3_spill] sm:$0xff] %v4235_v20  ;;  %v681_v21 = vadd.s32 104, %v4235_v20  ;;  %v676_v25 = vadd.s32 64, %v4235_v20  ;;  %v670_v27 = vadd.s32 16, %v4235_v20  ;;  %v692_v29 = vadd.s32 192, %v4235_v20  ;;  %s4132_s16 = smov 28  }
  0x12   : > { %v282_v1 = vld [vmem:[%s4194_s8] sm:$0xff]   ;;  %v284_v3 = vld [vmem:[%s4194_s8 + $0x8] sm:$0xff]   ;;  %v286_v5 = vld [vmem:[%s4194_s8 + $0x10] sm:$0xff]   ;;  %v704_v36 = vand.u32 15, %v4235_v20  ;;  %v672_v37 = vadd.s32 32, %v4235_v20  ;;  %v684_v39 = vadd.s32 128, %v4235_v20 }
  0x13   : > { %v298_v2 = vld [vmem:[%s4194_s8 + $0x40] sm:$0xff]   ;;  %v300_v4 = vld [vmem:[%s4194_s8 + $0x48] sm:$0xff]   ;;  %v302_v6 = vld [vmem:[%s4194_s8 + $0x50] sm:$0xff]   ;;  %3934 = vmatprep.mubr.msk.bf16.mxu0 %vm6493_vm0, %v282_v1  ;;  %v795_v22 = vand.u32 15, %v681_v21  ;;  %v760_v28 = vand.u32 15, %v676_v25  ;;  %v718_v31 = vand.u32 15, %v670_v27 }
  0x14   : > { %3950 = vmatprep.mubr.msk.bf16.mxu1 %vm6493_vm0, %v298_v2  ;;  %3935 = vmatmul.mubr.msk.bf16.vlgmr.msra.gmra.mrb[0].mxu0 %vm6493_vm0, %v284_v3  ;;  %v288_v7 = vld [vmem:[%s4194_s8 + $0x18] sm:$0xff]   ;;  %v290_v9 = vld [vmem:[%s4194_s8 + $0x20] sm:$0xff]   ;;  %v292_v11 = vld [vmem:[%s4194_s8 + $0x28] sm:$0xff]   ;;  %v872_v33 = vand.u32 15, %v692_v29  ;;  %v686_v41 = vadd.s32 144, %v4235_v20  ;;  %vm4266_vm9 = vcmp.gt.s32.totalorder %v704_v36, 0 }
  0x15   : > { %3951 = vmatmul.mubr.msk.bf16.vlgmr.msra.gmra.mrb[0].mxu1 %vm6493_vm0, %v300_v4  ;;  %3938 = vmatprep.mubr.msk.bf16.mxu0 %vm6493_vm0, %v286_v5  ;;  %v304_v8 = vld [vmem:[%s4194_s8 + $0x58] sm:$0xff]   ;;  %v306_v10 = vld [vmem:[%s4194_s8 + $0x60] sm:$0xff]   ;;  %v308_v12 = vld [vmem:[%s4194_s8 + $0x68] sm:$0xff]   ;;  %vm1129_vm1 = vcmp.lt.s32.totalorder %v795_v22, 15  ;;  %vm4246_vm5 = vcmp.gt.s32.totalorder %v760_v28, 0  ;;  %vm4254_vm6 = vcmp.gt.s32.totalorder %v718_v31, 0 }
  0x16   : > { %3954 = vmatprep.mubr.msk.bf16.mxu1 %vm6493_vm0, %v302_v6  ;;  %v294_v13 = vld [vmem:[%s4194_s8 + $0x30] sm:$0xff]   ;;  %v296_v15 = vld [vmem:[%s4194_s8 + $0x38] sm:$0xff]   ;;  %vm1544_vm2 = vmpackc.low %vm1129_vm1, %vm1129_vm1  ;;  %vm1108_vm8 = vcmp.gt.s32.totalorder %v872_v33, 0  ;;  %v732_v43 = vand.u32 15, %v672_v37  ;;  %v816_v45 = vand.u32 15, %v684_v39  ;;  %v830_v46 = vand.u32 15, %v686_v41 }
  0x17   : > { %v310_v14 = vld [vmem:[%s4194_s8 + $0x70] sm:$0xff]   ;;  %v312_v16 = vld [vmem:[%s4194_s8 + $0x78] sm:$0xff]   ;;  %v1576_v23 = vsel %vm1544_vm2, 65537, %v6472_v17  ;;  %vm1218_vm7 = vmpackc.low %vm4246_vm5, %vm4246_vm5  ;;  %v688_v47 = vadd.s32 160, %v4235_v20  ;;  %v682_v51 = vadd.s32 112, %v4235_v20  ;;  %v671_v61 = vadd.s32 24, %v4235_v20 }
  0x18   : > { %v3763_v26 = vcombine.low %v4240_v24, %v1576_v23  ;;  %vm1212_vm10 = vmpackc.low %vm4254_vm6, %vm4254_vm6  ;;  %v1248_v44 = vsel %vm1218_vm7, 65537, %v6472_v17  ;;  %vm4280_vm13 = vcmp.gt.s32.totalorder %v732_v43, 0  ;;  %vm4286_vm14 = vcmp.gt.s32.totalorder %v816_v45, 0  ;;  %s4133_s17 = smov 4   ;;  %s4134_s18 = smov 16  }
  0x19   : > { %vm1234_vm11 = vmpackc.low %vm1108_vm8, %vm1108_vm8  ;;  %v3745_v48 = vcombine.low %v1248_v44, %v4240_v24  ;;  %v1242_v49 = vsel %vm1212_vm10, 65537, %v6472_v17  ;;  %vm4291_vm15 = vcmp.gt.s32.totalorder %v830_v46, 0  ;;  %v844_v56 = vand.u32 15, %v688_v47 }
  0x1a   : > { %v1689_v30 = vshrl.u32 %v3763_v26, 16  ;;  %v1692_v35 = vshll.u32 %v3763_v26, 16  ;;  %vm1800_vm12 = vmpackc.low %vm4266_vm9, %vm4266_vm9  ;;  %v1264_v52 = vsel %vm1234_vm11, 65537, %v6472_v17  ;;  %v3742_v57 = vcombine.low %v1242_v49, %v4240_v24 }
  0x1b   : > { %v1802_v54 = vsel %vm1800_vm12, 65537, %v6472_v17  ;;  %vm1214_vm1 = vmpackc.low %vm4280_vm13, %vm4280_vm13  ;;  %v1342_v58 = vshll.u32 %v3745_v48, 16  ;;  %v3753_v59 = vcombine.low %v1264_v52, %v4240_v24  ;;  %v802_v60 = vand.u32 15, %v682_v51 }
  0x1c   : > { %3939 = vmatmul.mubr.msk.bf16.gmra.mrb[4].mxu0 %vm6493_vm0, %v288_v7  ;;  %v4250_v34 = vrot.slane %v1689_v30, 7  ;;  %vm1226_vm2 = vmpackc.low %vm4286_vm14, %vm4286_vm14  ;;  %v3773_v62 = vcombine.low %v1802_v54, %v4240_v24  ;;  %vm4308_vm4 = vcmp.gt.s32.totalorder %v844_v56, 0  ;;  %v669_v0 = vadd.s32 8, %v4235_v20 }
  0x1d   : > { %3955 = vmatmul.mubr.msk.bf16.gmra.mrb[4].mxu1 %vm6493_vm0, %v304_v8  ;;  %3942 = vmatprep.mubr.msk.bf16.mxu0 %vm6493_vm0, %v290_v9  ;;  %vm1228_vm3 = vmpackc.low %vm4291_vm15, %vm4291_vm15  ;;  %v1321_v1 = vshll.u32 %v3742_v57, 16  ;;  %v1244_v2 = vsel %vm1214_vm1, 65537, %v6472_v17  ;;  %v4314_v3 = vrot.slane %v1342_v58, 1  ;;  %v1406_v4 = vshll.u32 %v3753_v59, 16 }
  0x1e   : > { %3958 = vmatprep.mubr.msk.bf16.mxu1 %vm6493_vm0, %v306_v10  ;;  %v4263_v40 = vor.u32 %v1692_v35, %v4250_v34  ;;  %v1256_v5 = vsel %vm1226_vm2, 65537, %v6472_v17  ;;  %v1258_v6 = vsel %vm1228_vm3, 65537, %v6472_v17  ;;  %vm4318_vm5 = vcmp.gt.s32.totalorder %v802_v60, 0  ;;  %vm1230_vm6 = vmpackc.low %vm4308_vm4, %vm4308_vm4 }
  0x1f   : > { %v725_v8 = vand.u32 15, %v671_v61  ;;  %v1810_v9 = vshll.u32 %v3773_v62, 16  ;;  %v687_v10 = vadd.s32 152, %v4235_v20  ;;  %vm1224_vm7 = vmpackc.low %vm4318_vm5, %vm4318_vm5  ;;  %v4335_v19 = vrot.slane %v1406_v4, 1 }
  0x20   : > { %v1323_v22 = vrot.slane %v1321_v1, 1  ;;  %v1319_v23 = vshrl.u32 %v3742_v57, 16  ;;  %v685_v26 = vadd.s32 136, %v4235_v20  ;;  %v1808_v27 = vshrl.u32 %v3773_v62, 16 }
  0x21   : > { %vm4340_vm8 = vcmp.lt.s32.totalorder %v725_v8, 15  ;;  %v4345_v28 = vrot.slane %v1810_v9, 1  ;;  %v837_v29 = vand.u32 15, %v687_v10  ;;  %v1410_v30 = vshrl.u32 %v3753_v59, 16 }
  0x22   : > { %v1260_v31 = vsel %vm1230_vm6, 65537, %v6472_v17  ;;  %v1254_v32 = vsel %vm1224_vm7, 65537, %v6472_v17  ;;  %vm1534_vm10 = vmpackc.low %vm4340_vm8, %vm4340_vm8  ;;  %vm1317_vm11 = vsmask.f32 7424  ;;  %v1324_v39 = vor.u32 %v1323_v22, %v1319_v23 }
  0x23   : > { %v4362_v38 = vor.u32 %v1410_v30, %v4335_v19  ;;  %v823_v42 = vand.u32 15, %v685_v26  ;;  %v1813_v43 = vor.u32 %v4345_v28, %v1808_v27  ;;  %v3748_v44 = vcombine.low %v1254_v32, %v4240_v24 }
  0x24   : > { %3943 = vmatmul.mubr.msk.bf16.gmra.mrb[8].mxu0 %vm6493_vm0, %v292_v11  ;;  %v1346_v11 = vshrl.u32 %v3745_v48, 16  ;;  %vm4367_vm12 = vcmp.lt.s32.totalorder %v837_v29, 15  ;;  %v673_v46 = vadd.s32 40, %v4235_v20  ;;  %v4373_v47 = vcombine.low %v1260_v31, %v4240_v24 }
  0x25   : > { %3959 = vmatmul.mubr.msk.bf16.gmra.mrb[8].mxu1 %vm6493_vm0, %v308_v12  ;;  %3946 = vmatprep.mubr.msk.bf16.mxu0 %vm6493_vm0, %v294_v13  ;;  %v4324_v12 = vcombine.low %v1244_v2, %v4240_v24  ;;  %v711_v13 = vand.u32 15, %v669_v0  ;;  %v1566_v48 = vsel %vm1534_vm10, 65537, %v6472_v17  ;;  %v683_v50 = vadd.s32 120, %v4235_v20  ;;  %vm1550_vm1 = vmpackc.low %vm4367_vm12, %vm4367_vm12 }
  0x26   : > { %3962 = vmatprep.mubr.msk.bf16.mxu1 %vm6493_vm0, %v310_v14  ;;  %v689_v14 = vadd.s32 168, %v4235_v20  ;;  %v4338_v21 = vor.u32 %v1346_v11, %v4314_v3  ;;  %vm4388_vm15 = vcmp.lt.s32.totalorder %v823_v42, 15  ;;  %v1366_v57 = vshll.u32 %v3748_v44, 16 }
  0x27   : > { %vm4354_vm9 = vcmp.lt.s32.totalorder %v711_v13, 15  ;;  %v1326_v41 = vshll.u32 %v4324_v12, 16  ;;  %v3758_v59 = vcombine.low %v4240_v24, %v1566_v48  ;;  %v739_v60 = vand.u32 15, %v673_v46  ;;  %vm1548_vm3 = vmpackc.low %vm4388_vm15, %vm4388_vm15 }
  0x28   : > { %v851_v33 = vand.u32 15, %v689_v14  ;;  %vm1532_vm13 = vmpackc.low %vm4354_vm9, %vm4354_vm9  ;;  %v4401_v61 = vsel %vm1317_vm11, %v1813_v43, %v1323_v22  ;;  %v1390_v63 = vshll.u32 %v4373_v47, 16  ;;  %v809_v0 = vand.u32 15, %v683_v50 }
  0x29   : > { %v4386_v55 = vrot.slane %v1326_v41, 1  ;;  %v1564_v58 = vsel %vm1532_vm13, 65537, %v6472_v17  ;;  %v1582_v4 = vsel %vm1550_vm1, 65537, %v6472_v17  ;;  %v675_v9 = vadd.s32 56, %v4235_v20 }
  0x2a   : > { %vm4379_vm14 = vcmp.lt.s32.totalorder %v851_v33, 15  ;;  %v3757_v7 = vcombine.low %v4240_v24, %v1564_v58  ;;  %v4417_v10 = vrot.slane %v1366_v57, 1  ;;  %v1649_v11 = vshrl.u32 %v3758_v59, 16 }
  0x2b   : > { %vm1552_vm2 = vmpackc.low %vm4379_vm14, %vm4379_vm14  ;;  %v4405_v62 = vsel %vm1317_vm11, %v1324_v39, %v4386_v55  ;;  %vm4419_vm4 = vcmp.lt.s32.totalorder %v739_v60, 15  ;;  %v691_v14 = vadd.s32 184, %v4235_v20  ;;  %vm4426_vm5 = vcmp.lt.s32.totalorder %v809_v0, 15 }
  0x2c   : > { %3947 = vmatmul.mubr.msk.bf16.gmra.mrb[12].mxu0 %vm6493_vm0, %v296_v15  ;;  %v3749_v15 = vcombine.low %v1256_v5, %v4240_v24  ;;  %6568 = vst [vmem:[#allocation5_spill] sm:$0xff] %v4405_v62  ;;  %v674_v5 = vadd.s32 48, %v4235_v20  ;;  %v1584_v8 = vsel %vm1552_vm2, 65537, %v6472_v17  ;;  %6569 = vst [vmem:[#allocation6_spill] sm:$0xff] %v4417_v10  ;;  %v677_v23 = vadd.s32 72, %v4235_v20 }
  0x2d   : > { %3963 = vmatmul.mubr.msk.bf16.gmra.mrb[12].mxu1 %vm6493_vm0, %v312_v16  ;;  %v3750_v16 = vcombine.low %v1258_v6, %v4240_v24  ;;  %v1370_v6 = vshrl.u32 %v3748_v44, 16  ;;  %v4431_v25 = vrot.slane %v1390_v63, 1  ;;  %v3767_v26 = vcombine.low %v4240_v24, %v1584_v8  ;;  %vm1536_vm6 = vmpackc.low %vm4419_vm4, %vm4419_vm4 }
  0x2e   : > { %v1374_v35 = vshll.u32 %v3749_v15, 16  ;;  %v1378_v52 = vshrl.u32 %v3749_v15, 16  ;;  %v1580_v15 = vsel %vm1548_vm3, 65537, %v6472_v17  ;;  %v746_v27 = vand.u32 15, %v674_v5  ;;  %vm1546_vm7 = vmpackc.low %vm4426_vm5, %vm4426_vm5 }
  0x2f   : > { %v1382_v36 = vshll.u32 %v3750_v16, 16  ;;  %v1386_v54 = vshrl.u32 %v3750_v16, 16  ;;  %v3766_v16 = vcombine.low %v4240_v24, %v1582_v4  ;;  %v693_v29 = vadd.s32 200, %v4235_v20 }
  0x30   : > { %v4384_v51 = vrot.slane %v1374_v35, 1  ;;  %v1645_v31 = vshrl.u32 %v3757_v7, 16  ;;  %v690_v32 = vadd.s32 176, %v4235_v20  ;;  %v753_v33 = vand.u32 15, %v675_v9 }
  0x31   : > { %v1384_v53 = vrot.slane %v1382_v36, 1  ;;  %v4442_v35 = vrot.slane %v1649_v11, 7  ;;  %v1652_v36 = vshll.u32 %v3758_v59, 16  ;;  %v4445_v37 = vcombine.low %v4240_v24, %v1580_v15 }
  0x32   : > { %v1380_v1 = vor.u32 %v1378_v52, %v4384_v51  ;;  %v865_v39 = vand.u32 15, %v691_v14  ;;  %v1372_v41 = vor.u32 %v1370_v6, %v4417_v10  ;;  %v1713_v42 = vshrl.u32 %v3766_v16, 16 }
  0x33   : > { %v1388_v2 = vor.u32 %v1386_v54, %v1384_v53  ;;  %v767_v43 = vand.u32 15, %v677_v23  ;;  %v679_v44 = vadd.s32 88, %v4235_v20  ;;  %v1832_v45 = vshll.u32 %v3757_v7, 16 }
  0x34   : > { %v4436_v30 = vsel %vm1317_vm11, %v1380_v1, %v1384_v53  ;;  %v1721_v46 = vshrl.u32 %v3767_v26, 16  ;;  %vm4452_vm8 = vcmp.gt.s32.totalorder %v746_v27, 0  ;;  %v879_v49 = vand.u32 15, %v693_v29 }
  0x35   : > { %6574 = vst [vmem:[#allocation7_spill] sm:$0xff] %v4436_v30  ;;  %v1568_v50 = vsel %vm1536_vm6, 65537, %v6472_v17  ;;  %v1578_v52 = vsel %vm1546_vm7, 65537, %v6472_v17  ;;  %v858_v53 = vand.u32 15, %v690_v32  ;;  %vm4463_vm9 = vcmp.lt.s32.totalorder %v753_v33, 15  ;;  %vm1216_vm12 = vmpackc.low %vm4452_vm8, %vm4452_vm8 }
  0x36   : > { %v1647_v56 = vrot.slane %v1645_v31, 7  ;;  %v1654_v57 = vor.u32 %v1652_v36, %v4442_v35  ;;  %v1705_v58 = vshrl.u32 %v4445_v37, 16  ;;  %vm4469_vm10 = vcmp.lt.s32.totalorder %v865_v39, 15  ;;  %vm1538_vm15 = vmpackc.low %vm4463_vm9, %vm4463_vm9 }
  0x37   : > { %v1715_v60 = vrot.slane %v1713_v42, 7  ;;  %v1716_v63 = vshll.u32 %v3766_v16, 16  ;;  %vm4476_vm13 = vcmp.lt.s32.totalorder %v767_v43, 15  ;;  %v781_v1 = vand.u32 15, %v679_v44  ;;  %vm1554_vm3 = vmpackc.low %vm4469_vm10, %vm4469_vm10 }
  0x38   : > { %vm6518_vm14 = vsmask.f32 256  ;;  %v3759_v4 = vcombine.low %v4240_v24, %v1568_v50  ;;  %v3764_v5 = vcombine.low %v4240_v24, %v1578_v52  ;;  %vm4485_vm1 = vcmp.lt.s32.totalorder %v879_v49, 15  ;;  %vm1540_vm4 = vmpackc.low %vm4476_vm13, %vm4476_vm13 }
  0x39   : > { %v4489_v7 = vrot.slane %v1721_v46, 7  ;;  %v1724_v8 = vshll.u32 %v3767_v26, 16  ;;  %vm4491_vm2 = vcmp.gt.s32.totalorder %v858_v53, 0  ;;  %v678_v11 = vadd.s32 80, %v4235_v20  ;;  %vm1556_vm5 = vmpackc.low %vm4485_vm1, %vm4485_vm1 }
  0x3a   : > { %v4501_v13 = vsel %vm1317_vm11, %v1388_v2, %v4431_v25  ;;  %v4505_v14 = vsel %vm1317_vm11, %v1372_v41, %v4384_v51  ;;  %v4507_v15 = vor.u32 %v1832_v45, %v1647_v56  ;;  %v695_v16 = vadd.s32 216, %v4235_v20  ;;  %vm1232_vm7 = vmpackc.low %vm4491_vm2, %vm4491_vm2 }
  0x3b   : > { %6587 = vst [vmem:[#allocation8_spill] sm:$0xff] %v4501_v13  ;;  %6588 = vst [vmem:[#allocation9_spill] sm:$0xff] %v4505_v14  ;;  %v4514_v22 = vsel %vm6518_vm14, %v1647_v56, %v1654_v57  ;;  %v1707_v23 = vrot.slane %v1705_v58, 7  ;;  %v1718_v26 = vor.u32 %v1716_v63, %v1715_v60  ;;  %vm4519_vm6 = vcmp.lt.s32.totalorder %v781_v1, 15 }
  0x3c   : > { %v1657_v2 = vshrl.u32 %v3759_v4, 16  ;;  %v1697_v27 = vshrl.u32 %v3764_v5, 16  ;;  %v1570_v29 = vsel %vm1538_vm15, 65537, %v6472_v17  ;;  %v1586_v31 = vsel %vm1554_vm3, 65537, %v6472_v17  ;;  %vm1542_vm9 = vmpackc.low %vm4519_vm6, %vm4519_vm6 }
  0x3d   : > { %v1726_v32 = vor.u32 %v1724_v8, %v4489_v7  ;;  %v1660_v33 = vshll.u32 %v3759_v4, 16  ;;  %v1708_v36 = vshll.u32 %v4445_v37, 16  ;;  %v774_v39 = vand.u32 15, %v678_v11 }
  0x3e   : > { %v1572_v41 = vsel %vm1540_vm4, 65537, %v6472_v17  ;;  %v1588_v42 = vsel %vm1556_vm5, 65537, %v6472_v17  ;;  %v694_v43 = vadd.s32 208, %v4235_v20  ;;  %v893_v44 = vand.u32 15, %v695_v16 }
  0x3f   : > { %v1246_v37 = vsel %vm1216_vm12, 65537, %v6472_v17  ;;  %v1262_v45 = vsel %vm1232_vm7, 65537, %v6472_v17  ;;  %v3760_v46 = vcombine.low %v4240_v24, %v1570_v29  ;;  %v3768_v49 = vcombine.low %v4240_v24, %v1586_v31 }
  0x40   : > { %v4560_v50 = vrot.slane %v1657_v2, 7  ;;  %v1699_v52 = vrot.slane %v1697_v27, 7  ;;  %v1700_v53 = vshll.u32 %v3764_v5, 16  ;;  %v1330_v54 = vshrl.u32 %v4324_v12, 16 }
  0x41   : > { %v3761_v56 = vcombine.low %v4240_v24, %v1572_v41  ;;  %v3769_v57 = vcombine.low %v4240_v24, %v1588_v42  ;;  %vm4565_vm10 = vcmp.gt.s32.totalorder %v774_v39, 0  ;;  %v1574_v58 = vsel %vm1542_vm9, 65537, %v6472_v17 }
  0x42   : > { %v3744_v59 = vcombine.low %v1246_v37, %v4240_v24  ;;  %v3752_v63 = vcombine.low %v1262_v45, %v4240_v24  ;;  %v886_v0 = vand.u32 15, %v694_v43  ;;  %vm4572_vm8 = vcmp.lt.s32.totalorder %v893_v44, 15  ;;  %vm1220_vm12 = vmpackc.low %vm4565_vm10, %vm4565_vm10 }
  0x43   : > { %v4577_v12 = vsel %vm6518_vm14, %v1707_v23, %v1718_v26  ;;  %v1710_v4 = vor.u32 %v1708_v36, %v1707_v23  ;;  %v1665_v5 = vshrl.u32 %v3760_v46, 16  ;;  %v1729_v6 = vshrl.u32 %v3768_v49, 16  ;;  %vm1558_vm13 = vmpackc.low %vm4572_vm8, %vm4572_vm8 }
  0x44   : > { %v4580_v8 = vsel %vm6518_vm14, %v1715_v60, %v1726_v32  ;;  %v1662_v9 = vor.u32 %v1660_v33, %v4560_v50  ;;  %v1394_v11 = vshrl.u32 %v4373_v47, 16  ;;  %v4588_v16 = vcombine.low %v4240_v24, %v1574_v58 }
  0x45   : > { %v1702_v51 = vor.u32 %v1700_v53, %v1699_v52  ;;  %v1332_v26 = vor.u32 %v1330_v54, %v4386_v55  ;;  %v1673_v23 = vshrl.u32 %v3761_v56, 16  ;;  %v1737_v2 = vshrl.u32 %v3769_v57, 16 }
  0x46   : > { %v1334_v60 = vshll.u32 %v3744_v59, 16  ;;  %v1398_v27 = vshll.u32 %v3752_v63, 16  ;;  %v1668_v29 = vshll.u32 %v3760_v46, 16  ;;  %vm4594_vm15 = vcmp.gt.s32.totalorder %v886_v0, 0 }
  0x47   : > { %v1667_v31 = vrot.slane %v1665_v5, 7  ;;  %v1731_v32 = vrot.slane %v1729_v6, 7  ;;  %v1732_v33 = vshll.u32 %v3768_v49, 16  ;;  %v1250_v36 = vsel %vm1220_vm12, 65537, %v6472_v17  ;;  %vm1236_vm1 = vmpackc.low %vm4594_vm15, %vm4594_vm15 }
  0x48   : > { %v1338_v39 = vshrl.u32 %v3744_v59, 16  ;;  %v1402_v55 = vshrl.u32 %v3752_v63, 16  ;;  %v1681_v41 = vshrl.u32 %v4588_v16, 16  ;;  %v1590_v42 = vsel %vm1558_vm13, 65537, %v6472_v17 }
  0x49   : > { %v4601_v43 = vrot.slane %v1673_v23, 7  ;;  %v1676_v44 = vshll.u32 %v3761_v56, 16  ;;  %v4603_v37 = vrot.slane %v1737_v2, 7  ;;  %v1740_v45 = vshll.u32 %v3769_v57, 16 }
  0x4a   : > { %v1336_v46 = vrot.slane %v1334_v60, 1  ;;  %v1400_v49 = vrot.slane %v1398_v27, 1  ;;  %v680_v53 = vadd.s32 96, %v4235_v20  ;;  %v4610_v54 = vcombine.low %v1250_v36, %v4240_v24 }
  0x4b   : > { %v1396_v48 = vor.u32 %v1394_v11, %v4431_v25  ;;  %v1670_v58 = vor.u32 %v1668_v29, %v1667_v31  ;;  %v1734_v59 = vor.u32 %v1732_v33, %v1731_v32  ;;  %v4614_v56 = vcombine.low %v4240_v24, %v1590_v42 }
  0x4c   : > { %v1340_v63 = vor.u32 %v1338_v39, %v1336_v46  ;;  %v1404_v57 = vor.u32 %v1402_v55, %v1400_v49  ;;  %v1266_v0 = vsel %vm1236_vm1, 65537, %v6472_v17  ;;  %v1683_v1 = vrot.slane %v1681_v41, 7 }
  0x4d   : > { %v4619_v5 = vsel %vm6518_vm14, %v4442_v35, %v1662_v9  ;;  %v4622_v6 = vsel %vm6518_vm14, %v1699_v52, %v1710_v4  ;;  %v1678_v23 = vor.u32 %v1676_v44, %v4601_v43  ;;  %v1742_v25 = vor.u32 %v1740_v45, %v4603_v37  ;;  %v4637_v35 = vld [vmem:[%s6468_s4] ss:$0 sm:$0xff] }
  0x4e   : > { %6597 = vst [vmem:[#allocation10_spill] sm:$0xff] %v4622_v6  ;;  %v4628_v11 = vsel %vm6518_vm14, %v4250_v34, %v1702_v51  ;;  %v4631_v2 = vsel %vm1317_vm11, %v1332_v26, %v1336_v46  ;;  %v788_v60 = vand.u32 15, %v680_v53  ;;  %v1350_v27 = vshll.u32 %v4610_v54, 16 }
  0x4f   : > { %6598 = vst [vmem:[#allocation11_spill] sm:$0xff] %v4631_v2  ;;  %vm1815_vm2 = vcmp.ne.s16.totalorder %v4401_v61, 0  ;;  %vm1437_vm3 = vcmp.ne.s16.totalorder %v4405_v62, 0  ;;  %v4642_v52 = vsel %vm1317_vm11, %v1396_v48, %v1400_v49  ;;  %v4646_v34 = vsel %vm6518_vm14, %v4560_v50, %v1670_v58 }
  0x50   : > { %6599 = vst [vmem:[#allocation12_spill] sm:$0xff] %v4642_v52  ;;  %v4649_v4 = vcombine.low %v1266_v0, %v4240_v24  ;;  %v1745_v9 = vshrl.u32 %v4614_v56, 16  ;;  %v4654_v51 = vsel %vm1317_vm11, %v1340_v63, %v4314_v3  ;;  %v4658_v26 = vsel %vm1317_vm11, %v1404_v57, %v4335_v19 }
  0x51   : > { %v4662_v29 = vsel %vm6518_vm14, %v4489_v7, %v1734_v59  ;;  %v4666_v50 = vsel %vm6518_vm14, %v1683_v1, %v4263_v40  ;;  %v4669_v36 = vsel %vm6518_vm14, %v1667_v31, %v1678_v23  ;;  %v4672_v3 = vsel %vm6518_vm14, %v1731_v32, %v1742_v25 }
  0x52   : > { %v696_v39 = vadd.s32 224, %v4235_v20  ;;  %v1684_v19 = vshll.u32 %v4588_v16, 16  ;;  %vm4678_vm4 = vcmp.gt.s32.totalorder %v788_v60, 0  ;;  %v4682_v44 = vrot.slane %v1350_v27, 1 }
  0x53   : > { %vm6492_vm5 = vcmp.ne.s16.totalorder %v4436_v30, 0  ;;  %vm1445_vm6 = vcmp.ne.s16.totalorder %v4501_v13, 0  ;;  %v1414_v16 = vshll.u32 %v4649_v4, 16  ;;  %v4689_v49 = vrot.slane %v1745_v9, 7  ;;  %vm1222_vm7 = vmpackc.low %vm4678_vm4, %vm4678_vm4 }
  0x54   : > { %v1748_v57 = vshll.u32 %v4614_v56, 16  ;;  %v900_v60 = vand.u32 15, %v696_v39  ;;  %vm1852_vm9 = vcmp.ne.s16.totalorder %v4345_v28, 0  ;;  %v4703_v56 = vsel %vm1317_vm11, %v4338_v21, %v4682_v44 }
  0x55   : > { %6602 = vst [vmem:[#allocation13_spill] sm:$0xff] %v4689_v49  ;;  %v1252_v39 = vsel %vm1222_vm7, 65537, %v6472_v17  ;;  %vm1835_vm10 = vcmp.ne.s16.totalorder %v4507_v15, 0  ;;  %vm6512_vm12 = vcmp.ne.s16.totalorder %v4505_v14, 0  ;;  %vm1768_vm13 = vcmp.ne.s16.totalorder %v4514_v22, 0 }
  0x56   : > { %vm4717_vm8 = vcmp.gt.s32.totalorder %v900_v60, 0  ;;  %v1750_v21 = vor.u32 %v1748_v57, %v4689_v49  ;;  %v4737_v60 = vcombine.low %v1252_v39, %v4240_v24  ;;  %vm1776_vm15 = vcmp.ne.s16.totalorder %v4577_v12, 0 }
  0x57   : > { %vm1238_vm1 = vmpackc.low %vm4717_vm8, %vm4717_vm8  ;;  %vm1777_vm4 = vcmp.ne.s16.totalorder %v4580_v8, 0  ;;  %vm2062_vm7 = vcmask 1046528   ;;  %vm1770_vm8 = vcmp.ne.s16.totalorder %v4646_v34, 0  ;;  %vm1779_vm0 = vcmp.ne.s16.totalorder %v4672_v3, 0 }
  0x58   : > { %6607 = vst [vmem:[#allocation16_spill] sm:$0xff] %v4737_v60 }
  0xe7   : > { %v3936_v47 = vpop.f32.mrb[0].mxu0 }
  0xe8   : > { %v3952_v33 = vpop.f32.mrb[0].mxu1  ;;  %v501_v55 = vadd.f32 %v3936_v47, %v4637_v35  ;;  %v492_v41 = vpop.f32.mrb[1].mxu0 }
  0xe9   : > { %v565_v7 = vadd.f32 %v3952_v33, %v4637_v35  ;;  %v556_v42 = vpop.f32.mrb[1].mxu1  ;;  %v493_v31 = vadd.f32 %v4637_v35, %v492_v41  ;;  %v3937_v45 = vpop.f32.mrb[2].mxu0  ;;  %v1686_v33 = vor.u32 %v1684_v19, %v1683_v1 }
  0xea   : > { %v557_v32 = vadd.f32 %v4637_v35, %v556_v42  ;;  %v3953_v46 = vpop.f32.mrb[2].mxu1  ;;  %v504_v48 = vadd.f32 %v3937_v45, %v4637_v35  ;;  %v495_v59 = vpop.f32.mrb[3].mxu0  ;;  %v621_v27 = vmax.f32 %v501_v55, 0.0  ;;  %v4710_v55 = vrot.slane %v1414_v16, 1 }
  0xeb   : > { %v637_v53 = vmax.f32 %v565_v7, 0.0  ;;  %v568_v58 = vadd.f32 %v3953_v46, %v4637_v35  ;;  %v559_v63 = vpop.f32.mrb[3].mxu1  ;;  %v496_v23 = vadd.f32 %v4637_v35, %v495_v59  ;;  %v619_v7 = vmax.f32 %v493_v31, 0.0 }
  0xec   : > { %v635_v0 = vmax.f32 %v557_v32, 0.0  ;;  %v560_v25 = vadd.f32 %v4637_v35, %v559_v63  ;;  %v622_v9 = vmax.f32 %v504_v48, 0.0  ;;  %v1418_v46 = vshrl.u32 %v4649_v4, 16 }
  0xed   : > { %v638_v47 = vmax.f32 %v568_v58, 0.0  ;;  %v620_v41 = vmax.f32 %v496_v23, 0.0  ;;  %v4775_v4 = vsel %vm1317_vm11, %v4362_v38, %v4710_v55 }
  0xee   : > { %v636_v42 = vmax.f32 %v560_v25, 0.0  ;;  %v4705_v32 = vpack.c.bf16 %v622_v9, %v621_v27  ;;  %v1354_v27 = vshrl.u32 %v4610_v54, 16 }
  0xef   : > { %v4707_v40 = vpack.c.bf16 %v638_v47, %v637_v53  ;;  %v4712_v45 = vpack.c.bf16 %v620_v41, %v619_v7  ;;  %v3940_v19 = vpop.f32.mrb[4].mxu0 }
  0xf0   : > { %6603 = vst [vmem:[#allocation14_spill] sm:$0xff] %v4705_v32  ;;  %v4714_v1 = vpack.c.bf16 %v636_v42, %v635_v0  ;;  %v3956_v31 = vpop.f32.mrb[4].mxu1  ;;  %v517_v53 = vadd.f32 %v3940_v19, %v4637_v35  ;;  %v508_v16 = vpop.f32.mrb[5].mxu0  ;;  %v1854_v59 = vsel %vm1815_vm2, %v4705_v32, 0  ;;  %v1817_v63 = vsel %vm1437_vm3, %v4705_v32, 0 }
  0xf1   : > { %6604 = vst [vmem:[#allocation15_spill] sm:$0xff] %v4707_v40  ;;  %v581_v48 = vadd.f32 %v3956_v31, %v4637_v35  ;;  %v572_v58 = vpop.f32.mrb[5].mxu1  ;;  %v509_v0 = vadd.f32 %v4637_v35, %v508_v16  ;;  %2322 = vrot.lane.b32.xlu1 %v1854_v59, %s4129_s13  ;;  %2150 = vrot.lane.b32.xlu0 %v1817_v63, %s4126_s9  ;;  %v3941_v57 = vpop.f32.mrb[6].mxu0 }
  0xf2   : > { %v573_v23 = vadd.f32 %v4637_v35, %v572_v58  ;;  %v3957_v25 = vpop.f32.mrb[6].mxu1  ;;  %v625_v9 = vmax.f32 %v517_v53, 0.0  ;;  %v520_v41 = vadd.f32 %v3941_v57, %v4637_v35  ;;  %v511_v42 = vpop.f32.mrb[7].mxu0  ;;  %v1862_v53 = vsel %vm6492_vm5, %v4707_v40, 0 }
  0xf3   : > { %v641_v47 = vmax.f32 %v581_v48, 0.0  ;;  %v584_v7 = vadd.f32 %v3957_v25, %v4637_v35  ;;  %v575_v19 = vpop.f32.mrb[7].mxu1  ;;  %v623_v31 = vmax.f32 %v509_v0, 0.0  ;;  %v512_v58 = vadd.f32 %v4637_v35, %v511_v42 }
  0xf4   : > { %v639_v16 = vmax.f32 %v573_v23, 0.0  ;;  %v576_v59 = vadd.f32 %v4637_v35, %v575_v19  ;;  %v626_v39 = vmax.f32 %v520_v41, 0.0  ;;  %v1825_v48 = vsel %vm1445_vm6, %v4707_v40, 0 }
  0xf5   : > { %v642_v54 = vmax.f32 %v584_v7, 0.0  ;;  %v624_v63 = vmax.f32 %v512_v58, 0.0  ;;  %2338 = vrot.lane.b32.xlu1 %v1862_v53, %s4129_s13  ;;  %2166 = vrot.lane.b32.xlu0 %v1825_v48, %s4126_s9  ;;  %v4760_v23 = vsel %vm6518_vm14, %v4601_v43, %v1686_v33  ;;  %v1358_v7 = vshll.u32 %v4737_v60, 16 }
  0xf6   : > { %v640_v0 = vmax.f32 %v576_v59, 0.0  ;;  %v4764_v57 = vpack.c.bf16 %v626_v39, %v625_v9  ;;  %v1268_v41 = vsel %vm1238_vm1, 65537, %v6472_v17  ;;  %v4779_v43 = vsel %vm6518_vm14, %v4603_v37, %v1750_v21 }
  0xf7   : > { %v4762_v25 = vpack.c.bf16 %v642_v54, %v641_v47  ;;  %v4768_v42 = vpack.c.bf16 %v624_v63, %v623_v31  ;;  %v3944_v58 = vpop.f32.mrb[8].mxu0  ;;  %v1853_v33 = vsel %vm1852_vm9, %v4712_v45, 0  ;;  %v1816_v9 = vsel %vm1815_vm2, %v4712_v45, 0 }
  0xf8   : > { %v4770_v19 = vpack.c.bf16 %v640_v0, %v639_v16  ;;  %v3960_v59 = vpop.f32.mrb[8].mxu1  ;;  %v533_v47 = vadd.f32 %v3944_v58, %v4637_v35  ;;  %v524_v31 = vpop.f32.mrb[9].mxu0  ;;  %v4789_v38 = vor.u32 %v1354_v27, %v4682_v44  ;;  %vm1769_vm9 = vcmp.ne.s16.totalorder %v4619_v5, 0 }
  0xf9   : > { %v588_v16 = vpop.f32.mrb[9].mxu1  ;;  %2320 = vrot.lane.b32.xlu1 %v1853_v33, %s4129_s13  ;;  %2148 = vrot.lane.b32.xlu0 %v1816_v9, %s4126_s9  ;;  %v525_v37 = vadd.f32 %v4637_v35, %v524_v31  ;;  %v3945_v28 = vpop.f32.mrb[10].mxu0  ;;  %v4798_v61 = vcombine.low %v1268_v41, %v4240_v24  ;;  %v4801_v54 = vor.u32 %v1418_v46, %v4710_v55  ;;  %v4807_v53 = vsel %vm1835_vm10, %v4705_v32, 0 }
  0xfa   : > { %v4795_v21 = vpop.f32.mrb[10].mxu1  ;;  %v629_v39 = vmax.f32 %v533_v47, 0.0  ;;  %v536_v44 = vadd.f32 %v3945_v28, %v4637_v35  ;;  %v527_v27 = vpop.f32.mrb[11].mxu0  ;;  %6609 = vst [vmem:[#allocation18_spill] sm:$0xff] %v4807_v53  ;;  %v4811_v63 = vrot.slane %v1358_v7, 1  ;;  %v1824_v41 = vsel %vm6492_vm5, %v4714_v1, 0 }
  0xfb   : > { %6608 = vst [vmem:[#allocation17_spill] sm:$0xff] %v4798_v61  ;;  %v4809_v48 = vpop.f32.mrb[11].mxu1  ;;  %v627_v0 = vmax.f32 %v525_v37, 0.0  ;;  %v528_v55 = vadd.f32 %v4637_v35, %v527_v27  ;;  %v1836_v46 = vsel %vm1835_vm10, %v4712_v45, 0  ;;  %v1861_v33 = vsel %vm6512_vm12, %v4714_v1, 0 }
  0xfc   : > { %6610 = vst [vmem:[#allocation19_spill] sm:$0xff] %v4811_v63  ;;  %v630_v58 = vmax.f32 %v536_v44, 0.0  ;;  %v4826_v7 = vsel %vm1768_vm13, %v4705_v32, 0  ;;  %v1892_v9 = vshll.u32 %v4712_v45, 16  ;;  %v4833_v31 = vadd.f32 %v3960_v59, %v4637_v35 }
  0xfd   : > { %2164 = vrot.lane.b32.xlu1 %v1824_v41, %s4126_s9  ;;  %2336 = vrot.lane.b32.xlu0 %v1861_v33, %s4129_s13  ;;  %v628_v47 = vmax.f32 %v528_v55, 0.0  ;;  %v1422_v37 = vshll.u32 %v4798_v61, 16  ;;  %v2238_v44 = vrot.slane %v1836_v46, 1  ;;  %v1900_v27 = vshll.u32 %v4705_v32, 16 }
  0xfe   : > { %v4836_v28 = vpack.c.bf16 %v630_v58, %v629_v39  ;;  %v4842_v17 = vsel %vm1776_vm15, %v4714_v1, 0  ;;  %vm6517_vm2 = vcmp.ne.s16.totalorder %v4628_v11, 0  ;;  %v4851_v39 = vsel %vm1777_vm4, %v4707_v40, 0 }
  0xff   : > { %6611 = vst [vmem:[#allocation20_spill] sm:$0xff] %v4842_v17  ;;  %v4845_v41 = vpack.c.bf16 %v628_v47, %v627_v0  ;;  %v3948_v55 = vpop.f32.mrb[12].mxu0  ;;  %v589_v46 = vadd.f32 %v4637_v35, %v588_v16  ;;  %v1784_v0 = vsel %vm1768_vm13, %v4712_v45, 0  ;;  %v4860_v47 = vrot.slane %v1892_v9, 1 }
 0x100   : > { %v4854_v58 = vpop.f32.mrb[12].mxu1  ;;  %v549_v33 = vadd.f32 %v3948_v55, %v4637_v35  ;;  %v540_v15 = vpop.f32.mrb[13].mxu0  ;;  %v4865_v59 = vsel %vm1769_vm9, %v4705_v32, 0  ;;  %vm6514_vm10 = vcmp.ne.s16.totalorder %v4622_v6, 0  ;;  %v6612_v9 = vrot.slane %v4807_v53, 1 }
 0x101   : > { %v4869_v16 = vpop.f32.mrb[13].mxu1  ;;  %v4872_v55 = vadd.f32 %v4637_v35, %v540_v15  ;;  %v3949_v30 = vpop.f32.mrb[14].mxu0  ;;  %2270 = vrot.lane.b32.xlu0 %v2238_v44, %s4131_s15  ;;  %vm1771_vm1 = vcmp.ne.s16.totalorder %v4669_v36, 0  ;;  %v4882_v10 = vrot.slane %v1422_v37, 1  ;;  %v4885_v15 = vadd.s32 232, %v4235_v20 }
 0x102   : > { %2435 = vrot.lane.b32.xlu1 %v6612_v9, %s4130_s14  ;;  %v4880_v61 = vpop.f32.mrb[14].mxu1  ;;  %v633_v32 = vmax.f32 %v549_v33, 0.0  ;;  %v552_v60 = vadd.f32 %v3949_v30, %v4637_v35  ;;  %v4888_v49 = vrot.slane %v1900_v27, 1  ;;  %v4891_v53 = vpop.f32.mrb[15].mxu0  ;;  %v6615_v14 = vrot.slane %v4826_v7, 1 }
 0x103   : > { %6613 = vst [vmem:[#allocation21_spill] sm:$0xff] %v4882_v10  ;;  %v4893_v62 = vpop.f32.mrb[15].mxu1  ;;  %v2064_v37 = vrot.slane %v1784_v0, 1  ;;  %v1896_v20 = vshrl.u32 %v4712_v45, 16  ;;  %vm6519_vm5 = vcmp.ne.s16.totalorder %v4662_v29, 0  ;;  %v1895_v27 = vsel %vm1317_vm11, %v4229_v18, %v4860_v47 }
 0x104   : > { %6614 = vst [vmem:[#allocation22_spill] sm:$0xff] %v4888_v49  ;;  %v2240_v24 = vsel %vm2062_vm7, %v2238_v44, %v6615_v14  ;;  %v634_v30 = vmax.f32 %v552_v60, 0.0  ;;  %v645_v33 = vmax.f32 %v4833_v31, 0.0  ;;  %v1956_v9 = vshll.u32 %v4714_v1, 16 }
 0x105   : > { %2272 = vrot.lane.b32.xlu0 %v2240_v24, %s4131_s15  ;;  %v1898_v14 = vor.u32 %v1896_v20, %v4860_v47  ;;  %v643_v44 = vmax.f32 %v589_v46, 0.0  ;;  %v600_v60 = vadd.f32 %v4795_v21, %v4637_v35  ;;  %v592_v0 = vadd.f32 %v4637_v35, %v4809_v48 }
 0x106   : > { %2355 = vrot.lane.b32.xlu1 %v4888_v49, %s4132_s16  ;;  %v4915_v31 = vpack.c.bf16 %v634_v30, %v633_v32  ;;  %v4920_v13 = vsel %vm1317_vm11, %v4789_v38, %v4811_v63  ;;  %v4925_v24 = vsel %vm1317_vm11, %v4801_v54, %v4882_v10  ;;  %v6617_v46 = vrot.slane %v4851_v39, 1 }
 0x107   : > { %v6618_v21 = vrot.slane %v4842_v17, 1  ;;  %v2065_v32 = vsel %vm2062_vm7, %v4229_v18, %v2064_v37  ;;  %v646_v30 = vmax.f32 %v600_v60, 0.0  ;;  %v4060_v38 = vpack.i.bf16 %v4229_v18, %v1895_v27 }
 0x108   : > { %6616 = vst [vmem:[#allocation23_spill] sm:$0xff] %v4915_v31  ;;  %v644_v31 = vmax.f32 %v592_v0, 0.0  ;;  %v6619_v63 = vrot.slane %v4865_v59, 1  ;;  %v4939_v10 = vrot.slane %v1956_v9, 1  ;;  %v1960_v20 = vshrl.u32 %v4714_v1, 16 }
 0x109   : > { %v2083_v48 = vsel %vm2062_vm7, %v6618_v21, %v6617_v46  ;;  %v4946_v46 = vsel %vm1317_vm11, %v1898_v14, %v4888_v49  ;;  %v4951_v27 = vsel %vm6517_vm2, %v4714_v1, 0  ;;  %v4953_v60 = vpack.c.bf16 %v646_v30, %v645_v33 }
 0x10a   : > { %v2067_v54 = vsel %vm2062_vm7, %v2064_v37, %v6619_v63  ;;  %6620 = vst [vmem:[#allocation24_spill] sm:$0xff] %v4939_v10  ;;  %2116 = vrot.lane.b32.xlu0 %v2083_v48, %s4127_s10  ;;  %2098 = vrot.lane.b32.xlu1 %v2065_v32, %s4127_s10  ;;  %6621 = vst [vmem:[#allocation25_spill] sm:$0xff] %v4951_v27  ;;  %v4955_v63 = vpack.c.bf16 %v644_v31, %v643_v44  ;;  %v1964_v37 = vshll.u32 %v4707_v40, 16 }
 0x10b   : > { %v4962_v0 = vsel %vm1768_vm13, %v4768_v42, 0  ;;  %v4967_v14 = vsel %vm1769_vm9, %v4764_v57, 0  ;;  %v4972_v33 = vsel %vm6514_vm10, %v4707_v40, 0  ;;  %v4979_v22 = vsel %vm1770_vm8, %v4768_v42, 0 }
 0x10c   : > { %6622 = vst [vmem:[#allocation26_spill] sm:$0xff] %v4962_v0  ;;  %6623 = vst [vmem:[#allocation27_spill] sm:$0xff] %v4972_v33  ;;  %v6500_v44 = vrot.slane %v4962_v0, 1  ;;  %v6501_v31 = vrot.slane %v4967_v14, 1  ;;  %v1962_v21 = vor.u32 %v1960_v20, %v4939_v10  ;;  %v4986_v32 = vsel %vm6514_vm10, %v4714_v1, 0 }
 0x10d   : > { %v4991_v30 = vsel %vm1771_vm1, %v4764_v57, 0  ;;  %v4998_v20 = vsel %vm1769_vm9, %v4768_v42, 0  ;;  %v6505_v48 = vrot.slane %v4979_v22, 1  ;;  %v5009_v10 = vrot.slane %v1964_v37, 1 }
 0x10e   : > { %4061 = vrot.lane.b32.xlu0 %v4060_v38, %s4133_s17  ;;  %2100 = vrot.lane.b32.xlu1 %v2067_v54, %s4127_s10  ;;  %v5005_v9 = vsel %vm2062_vm7, %v6500_v44, %v6501_v31  ;;  %v6506_v18 = vrot.slane %v4991_v30, 1  ;;  %v5015_v5 = vsel %vm1776_vm15, %v4707_v40, 0  ;;  %v1794_v54 = vsel %vm6519_vm5, %v4770_v19, 0 }
 0x10f   : > { %6624 = vst [vmem:[#allocation28_spill] sm:$0xff] %v5009_v10  ;;  %vm1439_vm13 = vcmp.ne.s16.totalorder %v4654_v51, 0  ;;  %v5032_v31 = vsel %vm1779_vm0, %v4762_v25, 0  ;;  %v5037_v38 = vsel %vm1770_vm8, %v4764_v57, 0  ;;  %vm1447_vm9 = vcmp.ne.s16.totalorder %v4658_v26, 0 }
 0x110   : > { %v5027_v37 = vsel %vm2062_vm7, %v6505_v48, %v6506_v18  ;;  %v2084_v40 = vrot.slane %v1794_v54, 1  ;;  %v1908_v17 = vshll.u32 %v4768_v42, 16  ;;  %v5052_v44 = vsel %vm1776_vm15, %v4770_v19, 0 }
 0x111   : > { %6625 = vst [vmem:[#allocation29_spill] sm:$0xff] %v5027_v37  ;;  %6626 = vst [vmem:[#allocation30_spill] sm:$0xff] %v5052_v44  ;;  %v5057_v54 = vsel %vm1777_vm4, %v4762_v25, 0  ;;  %v6627_v48 = vrot.slane %v4972_v33, 1  ;;  %v6628_v49 = vrot.slane %v4951_v27, 1  ;;  %v5067_v18 = vsel %vm1777_vm4, %v4770_v19, 0 }
 0x112   : > { %2015 = vrot.lane.b32.xlu0 %v4946_v46, %s4133_s17  ;;  %2188 = vrot.lane.b32.xlu1 %v4860_v47, %s4134_s18  ;;  %v6629_v12 = vrot.slane %v5032_v31, 1  ;;  %v6631_v37 = vrot.slane %v5037_v38, 1  ;;  %v6632_v6 = vrot.slane %v4998_v20, 1  ;;  %v1972_v27 = vshll.u32 %v4770_v19, 16 }
 0x113   : > { %v2420_v47 = vsel %vm2062_vm7, %v6628_v49, %v6627_v48  ;;  %v5083_v49 = vsel %vm1317_vm11, %v1962_v21, %v5009_v10  ;;  %vm1440_vm15 = vcmp.ne.s16.totalorder %v4703_v56, 0  ;;  %vm6520_vm4 = vcmp.ne.s16.totalorder %v4775_v4, 0 }
 0x114   : > { %v5072_v0 = vsel %vm2062_vm7, %v2084_v40, %v6629_v12  ;;  %v5079_v33 = vsel %vm2062_vm7, %v6632_v6, %v6631_v37  ;;  %vm1772_vm12 = vcmp.ne.s16.totalorder %v4760_v23, 0  ;;  %v5091_v12 = vrot.slane %v1908_v17, 1 }
 0x115   : > { %6630 = vst [vmem:[#allocation31_spill] sm:$0xff] %v5072_v0  ;;  %6633 = vst [vmem:[#allocation32_spill] sm:$0xff] %v5079_v33  ;;  %v6635_v6 = vrot.slane %v4851_v39, 1  ;;  %v5101_v21 = vsel %vm6519_vm5, %v4762_v25, 0  ;;  %v1912_v8 = vshrl.u32 %v4768_v42, 16  ;;  %v6637_v17 = vrot.slane %v5015_v5, 1 }
 0x116   : > { %6634 = vst [vmem:[#allocation33_spill] sm:$0xff] %v5091_v12  ;;  %2371 = vrot.lane.b32.xlu0 %v5083_v49, %s4132_s16  ;;  %2451 = vrot.lane.b32.xlu1 %v2420_v47, %s4130_s14  ;;  %v6638_v48 = vrot.slane %v4986_v32, 1  ;;  %v2259_v33 = vrot.slane %v5101_v21, 1  ;;  %vm1773_vm10 = vcmp.ne.s16.totalorder %v4666_v50, 0  ;;  %v1916_v0 = vshll.u32 %v4764_v57, 16  ;;  %v6689_v50 = vld [vmem:[#allocation10_spill] sm:$0xff] }
 0x117   : > { %v5096_v37 = vsel %vm2062_vm7, %v6635_v6, %v2084_v40  ;;  %v6639_v6 = vrot.slane %v5057_v54, 1  ;;  %v1914_v47 = vor.u32 %v1912_v8, %v5091_v12  ;;  %v5128_v40 = vrot.slane %v1972_v27, 1 }
 0x118   : > { %6636 = vst [vmem:[#allocation34_spill] sm:$0xff] %v5096_v37  ;;  %v2256_v39 = vsel %vm2062_vm7, %v6638_v48, %v6637_v17  ;;  %v6640_v37 = vrot.slane %v5052_v44, 1  ;;  %v544_v48 = vadd.f32 %v4637_v35, %v4891_v53  ;;  %v613_v17 = vadd.f32 %v4854_v58, %v4637_v35 }
 0x119   : > { %v6642_v44 = vrot.slane %v5067_v18, 1  ;;  %v605_v21 = vadd.f32 %v4637_v35, %v4869_v16  ;;  %v1976_v8 = vshrl.u32 %v4770_v19, 16  ;;  %v1980_v53 = vshll.u32 %v4762_v25, 16 }
 0x11a   : > { %v5118_v10 = vsel %vm2062_vm7, %v6640_v37, %v6639_v6  ;;  %v1918_v6 = vrot.slane %v1916_v0, 1  ;;  %v649_v12 = vmax.f32 %v613_v17, 0.0  ;;  %2031 = vrot.lane.b32.xlu0 %v5083_v49, %s4133_s17  ;;  %2288 = vrot.lane.b32.xlu1 %v2256_v39, %s4131_s15  ;;  %vm1438_vm2 = vcmp.ne.s16.totalorder %v4631_v2, 0 }
 0x11b   : > { %6641 = vst [vmem:[#allocation35_spill] sm:$0xff] %v5118_v10  ;;  %v5133_v37 = vsel %vm2062_vm7, %v6642_v44, %v2259_v33  ;;  %v632_v10 = vmax.f32 %v544_v48, 0.0  ;;  %v647_v58 = vmax.f32 %v605_v21, 0.0  ;;  %v1978_v27 = vor.u32 %v1976_v8, %v5128_v40 }
 0x11c   : > { %6643 = vst [vmem:[#allocation36_spill] sm:$0xff] %v5133_v37  ;;  %v616_v16 = vadd.f32 %v4880_v61, %v4637_v35  ;;  %v608_v0 = vadd.f32 %v4637_v35, %v4893_v62  ;;  %vm1780_vm14 = vcmp.ne.s16.totalorder %v4779_v43, 0  ;;  %v1819_v44 = vsel %vm1439_vm13, %v4764_v57, 0  ;;  %v6713_v51 = vld [vmem:[#allocation32_spill] sm:$0xff] }
 0x11d   : > { %v5153_v48 = vsel %vm1317_vm11, %v1914_v47, %v1918_v6  ;;  %v6645_v39 = vmax.f32 %v4872_v55, 0.0  ;;  %v5159_v21 = vrot.slane %v1980_v53, 1  ;;  %v1827_v61 = vsel %vm1447_vm9, %v4762_v25, 0  ;;  %v6722_v56 = vld [vmem:[#allocation33_spill] sm:$0xff] }
 0x11e   : > { %6644 = vst [vmem:[#allocation37_spill] sm:$0xff] %v5153_v48  ;;  %vm1446_vm5 = vcmp.ne.s16.totalorder %v4642_v52, 0  ;;  %v650_v62 = vmax.f32 %v616_v16, 0.0  ;;  %v648_v35 = vmax.f32 %v608_v0, 0.0  ;;  %v5168_v8 = vsel %vm1439_vm13, %v4845_v41, 0  ;;  %2154 = vrot.lane.b32.xlu0 %v1819_v44, %s4126_s9  ;;  %2190 = vrot.lane.b32.xlu1 %v4946_v46, %s4134_s18 }
 0x11f   : > { %v5157_v17 = vpack.c.bf16 %v632_v10, %v6645_v39  ;;  %6646 = vst [vmem:[#allocation38_spill] sm:$0xff] %v5168_v8  ;;  %v5172_v55 = vsel %vm1317_vm11, %v1978_v27, %v5159_v21  ;;  %v5177_v10 = vsel %vm1440_vm15, %v4836_v28, 0  ;;  %v5182_v47 = vsel %vm1447_vm9, %v4955_v63, 0 }
 0x120   : > { %6647 = vst [vmem:[#allocation39_spill] sm:$0xff] %v5172_v55  ;;  %6648 = vst [vmem:[#allocation40_spill] sm:$0xff] %v5177_v10  ;;  %v5187_v53 = vsel %vm6520_vm4, %v4953_v60, 0  ;;  %v5192_v27 = vpack.c.bf16 %v650_v62, %v649_v12  ;;  %v5194_v16 = vpack.c.bf16 %v648_v35, %v647_v58  ;;  %v1840_v0 = vsel %vm1771_vm1, %v4845_v41, 0 }
 0x121   : > { %6649 = vst [vmem:[#allocation41_spill] sm:$0xff] %v5182_v47  ;;  %6650 = vst [vmem:[#allocation42_spill] sm:$0xff] %v5187_v53  ;;  %v5202_v39 = vsel %vm1440_vm15, %v4845_v41, 0  ;;  %v2245_v47 = vrot.slane %v1840_v0, 1  ;;  %v1788_v44 = vsel %vm1772_vm12, %v4845_v41, 0  ;;  %v5210_v46 = vsel %vm1773_vm10, %v4836_v28, 0 }
 0x122   : > { %6651 = vst [vmem:[#allocation43_spill] sm:$0xff] %v5192_v27  ;;  %6652 = vst [vmem:[#allocation44_spill] sm:$0xff] %v5202_v39  ;;  %v5215_v12 = vsel %vm6520_vm4, %v4955_v63, 0  ;;  %v2072_v58 = vrot.slane %v1788_v44, 1  ;;  %v5221_v35 = vsel %vm1779_vm0, %v4955_v63, 0  ;;  %v1872_v0 = vsel %vm1770_vm8, %v4845_v41, 0  ;;  %2170 = vrot.lane.b32.xlu0 %v1827_v61, %s4126_s9  ;;  %2206 = vrot.lane.b32.xlu1 %v5083_v49, %s4134_s18 }
 0x123   : > { %6653 = vst [vmem:[#allocation45_spill] sm:$0xff] %v5215_v12  ;;  %v6654_v39 = vrot.slane %v5037_v38, 1  ;;  %v6524_v10 = vrot.slane %v5221_v35, 1  ;;  %v2409_v12 = vrot.slane %v1872_v0, 1  ;;  %v6656_v44 = vand.u32 15, %v4885_v15 }
 0x124   : > { %v1863_v34 = vsel %vm1445_vm6, %v4770_v19, 0  ;;  %v6658_v38 = vrot.slane %v5210_v46, 1  ;;  %v5248_v15 = vsel %vm1771_vm1, %v4836_v28, 0  ;;  %v1920_v61 = vshrl.u32 %v4764_v57, 16 }
 0x125   : > { %v5229_v53 = vsel %vm2062_vm7, %v6654_v39, %v2245_v47  ;;  %vm1145_vm4 = vcmp.lt.s32.totalorder %v6656_v44, 15  ;;  %v1856_v49 = vsel %vm1438_vm2, %v4764_v57, 0  ;;  %v5257_v0 = vsel %vm2062_vm7, %v2259_v33, %v6524_v10 }
 0x126   : > { %6655 = vst [vmem:[#allocation46_spill] sm:$0xff] %v5229_v53  ;;  %v5243_v39 = vsel %vm2062_vm7, %v2072_v58, %v6658_v38  ;;  %vm1560_vm8 = vmpackc.low %vm1145_vm4, %vm1145_vm4  ;;  %v6660_v44 = vrot.slane %v4967_v14, 1  ;;  %v6663_v53 = vld [vmem:[#allocation4_spill] sm:$0xff]  ;;  %v6525_v27 = vrot.slane %v5248_v15, 1  ;;  %v1922_v55 = vor.u32 %v1920_v61, %v1918_v6  ;;  %2340 = vrot.lane.b32.xlu0 %v1863_v34, %s4129_s13  ;;  %2326 = vrot.lane.b32.xlu1 %v1856_v49, %s4129_s13 }
 0x127   : > { %6659 = vst [vmem:[#allocation8_spill] sm:$0xff] %v5243_v39  ;;  %v6662_v39 = vmov 0   ;;  %v1924_v48 = vshll.u32 %v4845_v41, 16  ;;  %v1864_v37 = vsel %vm1446_vm5, %v4762_v25, 0  ;;  %v1796_v14 = vsel %vm1780_vm14, %v4955_v63, 0 }
 0x128   : > { %v5262_v38 = vsel %vm2062_vm7, %v6660_v44, %v2409_v12  ;;  %v1592_v36 = vsel %vm1560_vm8, 65537, %v6662_v39  ;;  %v6664_v33 = vrot.slane %v4991_v30, 1  ;;  %v5289_v10 = vsel %vm2062_vm7, %v2409_v12, %v6525_v27  ;;  %v6672_v27 = vld [vmem:[#allocation13_spill] sm:$0xff] }
 0x129   : > { %6661 = vst [vmem:[#allocation47_spill] sm:$0xff] %v5262_v38  ;;  %v3771_v8 = vcombine.low %v6663_v53, %v1592_v36  ;;  %v5282_v36 = vsel %vm1772_vm12, %v4836_v28, 0  ;;  %v1926_v30 = vrot.slane %v1924_v48, 1  ;;  %v1855_v34 = vsel %vm1437_vm3, %v4768_v42, 0 }
 0x12a   : > { %v5277_v44 = vsel %vm2062_vm7, %v6664_v33, %v2072_v58  ;;  %v6666_v58 = vrot.slane %v4998_v20, 1  ;;  %v6667_v33 = vrot.slane %v4826_v7, 1  ;;  %vm1441_vm1 = vcmp.ne.s16.totalorder %v4920_v13, 0  ;;  %2342 = vrot.lane.b32.xlu1 %v1864_v37, %s4129_s13 }
 0x12b   : > { %6665 = vst [vmem:[#allocation4_spill] sm:$0xff] %v5277_v44  ;;  %v1753_v6 = vshrl.u32 %v3771_v8, 16  ;;  %v1756_v61 = vshll.u32 %v3771_v8, 16  ;;  %vm1449_vm4 = vcmp.ne.s16.totalorder %v4925_v24, 0  ;;  %v2247_v8 = vrot.slane %v5282_v36, 1 }
 0x12c   : > { %v2242_v44 = vsel %vm2062_vm7, %v6667_v33, %v6666_v58  ;;  %v5305_v48 = vsel %vm1437_vm3, %v4712_v45, 0  ;;  %v1818_v7 = vsel %vm1438_vm2, %v4768_v42, 0  ;;  %v2088_v12 = vrot.slane %v1796_v14, 1 }
 0x12d   : > { %6669 = vst [vmem:[#allocation5_spill] sm:$0xff] %v5305_v48  ;;  %v5310_v20 = vrot.slane %v1753_v6, 7  ;;  %v5313_v49 = vsel %vm1317_vm11, %v1922_v55, %v1926_v30  ;;  %v5316_v58 = vsel %vm2062_vm7, %v2245_v47, %v2247_v8  ;;  %v1984_v36 = vshrl.u32 %v4762_v25, 16  ;;  %2274 = vrot.lane.b32.xlu0 %v2242_v44, %s4131_s15 }
 0x12e   : > { %v1988_v33 = vshll.u32 %v4955_v63, 16  ;;  %vm6670_vm3 = vcmp.ne.s16.totalorder %v4662_v29, 0  ;;  %v5329_v55 = vsel %vm1779_vm0, %v4953_v60, 0  ;;  %v5334_v47 = vsel %vm1445_vm6, %v4714_v1, 0  ;;  %2324 = vrot.lane.b32.xlu1 %v1855_v34, %s4129_s13 }
 0x12f   : > { %v1880_v45 = vsel %vm6670_vm3, %v4955_v63, 0  ;;  %v1758_v38 = vor.u32 %v1756_v61, %v5310_v20  ;;  %6671 = vst [vmem:[#allocation48_spill] sm:$0xff] %v5334_v47  ;;  %v1986_v29 = vor.u32 %v1984_v36, %v5159_v21  ;;  %v6526_v44 = vrot.slane %v5329_v55, 1 }
 0x130   : > { %v2425_v14 = vrot.slane %v1880_v45, 1  ;;  %v1990_v6 = vrot.slane %v1988_v33, 1  ;;  %v1928_v37 = vshrl.u32 %v4845_v41, 16  ;;  %vm6673_vm8 = vsmask.f32 256 }
 0x131   : > { %v5341_v61 = vsel %vm6673_vm8, %v6672_v27, %v1758_v38  ;;  %v6674_v3 = vrot.slane %v5057_v54, 1  ;;  %v1932_v62 = vshll.u32 %v4836_v28, 16  ;;  %v6675_v1 = vrot.slane %v5032_v31, 1  ;;  %2439 = vrot.lane.b32.xlu0 %v5005_v9, %s4130_s14 }
 0x132   : > { %vm1781_vm0 = vcmp.ne.s16.totalorder %v5341_v61, 0  ;;  %v5356_v36 = vsel %vm1317_vm11, %v1986_v29, %v1990_v6  ;;  %v5361_v27 = vsel %vm2062_vm7, %v2425_v14, %v6526_v44  ;;  %v1930_v54 = vor.u32 %v1928_v37, %v1926_v30  ;;  %2152 = vrot.lane.b32.xlu1 %v1818_v7, %s4126_s9  ;;  %v5689_v61 = vpop.permute.xlu0 %2146 }
 0x133   : > { %v5346_v45 = vsel %vm2062_vm7, %v6674_v3, %v2425_v14  ;;  %v5352_v21 = vsel %vm2062_vm7, %v6675_v1, %v2088_v12  ;;  %v5369_v31 = vsel %vm1781_vm0, %v4953_v60, 0  ;;  %v1934_v33 = vrot.slane %v1932_v62, 1 }
 0x134   : > { %6676 = vst [vmem:[#allocation13_spill] sm:$0xff] %v5352_v21  ;;  %v1849_v38 = vsel %vm1780_vm14, %v4953_v60, 0  ;;  %v1992_v29 = vshrl.u32 %v4955_v63, 16  ;;  %v6677_v14 = vrot.slane %v4979_v22, 1  ;;  %v6678_v30 = vrot.slane %v4865_v59, 1 }
 0x135   : > { %v6527_v34 = vrot.slane %v5369_v31, 1  ;;  %v2263_v37 = vrot.slane %v1849_v38, 1  ;;  %v1996_v3 = vshll.u32 %v4953_v60, 16  ;;  %v5383_v1 = vsel %vm1317_vm11, %v1930_v54, %v1934_v33 }
 0x136   : > { %v2069_v9 = vsel %vm2062_vm7, %v6678_v30, %v6677_v14  ;;  %v1994_v62 = vor.u32 %v1992_v29, %v1990_v6  ;;  %v5388_v44 = vsel %vm1441_vm1, %v5157_v17, 0  ;;  %v5393_v59 = vsel %vm1449_vm4, %v5194_v16, 0  ;;  %v6683_v29 = vld [vmem:[#allocation16_spill] sm:$0xff]  ;;  %v6684_v30 = vld [vmem:[#allocation23_spill] sm:$0xff] }
 0x137   : > { %6679 = vst [vmem:[#allocation49_spill] sm:$0xff] %v5388_v44  ;;  %6680 = vst [vmem:[#allocation50_spill] sm:$0xff] %v5393_v59  ;;  %v5398_v22 = vsel %vm2062_vm7, %v2088_v12, %v6527_v34  ;;  %v6681_v38 = vrot.slane %v5221_v35, 1  ;;  %v1998_v6 = vrot.slane %v1996_v3, 1  ;;  %v1362_v14 = vshrl.u32 %v6683_v29, 16  ;;  %2102 = vrot.lane.b32.xlu0 %v2069_v9, %s4127_s10  ;;  %v6688_v34 = vld [vmem:[#allocation19_spill] sm:$0xff] }
 0x138   : > { %vm6685_vm6 = vcmp.ne.s16.totalorder %v4628_v11, 0  ;;  %v5416_v12 = vsel %vm1773_vm10, %v5157_v17, 0  ;;  %v1875_v35 = vsel %vm1773_vm10, %v6684_v30, 0  ;;  %v1826_v29 = vsel %vm1446_vm5, %v4770_v19, 0 }
 0x139   : > { %v5403_v54 = vsel %vm2062_vm7, %v6681_v38, %v2263_v37  ;;  %v5411_v48 = vsel %vm6685_vm6, %v6684_v30, 0  ;;  %vm6686_vm3 = vmmov %vm6685_vm6  ;;  %v5425_v7 = vsel %vm1317_vm11, %v1994_v62, %v1998_v6  ;;  %v6531_v38 = vrot.slane %v5416_v12, 1  ;;  %2168 = vrot.lane.b32.xlu1 %v1826_v29, %s4126_s9 }
 0x13a   : > { %6682 = vst [vmem:[#allocation51_spill] sm:$0xff] %v5403_v54  ;;  %v1790_v9 = vsel %vm6686_vm3, %v5157_v17, 0  ;;  %6687 = vst [vmem:[#allocation16_spill] sm:$0xff] %v5425_v7  ;;  %v6532_v3 = vrot.slane %v5411_v48, 1  ;;  %v1364_v2 = vor.u32 %v1362_v14, %v6688_v34  ;;  %v2415_v47 = vrot.slane %v1875_v35, 1  ;;  %v6694_v34 = vld [vmem:[#allocation29_spill] sm:$0xff] }
 0x13b   : > { %vm6690_vm10 = vcmp.ne.s16.totalorder %v6689_v50, 0  ;;  %v6691_v11 = vrot.slane %v4986_v32, 1  ;;  %v5446_v44 = vsel %vm2062_vm7, %v2247_v8, %v6531_v38  ;;  %v2076_v52 = vrot.slane %v1790_v9, 1  ;;  %2104 = vrot.lane.b32.xlu0 %v6694_v34, %s4127_s10  ;;  %v6695_v14 = vld [vmem:[#allocation14_spill] sm:$0xff]  ;;  %v6696_v32 = vld [vmem:[#allocation25_spill] sm:$0xff] }
 0x13c   : > { %v1791_v59 = vsel %vm6690_vm10, %v6684_v30, 0  ;;  %6693 = vst [vmem:[#allocation10_spill] sm:$0xff] %v5446_v44  ;;  %v1904_v35 = vshrl.u32 %v6695_v14, 16  ;;  %v6697_v50 = vrot.slane %v6696_v32, 1  ;;  %v1874_v8 = vsel %vm1772_vm12, %v5157_v17, 0  ;;  %v6701_v34 = vld [vmem:[#allocation26_spill] sm:$0xff] }
 0x13d   : > { %v5441_v62 = vsel %vm2062_vm7, %v6532_v3, %v6691_v11  ;;  %v2078_v7 = vrot.slane %v1791_v59, 1  ;;  %v5460_v11 = vsel %vm1781_vm0, %v5194_v16, 0  ;;  %v6699_v59 = vrot.slane %v5067_v18, 1  ;;  %v6703_v38 = vld [vmem:[#allocation18_spill] sm:$0xff] }
 0x13e   : > { %6692 = vst [vmem:[#allocation19_spill] sm:$0xff] %v5441_v62  ;;  %v5455_v54 = vsel %vm2062_vm7, %v2415_v47, %v6697_v50  ;;  %v6700_v9 = vrot.slane %v5015_v5, 1  ;;  %v6702_v32 = vrot.slane %v6701_v34, 1  ;;  %v6704_v50 = vrot.slane %v6703_v38, 1  ;;  %v6707_v62 = vld [vmem:[#allocation22_spill] sm:$0xff] }
 0x13f   : > { %6698 = vst [vmem:[#allocation29_spill] sm:$0xff] %v5455_v54  ;;  %v5476_v14 = vsel %vm2062_vm7, %v2076_v52, %v2078_v7  ;;  %v6705_v54 = vld [vmem:[#allocation20_spill] sm:$0xff]  ;;  %v1906_v18 = vor.u32 %v1904_v35, %v6707_v62  ;;  %v6533_v5 = vrot.slane %v5460_v11, 1  ;;  %v2413_v21 = vrot.slane %v1874_v8, 1 }
 0x140   : > { %v2258_v29 = vsel %vm2062_vm7, %v6700_v9, %v6699_v59  ;;  %v2406_v3 = vsel %vm2062_vm7, %v6704_v50, %v6702_v32  ;;  %v6706_v44 = vrot.slane %v6705_v54, 1  ;;  %v1936_v59 = vshrl.u32 %v4836_v28, 16  ;;  %v6708_v9 = vld [vmem:[#allocation6_spill] sm:$0xff] }
 0x141   : > { %v5488_v38 = vsel %vm1317_vm11, %v1364_v2, %v6708_v9  ;;  %v1940_v34 = vshll.u32 %v5157_v17, 16  ;;  %v6709_v32 = vrot.slane %v5210_v46, 1  ;;  %2290 = vrot.lane.b32.xlu0 %v2258_v29, %s4131_s15  ;;  %2437 = vrot.lane.b32.xlu1 %v2406_v3, %s4130_s14  ;;  %v6710_v2 = vrot.slane %v5248_v15, 1 }
 0x142   : > { %v5481_v23 = vsel %vm2062_vm7, %v2078_v7, %v6706_v44  ;;  %v2000_v44 = vshrl.u32 %v4953_v60, 16  ;;  %v5502_v7 = vsel %vm2062_vm7, %v2263_v37, %v6533_v5  ;;  %v1938_v46 = vor.u32 %v1936_v59, %v1934_v33  ;;  %v6711_v59 = vld [vmem:[#allocation3_spill] sm:$0xff] }
 0x143   : > { %v5494_v54 = vsel %vm2062_vm7, %v6709_v32, %v2076_v52  ;;  %v5507_v62 = vsel %vm2062_vm7, %v6710_v2, %v2413_v21  ;;  %v2004_v52 = vshll.u32 %v5194_v16, 16  ;;  %v5510_v35 = vrot.slane %v1940_v34, 1  ;;  %v6716_v34 = vld [vmem:[#allocation27_spill] sm:$0xff] }
 0x144   : > { %v5513_v8 = vsel %vm2062_vm7, %v2413_v21, %v2415_v47  ;;  %v2002_v29 = vor.u32 %v2000_v44, %v1998_v6  ;;  %v1948_v3 = vshll.u32 %v6684_v30, 16  ;;  %v1952_v37 = vshrl.u32 %v6684_v30, 16 }
 0x145   : > { %v5516_v50 = vrot.slane %v2004_v52, 1  ;;  %v5522_v15 = vsel %vm1447_vm9, %v4770_v19, 0  ;;  %v5527_v33 = vsel %vm1439_vm13, %v4768_v42, 0  ;;  %v5531_v47 = vsel %vm1317_vm11, %v1938_v46, %v5510_v35  ;;  %v6712_v19 = vld [vmem:[#allocation31_spill] sm:$0xff]  ;;  %2276 = vrot.lane.b32.xlu1 %v6713_v51, %s4131_s15  ;;  %v6714_v42 = vld [vmem:[#allocation30_spill] sm:$0xff] }
 0x146   : > { %v5533_v21 = vrot.slane %v1948_v3, 1  ;;  %v5538_v6 = vsel %vm1780_vm14, %v5194_v16, 0  ;;  %v699_v26 = vadd.s32 248, %v6711_v59  ;;  %2120 = vrot.lane.b32.xlu0 %v6712_v19, %s4127_s10  ;;  %v6715_v9 = vrot.slane %v6714_v42, 1 }
 0x147   : > { %v6717_v32 = vrot.slane %v6716_v34, 1  ;;  %v5552_v2 = vsel %vm1317_vm11, %v2002_v29, %v5516_v50  ;;  %v6534_v43 = vrot.slane %v5538_v6, 1  ;;  %v698_v46 = vadd.s32 240, %v6711_v59 }
 0x148   : > { %vm1442_vm14 = vcmp.ne.s16.totalorder %v5488_v38, 0  ;;  %v1954_v52 = vor.u32 %v1952_v37, %v5533_v21  ;;  %v921_v3 = vand.u32 15, %v699_v26  ;;  %v5561_v19 = vsel %vm1440_vm15, %v4764_v57, 0  ;;  %v6723_v26 = vld [vmem:[#allocation24_spill] sm:$0xff] }
 0x149   : > { %v2422_v44 = vsel %vm2062_vm7, %v6717_v32, %v6715_v9  ;;  %v6718_v51 = vrot.slane %v5329_v55, 1  ;;  %v914_v42 = vand.u32 15, %v698_v46  ;;  %vm6719_vm12 = vcmp.ne.s16.totalorder %v4775_v4, 0 }
 0x14a   : > { %v5573_v59 = vsel %vm6719_vm12, %v4762_v25, 0  ;;  %v5578_v37 = vsel %vm1441_vm1, %v4845_v41, 0  ;;  %v1911_v57 = vsel %vm1317_vm11, %v1906_v18, %v6722_v56  ;;  %v5584_v55 = vsel %vm1317_vm11, %v1954_v52, %v6723_v26  ;;  %2453 = vrot.lane.b32.xlu1 %v2422_v44, %s4130_s14  ;;  %v6729_v44 = vld [vmem:[#allocation17_spill] sm:$0xff]  ;;  %v6731_v56 = vld [vmem:[#allocation28_spill] sm:$0xff] }
 0x14b   : > { %v5568_v29 = vsel %vm2062_vm7, %v6718_v51, %v6534_v43  ;;  %6720 = vst [vmem:[#allocation25_spill] sm:$0xff] %v5573_v59  ;;  %6721 = vst [vmem:[#allocation26_spill] sm:$0xff] %v5578_v37  ;;  %vm1147_vm13 = vcmp.lt.s32.totalorder %v921_v3, 15  ;;  %v5589_v9 = vsel %vm1449_vm4, %v4955_v63, 0  ;;  %2357 = vrot.lane.b32.xlu0 %v1911_v57, %s4132_s16  ;;  %v6725_v25 = vrot.slane %v5411_v48, 1  ;;  %v6728_v63 = vld [vmem:[#allocation15_spill] sm:$0xff] }
 0x14c   : > { %6724 = vst [vmem:[#allocation18_spill] sm:$0xff] %v5589_v9  ;;  %v6726_v4 = vrot.slane %v5416_v12, 1  ;;  %vm1562_vm9 = vmpackc.low %vm1147_vm13, %vm1147_vm13  ;;  %vm1114_vm15 = vcmp.gt.s32.totalorder %v914_v42, 0  ;;  %v5603_v18 = vsel %vm1442_vm14, %v4836_v28, 0  ;;  %v1968_v34 = vshrl.u32 %v6728_v63, 16  ;;  %v6730_v3 = vld [vmem:[#allocation35_spill] sm:$0xff] }
 0x14d   : > { %6727 = vst [vmem:[#allocation20_spill] sm:$0xff] %v5603_v18  ;;  %v1594_v32 = vsel %vm1562_vm9, 65537, %v6662_v39  ;;  %vm1240_vm8 = vmpackc.low %vm1114_vm15, %vm1114_vm15  ;;  %v1426_v46 = vshrl.u32 %v6729_v44, 16  ;;  %vm6734_vm6 = vsmask.f32 256  ;;  %vm2954_vm12 = vcmask 1041408  }
 0x14e   : > { %v5598_v41 = vsel %vm2062_vm7, %v6726_v4, %v6725_v25  ;;  %v3772_v48 = vcombine.low %v6663_v53, %v1594_v32  ;;  %v1270_v12 = vsel %vm1240_vm8, 65537, %v6662_v39  ;;  %2455 = vrot.lane.b32.xlu1 %v6730_v3, %s4130_s14  ;;  %v1970_v26 = vor.u32 %v1968_v34, %v6731_v56  ;;  %v6732_v4 = vld [vmem:[#allocation21_spill] sm:$0xff]  ;;  %v4082_v34 = vld [vmem:[%s6466_s2] sm:$0xff]   ;;  %v4084_v56 = vld [vmem:[%s6466_s2 + $0x10] ss:$0 sps:$4 sm:$0x33]  }
 0x14f   : > { %v3756_v52 = vcombine.low %v1270_v12, %v6663_v53  ;;  %2017 = vrot.lane.b32.xlu0 %v1911_v57, %s4133_s17  ;;  %v1428_v5 = vor.u32 %v1426_v46, %v6732_v4  ;;  %v6733_v53 = vld [vmem:[#allocation34_spill] sm:$0xff]  ;;  %3966 = vmatprep.subr.bf16.mxu1 %v4082_v34  ;;  %v6738_v4 = vrot.slane %v5369_v31, 1  ;;  %v6740_v31 = vld [vmem:[#allocation43_spill] sm:$0xff]  ;;  %v6769_v59 = vld [vmem:[#allocation9_spill] sm:$0xff]  ;;  %vm2519_vm9 = vcmask 64512  }
 0x150   : > { %v1761_v51 = vshrl.u32 %v3772_v48, 16  ;;  %v1764_v42 = vshll.u32 %v3772_v48, 16  ;;  %v1975_v32 = vsel %vm1317_vm11, %v1970_v26, %v5128_v40  ;;  %3967 = vmatpush3.bf16.msra.mxu1 %v4082_v34  ;;  %v6739_v34 = vld [vmem:[#allocation39_spill] sm:$0xff]  ;;  %v2181_v24 = vshll.u32 %v6740_v31, 16 }
 0x151   : > { %v1430_v25 = vshll.u32 %v3756_v52, 16  ;;  %vm2554_vm15 = vcmask 97280   ;;  %vm2623_vm8 = vcmask 162816  }
 0x152   : > { %v1763_v43 = vrot.slane %v1761_v51, 7  ;;  %2118 = vrot.lane.b32.xlu1 %v6733_v53, %s4127_s10  ;;  %v1944_v51 = vshrl.u32 %v5157_v17, 16 }
 0x153   : > { %v1432_v44 = vrot.slane %v1430_v25, 1  ;;  %2208 = vrot.lane.b32.xlu0 %v1975_v32, %s4134_s18  ;;  %v6737_v25 = vld [vmem:[#allocation37_spill] sm:$0xff] }
 0x154   : > { %v1766_v12 = vor.u32 %v1764_v42, %v1763_v43  ;;  %v1946_v26 = vor.u32 %v1944_v51, %v5510_v35  ;;  %v2956_v35 = vsel %vm2954_vm12, %v4084_v56, 0  ;;  %vm1783_vm13 = vcmp.ne.s16.totalorder %v1763_v43, 0  ;;  %v5691_v43 = vpop.permute.xlu1 %2096 }
 0x155   : > { %v5622_v3 = vsel %vm1317_vm11, %v1428_v5, %v1432_v44  ;;  %v6736_v5 = vld [vmem:[#allocation36_spill] sm:$0xff]  ;;  %v1434_v51 = vshrl.u32 %v3756_v52, 16 }
 0x156   : > { %v1767_v46 = vsel %vm6734_vm6, %v5310_v20, %v1766_v12  ;;  %vm1450_vm3 = vcmp.ne.s16.totalorder %v5622_v3, 0  ;;  %2292 = vrot.lane.b32.xlu1 %v6736_v5, %s4131_s15  ;;  %v4083_v20 = vld [vmem:[%s6466_s2 + $0x8] sm:$0xff]   ;;  %v5658_v12 = vsel %vm1317_vm11, %v1946_v26, %v5533_v21  ;;  %v5672_v21 = vsel %vm1781_vm0, %v6740_v31, 0  ;;  %v6744_v52 = vld [vmem:[#allocation40_spill] sm:$0xff] }
 0x157   : > { %vm1782_vm10 = vcmp.ne.s16.totalorder %v1767_v46, 0  ;;  %v5633_v40 = vsel %vm1450_vm3, %v4953_v60, 0  ;;  %2033 = vrot.lane.b32.xlu0 %v1975_v32, %s4133_s17  ;;  %3968 = vmatprep.subr.bf16.mxu1 %v4083_v20  ;;  %6741 = vst [vmem:[#allocation6_spill] sm:$0xff] %v5672_v21  ;;  %v1821_v5 = vsel %vm1441_vm1, %v4836_v28, 0  ;;  %vm6770_vm0 = vcmp.ne.s16.totalorder %v6769_v59, 0 }
 0x158   : > { %6735 = vst [vmem:[#allocation22_spill] sm:$0xff] %v5633_v40  ;;  %v1798_v48 = vsel %vm1782_vm10, %v5194_v16, 0  ;;  %3969 = vmatpush3.bf16.msra.mxu1 %v4083_v20  ;;  %v1799_v20 = vsel %vm1783_vm13, %v6740_v31, 0  ;;  %vm6773_vm6 = vcmask 130048   ;;  %vm2693_vm13 = vcmask 228352  }
 0x159   : > { %v2092_v42 = vrot.slane %v1798_v48, 1  ;;  %4040 = vmatprep.subr.msk.bf16.mxu1 %vm2954_vm12, %v4084_v56  ;;  %v2094_v13 = vrot.slane %v1799_v20, 1  ;;  %v5702_v56 = vor.u32 %v1434_v51, %v1432_v44  ;;  %v6749_v51 = vld [vmem:[#allocation42_spill] sm:$0xff] }
 0x15a   : > { %2192 = vrot.lane.b32.xlu1 %v1911_v57, %s4134_s18  ;;  %v6535_v57 = vrot.slane %v5672_v21, 1  ;;  %v1860_v21 = vsel %vm1442_vm14, %v6684_v30, 0 }
 0x15b   : > { %2359 = vrot.lane.b32.xlu0 %v6737_v25, %s4132_s16  ;;  %v5654_v53 = vsel %vm2062_vm7, %v6738_v4, %v2092_v42  ;;  %v5694_v28 = vsel %vm2062_vm7, %v2092_v42, %v2094_v13  ;;  %v2008_v4 = vshrl.u32 %v5194_v16, 16  ;;  %v6743_v42 = vld [vmem:[#allocation38_spill] sm:$0xff]  ;;  %vm1451_vm1 = vcmp.ne.s16.totalorder %v5702_v56, 0  ;;  %v6748_v13 = vld [vmem:[#allocation41_spill] sm:$0xff] }
 0x15c   : > { %3971 = vmatpush3.bf16.msra.mxu1 %v2956_v35  ;;  %v5737_v46 = vsel %vm1451_vm1, %v5194_v16, 0 }
 0x15d   : > { %6747 = vst [vmem:[#allocation31_spill] sm:$0xff] %v5737_v46 }
 0x15e   : > { %2373 = vrot.lane.b32.xlu1 %v1975_v32, %s4132_s16  ;;  %v6742_v32 = vrot.slane %v5538_v6, 1  ;;  %v1829_v6 = vsel %vm1449_vm4, %v4953_v60, 0  ;;  %v5717_v60 = vsel %vm1782_vm10, %v6740_v31, 0  ;;  %vm2469_vm4 = vcmask 31744  }
 0x15f   : > { %2375 = vrot.lane.b32.xlu0 %v6739_v34, %s4132_s16  ;;  %v6536_v44 = vrot.slane %v5717_v60, 1  ;;  %vm2658_vm10 = vcmask 195584  }
 0x160   : > { %v5683_v48 = vsel %vm2062_vm7, %v6742_v32, %v6535_v57  ;;  %v6746_v32 = vrot.slane %v5460_v11, 1 }
 0x162   : > { %2019 = vrot.lane.b32.xlu1 %v6737_v25, %s4133_s17  ;;  %v5732_v20 = vsel %vm2062_vm7, %v6746_v32, %v6536_v44 }
 0x163   : > { %2035 = vrot.lane.b32.xlu0 %v6739_v34, %s4133_s17  ;;  %v5704_v26 = vpop.permute.xlu1 %2322 }
 0x166   : > { %2194 = vrot.lane.b32.xlu1 %v6737_v25, %s4134_s18  ;;  %v5706_v25 = vpop.permute.xlu0 %2150 }
 0x167   : > { %2158 = vrot.lane.b32.xlu0 %v1821_v5, %s4126_s9  ;;  %v5720_v35 = vpop.permute.xlu1 %2338  ;;  %v5725_v5 = vor.u32 %v2008_v4, %v5516_v50  ;;  %v5743_v50 = vrot.slane %v2181_v24, 1  ;;  %v6754_v24 = vld [vmem:[#allocation8_spill] sm:$0xff] }
 0x168   : > { %6745 = vst [vmem:[#allocation3_spill] sm:$0xff] %v5720_v35 }
 0x169   : > { %v5752_v11 = vsel %vm1317_vm11, %v5725_v5, %v5743_v50 }
 0x16a   : > { %2210 = vrot.lane.b32.xlu1 %v6739_v34, %s4134_s18  ;;  %v5722_v34 = vpop.permute.xlu0 %2166 }
 0x16b   : > { %2174 = vrot.lane.b32.xlu0 %v1829_v6, %s4126_s9  ;;  %v5745_v6 = vpop.permute.xlu1 %2320 }
 0x16e   : > { %2330 = vrot.lane.b32.xlu1 %v6744_v52, %s4129_s13  ;;  %v5747_v4 = vpop.permute.xlu0 %2148  ;;  %v6751_v52 = vld [vmem:[#allocation44_spill] sm:$0xff] }
 0x16f   : > { %2328 = vrot.lane.b32.xlu0 %v6743_v42, %s4129_s13  ;;  %v6750_v42 = vld [vmem:[#allocation46_spill] sm:$0xff]  ;;  %v5758_v32 = vpop.permute.xlu1 %2164 }
 0x170   : > { %6752 = vst [vmem:[#allocation32_spill] sm:$0xff] %v5758_v32  ;;  %v6761_v32 = vld [vmem:[#allocation13_spill] sm:$0xff] }
 0x172   : > { %2346 = vrot.lane.b32.xlu1 %v6749_v51, %s4129_s13  ;;  %v6755_v51 = vld [vmem:[#allocation45_spill] sm:$0xff] }
 0x173   : > { %2344 = vrot.lane.b32.xlu0 %v6748_v13, %s4129_s13  ;;  %v5760_v13 = vpop.permute.xlu0 %2336 }
 0x174   : > { %6753 = vst [vmem:[#allocation30_spill] sm:$0xff] %v5760_v13  ;;  %v5766_v57 = vpop.permute.xlu1 %2435 }
 0x176   : > { %2156 = vrot.lane.b32.xlu1 %v6751_v52, %s4126_s9 }
 0x177   : > { %2278 = vrot.lane.b32.xlu0 %v6750_v42, %s4131_s15  ;;  %v5768_v44 = vpop.permute.xlu0 %2270  ;;  %v6756_v42 = vld [vmem:[#allocation47_spill] sm:$0xff] }
 0x178   : > { %v5774_v52 = vpop.permute.xlu1 %2355 }
 0x17a   : > { %2172 = vrot.lane.b32.xlu1 %v6755_v51, %s4126_s9 }
 0x17b   : > { %2108 = vrot.lane.b32.xlu0 %v6754_v24, %s4127_s10  ;;  %v5776_v46 = vpop.permute.xlu0 %2272 }
 0x17c   : > { %v2099_v51 = vpop.permute.xlu1 %2098 }
 0x17e   : > { %2441 = vrot.lane.b32.xlu1 %v6756_v42, %s4130_s14 }
 0x17f   : > { %2294 = vrot.lane.b32.xlu0 %v5257_v0, %s4131_s15  ;;  %v5782_v24 = vpop.permute.xlu0 %2116  ;;  %v6757_v0 = vld [vmem:[#allocation4_spill] sm:$0xff] }
 0x180   : > { %v5788_v40 = vpop.permute.xlu1 %2100 }
 0x182   : > { %2443 = vrot.lane.b32.xlu1 %v5289_v10, %s4130_s14 }
 0x183   : > { %2124 = vrot.lane.b32.xlu0 %v5398_v22, %s4127_s10  ;;  %v4062_v42 = vpop.permute.xlu0 %4061 }
 0x184   : > { %v2189_v10 = vpop.permute.xlu1 %2188 }
 0x186   : > { %2106 = vrot.lane.b32.xlu1 %v6757_v0, %s4127_s10 }
 0x187   : > { %2196 = vrot.lane.b32.xlu0 %v5313_v49, %s4134_s18  ;;  %v5794_v22 = vpop.permute.xlu0 %2015 }
 0x188   : > { %v5802_v0 = vpop.permute.xlu1 %2451 }
 0x189   : > { %6759 = vst [vmem:[#allocation33_spill] sm:$0xff] %v5802_v0  ;;  %v6763_v0 = vld [vmem:[#allocation51_spill] sm:$0xff] }
 0x18a   : > { %2280 = vrot.lane.b32.xlu1 %v5316_v58, %s4131_s15 }
 0x18b   : > { %2021 = vrot.lane.b32.xlu0 %v5313_v49, %s4133_s17  ;;  %v5800_v13 = vpop.permute.xlu0 %2371 }
 0x18c   : > { %6758 = vst [vmem:[#allocation27_spill] sm:$0xff] %v5800_v13  ;;  %v5810_v35 = vpop.permute.xlu1 %2288 }
 0x18d   : > { %6760 = vst [vmem:[#allocation24_spill] sm:$0xff] %v5810_v35  ;;  %v6766_v35 = vld [vmem:[#allocation16_spill] sm:$0xff] }
 0x18e   : > { %2457 = vrot.lane.b32.xlu1 %v5346_v45, %s4130_s14 }
 0x18f   : > { %2212 = vrot.lane.b32.xlu0 %v5356_v36, %s4134_s18  ;;  %v5808_v58 = vpop.permute.xlu0 %2031 }
 0x190   : > { %v2191_v13 = vpop.permute.xlu1 %2190 }
 0x192   : > { %2459 = vrot.lane.b32.xlu1 %v5361_v27, %s4130_s14 }
 0x193   : > { %2037 = vrot.lane.b32.xlu0 %v5356_v36, %s4133_s17  ;;  %v5816_v45 = vpop.permute.xlu0 %2154 }
 0x194   : > { %6762 = vst [vmem:[#allocation15_spill] sm:$0xff] %v5816_v45  ;;  %v5824_v18 = vpop.permute.xlu1 %2206 }
 0x195   : > { %6765 = vst [vmem:[#allocation35_spill] sm:$0xff] %v5824_v18 }
 0x196   : > { %2122 = vrot.lane.b32.xlu1 %v6761_v32, %s4127_s10 }
 0x197   : > { %2363 = vrot.lane.b32.xlu0 %v5383_v1, %s4132_s16  ;;  %v5822_v27 = vpop.permute.xlu0 %2170 }
 0x198   : > { %6764 = vst [vmem:[#allocation17_spill] sm:$0xff] %v5822_v27  ;;  %v5832_v9 = vpop.permute.xlu1 %2326 }
 0x199   : > { %6767 = vst [vmem:[#allocation28_spill] sm:$0xff] %v5832_v9 }
 0x19a   : > { %2296 = vrot.lane.b32.xlu1 %v6763_v0, %s4131_s15  ;;  %v4064_v0 = vunpack.i.h.bf16 %v4062_v42 }
 0x19b   : > { %2023 = vrot.lane.b32.xlu0 %v5383_v1, %s4133_s17  ;;  %v5830_v32 = vpop.permute.xlu0 %2340 }
 0x19c   : > { %v5840_v18 = vpop.permute.xlu1 %2342  ;;  %v2471_v9 = vsel %vm2469_vm4, 0, %v4064_v0 }
 0x19d   : > { %6768 = vst [vmem:[#allocation21_spill] sm:$0xff] %v5840_v18  ;;  %v2521_v27 = vsel %vm2519_vm9, %v2471_v9, %v5691_v43  ;;  %v6771_v18 = vld [vmem:[#allocation49_spill] sm:$0xff]  ;;  %v6772_v9 = vld [vmem:[#allocation50_spill] sm:$0xff] }
 0x19e   : > { %2361 = vrot.lane.b32.xlu1 %v5313_v49, %s4132_s16  ;;  %v1823_v49 = vsel %vm6770_vm0, %v6684_v30, 0  ;;  %v2556_v0 = vsel %vm2554_vm15, %v2521_v27, %v5689_v61  ;;  %v1822_v61 = vsel %vm1442_vm14, %v5157_v17, 0  ;;  %v6774_v30 = vld [vmem:[#allocation19_spill] sm:$0xff]  ;;  %vm6775_vm14 = vmmov %vm6773_vm6  ;;  %vm2728_vm0 = vcmask 261120  }
 0x19f   : > { %2379 = vrot.lane.b32.xlu0 %v6766_v35, %s4132_s16  ;;  %v5838_v37 = vpop.permute.xlu0 %2274  ;;  %v2590_v43 = vsel %vm6773_vm6, %v2556_v0, %v2189_v10 }
 0x1a2   : > { %2377 = vrot.lane.b32.xlu1 %v5356_v36, %s4132_s16  ;;  %v5851_v36 = vpop.permute.xlu1 %2324 }
 0x1a3   : > { %2039 = vrot.lane.b32.xlu0 %v6766_v35, %s4133_s17  ;;  %v5849_v45 = vpop.permute.xlu0 %2439 }
 0x1a6   : > { %2198 = vrot.lane.b32.xlu1 %v5383_v1, %s4134_s18  ;;  %v5861_v1 = vpop.permute.xlu1 %2152 }
 0x1a7   : > { %2162 = vrot.lane.b32.xlu0 %v1823_v49, %s4126_s9  ;;  %v4063_v49 = vunpack.i.l.bf16 %v4062_v42 }
 0x1a9   : > { %v5859_v59 = vpop.permute.xlu0 %2102 }
 0x1aa   : > { %2214 = vrot.lane.b32.xlu1 %v6766_v35, %s4134_s18 }
 0x1ab   : > { %2332 = vrot.lane.b32.xlu0 %v6771_v18, %s4129_s13  ;;  %v2473_v18 = vsel %vm2469_vm4, 0, %v4063_v49  ;;  %v5875_v42 = vpop.permute.xlu1 %2168 }
 0x1ac   : > { %v2523_v27 = vsel %vm2519_vm9, %v2473_v18, %v2099_v51 }
 0x1ad   : > { %v5873_v35 = vpop.permute.xlu0 %2104  ;;  %v2558_v0 = vsel %vm2554_vm15, %v2523_v27, %v5747_v4 }
 0x1ae   : > { %2334 = vrot.lane.b32.xlu1 %v1860_v21, %s4129_s13  ;;  %v2625_v21 = vsel %vm2623_vm8, %v2590_v43, %v5768_v44  ;;  %v2592_v51 = vsel %vm6775_vm14, %v2558_v0, %v2191_v13  ;;  %v6779_v0 = vld [vmem:[#allocation14_spill] sm:$0xff]  ;;  %vm6781_vm14 = vsmask.f32 256 }
 0x1af   : > { %2348 = vrot.lane.b32.xlu0 %v6772_v9, %s4129_s13  ;;  %v2660_v38 = vsel %vm2658_vm10, %v2625_v21, %v5745_v6  ;;  %v6776_v9 = vld [vmem:[#allocation10_spill] sm:$0xff]  ;;  %v2627_v4 = vsel %vm2623_vm8, %v2592_v51, %v5776_v46  ;;  %v6778_v46 = vld [vmem:[#allocation48_spill] sm:$0xff] }
 0x1b0   : > { %v2695_v43 = vsel %vm2693_vm13, %v2660_v38, %v5774_v52  ;;  %v2662_v13 = vsel %vm2658_vm10, %v2627_v4, %v5704_v26  ;;  %v2500_v21 = vsel %vm2469_vm4, %v6778_v46, %v5808_v58 }
 0x1b1   : > { %v2730_v27 = vsel %vm2728_vm0, %v2695_v43, %v5766_v57  ;;  %v1453_v57 = vsel %vm1438_vm2, %v6779_v0, 0  ;;  %vm2905_vm2 = vcmask 293888  }
 0x1b2   : > { %2160 = vrot.lane.b32.xlu1 %v1822_v61, %s4126_s9  ;;  %v2775_v26 = vshrl.u32 %v2730_v27, 16 }
 0x1b3   : > { %2286 = vrot.lane.b32.xlu0 %v6774_v30, %s4131_s15  ;;  %v2291_v10 = vpop.permute.xlu0 %2290  ;;  %v2438_v49 = vpop.permute.xlu1 %2437  ;;  %v6777_v30 = vld [vmem:[#allocation29_spill] sm:$0xff] }
 0x1b6   : > { %2449 = vrot.lane.b32.xlu1 %v6777_v30, %s4130_s14  ;;  %v2541_v30 = vsel %vm2519_vm9, %v2500_v21, %v5782_v24 }
 0x1b7   : > { %2282 = vrot.lane.b32.xlu0 %v6776_v9, %s4131_s15  ;;  %v5897_v44 = vpop.permute.xlu1 %2276  ;;  %v2576_v4 = vsel %vm2554_vm15, %v2541_v30, %v5722_v34  ;;  %v1461_v34 = vsel %vm1446_vm5, %v6728_v63, 0  ;;  %vm6784_vm5 = vmmov %vm6773_vm6 }
 0x1b8   : > { %v5895_v18 = vpop.permute.xlu0 %2120 }
 0x1ba   : > { %2114 = vrot.lane.b32.xlu1 %v5481_v23, %s4127_s10 }
 0x1bb   : > { %2112 = vrot.lane.b32.xlu0 %v5476_v14, %s4127_s10 }
 0x1bc   : > { %v5909_v61 = vpop.permute.xlu1 %2453 }
 0x1bd   : > { %v2358_v6 = vpop.permute.xlu0 %2357 }
 0x1be   : > { %v2697_v52 = vsel %vm2693_vm13, %v2662_v13, %v2358_v6  ;;  %2445 = vrot.lane.b32.xlu1 %v5507_v62, %s4130_s14  ;;  %v2777_v62 = vrot.slane %v2775_v26, 7 }
 0x1bf   : > { %v2732_v14 = vsel %vm2728_vm0, %v2697_v52, %v2438_v49  ;;  %2298 = vrot.lane.b32.xlu0 %v5502_v7, %s4131_s15  ;;  %v6782_v52 = vld [vmem:[#allocation5_spill] sm:$0xff] }
 0x1c0   : > { %v2778_v23 = vshrl.u32 %v2732_v14, 16  ;;  %v2456_v9 = vpop.permute.xlu1 %2455  ;;  %v2781_v43 = vshll.u32 %v2732_v14, 16  ;;  %v2476_v46 = vsel %vm2469_vm4, %v6782_v52, %v5794_v22 }
 0x1c1   : > { %v2018_v51 = vpop.permute.xlu0 %2017  ;;  %v2525_v26 = vsel %vm2519_vm9, %v2476_v46, %v5788_v40 }
 0x1c2   : > { %v2780_v58 = vrot.slane %v2778_v23, 7  ;;  %v2479_v49 = vsel %vm2469_vm4, %v1453_v57, %v2018_v51  ;;  %2447 = vrot.lane.b32.xlu1 %v5513_v8, %s4130_s14  ;;  %v2560_v38 = vsel %vm2554_vm15, %v2525_v26, %v5706_v25  ;;  %v2185_v8 = vshrl.u32 %v6740_v31, 16 }
 0x1c3   : > { %2200 = vrot.lane.b32.xlu0 %v5531_v47, %s4134_s18  ;;  %v6788_v26 = vrot.slane %v5717_v60, 1 }
 0x1c4   : > { %v2783_v7 = vor.u32 %v2781_v43, %v2780_v58  ;;  %v2119_v13 = vpop.permute.xlu1 %2118 }
 0x1c5   : > { %v2209_v6 = vpop.permute.xlu0 %2208 }
 0x1c6   : > { %v2610_v24 = vsel %vm6773_vm6, %v2576_v4, %v2209_v6  ;;  %v2784_v27 = vsel %vm6781_vm14, %v2777_v62, %v2783_v7  ;;  %2110 = vrot.lane.b32.xlu1 %v5494_v54, %s4127_s10  ;;  %vm6785_vm6 = vmmov %vm6781_vm14 }
 0x1c7   : > { %v2645_v21 = vsel %vm2623_vm8, %v2610_v24, %v2291_v10  ;;  %2025 = vrot.lane.b32.xlu0 %v5531_v47, %s4133_s17  ;;  %3972 = vmatprep.mubr.msk.bf16.mxu1 %vm2905_vm2, %v2784_v27  ;;  %vm6786_vm14 = vmmov %vm6784_vm5 }
 0x1c8   : > { %v2293_v23 = vpop.permute.xlu1 %2292  ;;  %v2680_v51 = vsel %vm2658_vm10, %v2645_v21, %v5830_v32 }
 0x1c9   : > { %v2034_v14 = vpop.permute.xlu0 %2033 }
 0x1ca   : > { %v2503_v22 = vsel %vm2469_vm4, %v1461_v34, %v2034_v14  ;;  %2284 = vrot.lane.b32.xlu1 %v5598_v41, %s4131_s15 }
 0x1cb   : > { %v2543_v10 = vsel %vm2519_vm9, %v2503_v22, %v2119_v13  ;;  %2216 = vrot.lane.b32.xlu0 %v5552_v2, %s4134_s18  ;;  %v1868_v22 = vsel %vm1450_vm3, %v6740_v31, 0 }
 0x1cc   : > { %v2578_v54 = vsel %vm2554_vm15, %v2543_v10, %v5875_v42  ;;  %v2193_v63 = vpop.permute.xlu1 %2192 }
 0x1cd   : > { %v2360_v0 = vpop.permute.xlu0 %2359  ;;  %v2594_v40 = vsel %vm6784_vm5, %v2560_v38, %v2193_v63  ;;  %v6789_v38 = vld [vmem:[#allocation6_spill] sm:$0xff] }
 0x1ce   : > { %v2629_v57 = vsel %vm2623_vm8, %v2594_v40, %v5838_v37  ;;  %2365 = vrot.lane.b32.xlu1 %v5531_v47, %s4132_s16  ;;  %v6790_v40 = vrot.slane %v6789_v38, 1 }
 0x1cf   : > { %2204 = vrot.lane.b32.xlu0 %v5584_v55, %s4134_s18  ;;  %v2664_v41 = vsel %vm2658_vm10, %v2629_v57, %v5851_v36 }
 0x1d0   : > { %v2699_v42 = vsel %vm2693_vm13, %v2664_v41, %v2360_v0  ;;  %v5972_v30 = vpop.permute.xlu1 %2373 }
 0x1d1   : > { %v2376_v25 = vpop.permute.xlu0 %2375  ;;  %v2734_v37 = vsel %vm2728_vm0, %v2699_v42, %v5849_v45  ;;  %v2527_v45 = vsel %vm2519_vm9, %v2479_v49, %v5859_v59 }
 0x1d2   : > { %v2715_v43 = vsel %vm2693_vm13, %v2680_v51, %v2376_v25  ;;  %v2785_v7 = vshrl.u32 %v2734_v37, 16  ;;  %2381 = vrot.lane.b32.xlu1 %v5552_v2, %s4132_s16  ;;  %v2788_v32 = vshll.u32 %v2734_v37, 16  ;;  %v2562_v59 = vsel %vm2554_vm15, %v2527_v45, %v5861_v1  ;;  %v6792_v25 = vld [vmem:[#allocation15_spill] sm:$0xff] }
 0x1d3   : > { %v5978_v62 = vsel %vm2728_vm0, %v2715_v43, %v2456_v9  ;;  %2029 = vrot.lane.b32.xlu0 %v5584_v55, %s4133_s17 }
 0x1d4   : > { %v5984_v47 = vrot.slane %v2785_v7, 7  ;;  %v2020_v4 = vpop.permute.xlu1 %2019 }
 0x1d5   : > { %v2036_v36 = vpop.permute.xlu0 %2035  ;;  %v2482_v3 = vsel %vm2469_vm4, %v5527_v33, %v2020_v4 }
 0x1d6   : > { %v2506_v6 = vsel %vm2469_vm4, %v5522_v15, %v2036_v36  ;;  %2369 = vrot.lane.b32.xlu1 %v5584_v55, %s4132_s16  ;;  %v2790_v13 = vor.u32 %v2788_v32, %v5984_v47 }
 0x1d7   : > { %v5992_v9 = vsel %vm2519_vm9, %v2506_v6, %v5895_v18  ;;  %2367 = vrot.lane.b32.xlu0 %v5658_v12, %s4132_s16  ;;  %v6795_v6 = vld [vmem:[#allocation25_spill] sm:$0xff] }
 0x1d8   : > { %v2195_v49 = vpop.permute.xlu1 %2194  ;;  %v2791_v15 = vsel %vm6785_vm6, %v2780_v58, %v2790_v13 }
 0x1d9   : > { %v5999_v24 = vpop.permute.xlu0 %2158  ;;  %v2596_v27 = vsel %vm6786_vm14, %v2562_v59, %v2195_v49  ;;  %3973 = vmatmul.mubr.msk.bf16.vlgmr.msra.gmra.mrb[16].mxu1 %vm2905_vm2, %v2791_v15 }
 0x1da   : > { %v6008_v18 = vsel %vm2623_vm8, %v2596_v27, %v5897_v44  ;;  %2202 = vrot.lane.b32.xlu1 %v5658_v12, %s4134_s18 }
 0x1db   : > { %2027 = vrot.lane.b32.xlu0 %v5658_v12, %s4133_s17 }
 0x1dc   : > { %v2211_v1 = vpop.permute.xlu1 %2210 }
 0x1dd   : > { %v6014_v55 = vpop.permute.xlu0 %2174  ;;  %v2612_v52 = vsel %vm6784_vm5, %v2578_v54, %v2211_v1 }
 0x1de   : > { %v6018_v58 = vsel %vm2623_vm8, %v2612_v52, %v2293_v23  ;;  %2461 = vrot.lane.b32.xlu1 %v5568_v29, %s4130_s14  ;;  %v6787_v23 = vld [vmem:[#allocation2_spill] sm:$0xff] }
 0x1df   : > { %2041 = vrot.lane.b32.xlu0 %v5552_v2, %s4133_s17  ;;  %v2433_v57 = vsel %vm2062_vm7, %v6790_v40, %v6787_v23 }
 0x1e0   : > { %v6024_v46 = vpop.permute.xlu1 %2330 }
 0x1e1   : > { %v2329_v44 = vpop.permute.xlu0 %2328 }
 0x1e2   : > { %2463 = vrot.lane.b32.xlu1 %v5683_v48, %s4130_s14  ;;  %v1830_v48 = vsel %vm1450_vm3, %v5194_v16, 0  ;;  %v2269_v16 = vsel %vm2062_vm7, %v6788_v26, %v6787_v23  ;;  %vm6794_vm7 = vmmov %vm6784_vm5 }
 0x1e3   : > { %2043 = vrot.lane.b32.xlu0 %v5725_v5, %s4133_s17  ;;  %v1831_v5 = vsel %vm1451_vm1, %v6740_v31, 0  ;;  %vm6800_vm3 = vmmov %vm6785_vm6 }
 0x1e4   : > { %v6030_v21 = vpop.permute.xlu1 %2346  ;;  %vm6801_vm1 = vmmov %vm6784_vm5 }
 0x1e5   : > { %v2345_v12 = vpop.permute.xlu0 %2344  ;;  %vm6802_vm6 = vmmov %vm6800_vm3 }
 0x1e6   : > { %2126 = vrot.lane.b32.xlu1 %v5654_v53, %s4127_s10  ;;  %v2187_v53 = vor.u32 %v2185_v8, %v5743_v50  ;;  %v6796_v8 = vld [vmem:[#allocation26_spill] sm:$0xff]  ;;  %vm6803_vm14 = vmmov %vm6800_vm3 }
 0x1e7   : > { %2128 = vrot.lane.b32.xlu0 %v5694_v28, %s4127_s10 }
 0x1e8   : > { %v2157_v29 = vpop.permute.xlu1 %2156 }
 0x1e9   : > { %v2279_v2 = vpop.permute.xlu0 %2278 }
 0x1ea   : > { %2176 = vrot.lane.b32.xlu1 %v1830_v48, %s4126_s9 }
 0x1eb   : > { %2178 = vrot.lane.b32.xlu0 %v1831_v5, %s4126_s9 }
 0x1ec   : > { %v2173_v34 = vpop.permute.xlu1 %2172 }
 0x1ed   : > { %v2109_v28 = vpop.permute.xlu0 %2108 }
 0x1ee   : > { %2300 = vrot.lane.b32.xlu1 %v5732_v20, %s4131_s15  ;;  %v2354_v20 = vsel %vm1317_vm11, %v2187_v53, %v6787_v23  ;;  %vm6793_vm11 = vmmov %vm6784_vm5 }
 0x1ef   : > { %2220 = vrot.lane.b32.xlu0 %v2187_v53, %s4134_s18  ;;  %vm6804_vm5 = vmmov %vm6801_vm1 }
 0x1f0   : > { %v2442_v56 = vpop.permute.xlu1 %2441 }
 0x1f1   : > { %v2295_v14 = vpop.permute.xlu0 %2294 }
 0x1f2   : > { %2350 = vrot.lane.b32.xlu1 %v1868_v22, %s4129_s13 }
 0x1f3   : > { %2302 = vrot.lane.b32.xlu0 %v2269_v16, %s4131_s15 }
 0x1f4   : > { %v2444_v10 = vpop.permute.xlu1 %2443 }
 0x1f5   : > { %v6058_v50 = vpop.permute.xlu0 %2124 }
 0x1f6   : > { %2385 = vrot.lane.b32.xlu1 %v2354_v20, %s4132_s16 }
 0x1f7   : > { %2383 = vrot.lane.b32.xlu0 %v5752_v11, %s4132_s16 }
 0x1f8   : > { %v2107_v54 = vpop.permute.xlu1 %2106 }
 0x1f9   : > { %v2197_v60 = vpop.permute.xlu0 %2196 }
 0x1fa   : > { %2218 = vrot.lane.b32.xlu1 %v5752_v11, %s4134_s18  ;;  %v6791_v11 = vld [vmem:[#allocation17_spill] sm:$0xff] }
 0x1fb   : > { %2352 = vrot.lane.b32.xlu0 %v6662_v39, %s4129_s13  ;;  %v2529_v39 = vsel %vm2519_vm9, %v2482_v3, %v5873_v35 }
 0x1fc   : > { %v6071_v0 = vpop.permute.xlu1 %2280  ;;  %v2564_v37 = vsel %vm2554_vm15, %v2529_v39, %v6792_v25  ;;  %v2841_v25 = vshrl.u32 %v5978_v62, 16 }
 0x1fd   : > { %v2022_v31 = vpop.permute.xlu0 %2021  ;;  %v2598_v43 = vsel %vm6794_vm7, %v2564_v37, %v2197_v60  ;;  %vm6806_vm7 = vmmov %vm6801_vm1 }
 0x1fe   : > { %v2485_v63 = vsel %vm2469_vm4, %v5561_v19, %v2022_v31  ;;  %2465 = vrot.lane.b32.xlu1 %v2433_v57, %s4130_s14  ;;  %v2580_v19 = vsel %vm2554_vm15, %v5992_v9, %v6791_v11  ;;  %v2633_v45 = vsel %vm2623_vm8, %v2598_v43, %v2279_v2  ;;  %v6798_v31 = vld [vmem:[#allocation21_spill] sm:$0xff]  ;;  %v6799_v57 = vld [vmem:[#allocation18_spill] sm:$0xff] }
 0x1ff   : > { %v2531_v41 = vsel %vm2519_vm9, %v2485_v63, %v2107_v54  ;;  %2387 = vrot.lane.b32.xlu0 %v6787_v23, %s4132_s16  ;;  %v2668_v59 = vsel %vm2658_vm10, %v2633_v45, %v2329_v44 }
 0x200   : > { %v2566_v33 = vsel %vm2554_vm15, %v2531_v41, %v2157_v29  ;;  %v2458_v51 = vpop.permute.xlu1 %2457 }
 0x201   : > { %v2213_v42 = vpop.permute.xlu0 %2212 }
 0x202   : > { %v2614_v35 = vsel %vm6793_vm11, %v2580_v19, %v2213_v42  ;;  %vm6805_vm11 = vmmov %vm6800_vm3 }
 0x203   : > { %v2649_v7 = vsel %vm2623_vm8, %v2614_v35, %v2295_v14  ;;  %2467 = vrot.lane.b32.xlu0 %v6787_v23, %s4130_s14  ;;  %v6797_v14 = vld [vmem:[#allocation28_spill] sm:$0xff]  ;;  %s6353_s14 = scalar_lea.vmem %s6471_s7, %s3845_s28 }
 0x204   : > { %v2684_v32 = vsel %vm2658_vm10, %v2649_v7, %v2345_v12  ;;  %v2460_v4 = vpop.permute.xlu1 %2459  ;;  %v2666_v23 = vsel %vm2658_vm10, %v6008_v18, %v6797_v14  ;;  %v2682_v18 = vsel %vm2658_vm10, %v6018_v58, %v6798_v31 }
 0x205   : > { %v2038_v36 = vpop.permute.xlu0 %2037 }
 0x206   : > { %v2509_v9 = vsel %vm2469_vm4, %v6795_v6, %v2038_v36 }
 0x208   : > { %v2123_v49 = vpop.permute.xlu1 %2122 }
 0x209   : > { %v2364_v13 = vpop.permute.xlu0 %2363  ;;  %v2547_v27 = vsel %vm2519_vm9, %v2509_v9, %v2123_v49  ;;  %v6146_v9 = vrot.slane %v2841_v25, 7 }
 0x20a   : > { %v2703_v15 = vsel %vm2693_vm13, %v2668_v59, %v2364_v13  ;;  %v2582_v1 = vsel %vm2554_vm15, %v2547_v27, %v2173_v34 }
 0x20b   : > { %v2738_v52 = vsel %vm2728_vm0, %v2703_v15, %v2444_v10 }
 0x20c   : > { %v2297_v29 = vpop.permute.xlu1 %2296  ;;  %v2799_v5 = vshrl.u32 %v2738_v52, 16 }
 0x20d   : > { %v2024_v12 = vpop.permute.xlu0 %2023 }
 0x20e   : > { %v2488_v2 = vsel %vm2469_vm4, %v6796_v8, %v2024_v12  ;;  %v6117_v22 = vrot.slane %v2799_v5, 7 }
 0x20f   : > { %v2533_v48 = vsel %vm2519_vm9, %v2488_v2, %v2109_v28 }
 0x210   : > { %v6110_v44 = vsel %vm2554_vm15, %v2533_v48, %v5999_v24  ;;  %v2362_v34 = vpop.permute.xlu1 %2361  ;;  %v2802_v24 = vshll.u32 %v2738_v52, 16 }
 0x211   : > { %v2380_v53 = vpop.permute.xlu0 %2379  ;;  %v2701_v16 = vsel %vm2693_vm13, %v2666_v23, %v2362_v34 }
 0x212   : > { %v2719_v26 = vsel %vm2693_vm13, %v2684_v32, %v2380_v53  ;;  %v2736_v28 = vsel %vm2728_vm0, %v2701_v16, %v2442_v56  ;;  %v2804_v56 = vor.u32 %v2802_v24, %v6117_v22 }
 0x213   : > { %v2754_v10 = vsel %vm2728_vm0, %v2719_v26, %v2460_v4  ;;  %v2792_v60 = vshrl.u32 %v2736_v28, 16  ;;  %v2795_v54 = vshll.u32 %v2736_v28, 16 }
 0x214   : > { %v2855_v20 = vshrl.u32 %v2754_v10, 16  ;;  %v2378_v63 = vpop.permute.xlu1 %2377  ;;  %v2858_v11 = vshll.u32 %v2754_v10, 16 }
 0x215   : > { %v2040_v3 = vpop.permute.xlu0 %2039  ;;  %v2794_v40 = vrot.slane %v2792_v60, 7  ;;  %v2717_v41 = vsel %vm2693_vm13, %v2682_v18, %v2378_v63 }
 0x216   : > { %v6124_v38 = vrot.slane %v2855_v20, 7  ;;  %v2512_v39 = vsel %vm2469_vm4, %v6799_v57, %v2040_v3  ;;  %v2752_v42 = vsel %vm2728_vm0, %v2717_v41, %v2458_v51  ;;  %v6808_v57 = vld [vmem:[#allocation23_spill] sm:$0xff] }
 0x217   : > { %v2549_v19 = vsel %vm2519_vm9, %v2512_v39, %v6058_v50  ;;  %v2797_v58 = vor.u32 %v2795_v54, %v2794_v40  ;;  %v2848_v37 = vshrl.u32 %v2752_v42, 16  ;;  %v2805_v32 = vsel %vm6800_vm3, %v2794_v40, %v2804_v56  ;;  %vm6807_vm3 = vmmov %vm6801_vm1  ;;  %v6809_v39 = vld [vmem:[#allocation7_spill] sm:$0xff] }
 0x218   : > { %v2860_v35 = vor.u32 %v2858_v11, %v6124_v38  ;;  %v2199_v7 = vpop.permute.xlu1 %2198  ;;  %v2584_v36 = vsel %vm2554_vm15, %v2549_v19, %v6014_v55  ;;  %v2851_v45 = vshll.u32 %v2752_v42, 16 }
 0x219   : > { %v6135_v43 = vpop.permute.xlu0 %2162  ;;  %v2850_v4 = vrot.slane %v2848_v37, 7  ;;  %v2600_v50 = vsel %vm6801_vm1, %v2566_v33, %v2199_v7  ;;  %v2798_v51 = vsel %vm6802_vm6, %v5984_v47, %v2797_v58  ;;  %v6811_v37 = vld [vmem:[#allocation20_spill] sm:$0xff] }
 0x21a   : > { %v2635_v6 = vsel %vm2623_vm8, %v2600_v50, %v6071_v0  ;;  %3976 = vmatprep.mubr.msk.bf16.mxu1 %vm2905_vm2, %v2798_v51 }
 0x21b   : > { %v2853_v13 = vor.u32 %v2851_v45, %v2850_v4  ;;  %3977 = vmatmul.mubr.msk.bf16.gmra.mrb[20].mxu1 %vm2905_vm2, %v2805_v32  ;;  %v2670_v55 = vsel %vm2658_vm10, %v2635_v6, %v6024_v46  ;;  %v6152_v59 = vsel %vm6803_vm14, %v2850_v4, %v2860_v35  ;;  %v6812_v32 = vld [vmem:[#allocation32_spill] sm:$0xff]  ;;  %v6813_v4 = vld [vmem:[#allocation35_spill] sm:$0xff] }
 0x21c   : > { %v2215_v49 = vpop.permute.xlu1 %2214 }
 0x21d   : > { %v2333_v33 = vpop.permute.xlu0 %2332  ;;  %v2616_v47 = vsel %vm6804_vm5, %v2582_v1, %v2215_v49  ;;  %v6157_v0 = vsel %vm6805_vm11, %v6146_v9, %v2853_v13  ;;  %vm6818_vm5 = vmmov %vm6801_vm1 }
 0x21e   : > { %v2651_v15 = vsel %vm2623_vm8, %v2616_v47, %v2297_v29  ;;  %vm6819_vm11 = vmmov %vm6801_vm1 }
 0x21f   : > { %v6162_v27 = vsel %vm2658_vm10, %v2651_v15, %v6030_v21  ;;  %v3167_v21 = vld [vmem:[%s6467_s3] sm:$0x3] }
 0x220   : > { %v6164_v12 = vpop.permute.xlu1 %2334  ;;  %4041 = vmatprep.subr.msk.bf16.mxu0 %vm2954_vm12, %v3167_v21  ;;  %v3224_v29 = vsel %vm2954_vm12, %v3167_v21, 0  ;;  %vm6810_vm12 = vcmp.ne.s16.totalorder %v6809_v39, 0 }
 0x221   : > { %v2349_v52 = vpop.permute.xlu0 %2348  ;;  %4005 = vmatpush3.bf16.msra.mxu0 %v3224_v29  ;;  %v1459_v41 = vsel %vm6810_vm12, %v6808_v57, 0 }
 0x224   : > { %v2161_v8 = vpop.permute.xlu1 %2160 }
 0x225   : > { %v6166_v46 = vpop.permute.xlu0 %2286 }
 0x228   : > { %v6168_v5 = vpop.permute.xlu1 %2449 }
 0x229   : > { %v2283_v2 = vpop.permute.xlu0 %2282 }
 0x22c   : > { %v2115_v48 = vpop.permute.xlu1 %2114 }
 0x22d   : > { %v2113_v1 = vpop.permute.xlu0 %2112 }
 0x230   : > { %v2446_v14 = vpop.permute.xlu1 %2445 }
 0x231   : > { %v2299_v53 = vpop.permute.xlu0 %2298 }
 0x234   : > { %v2448_v34 = vpop.permute.xlu1 %2447 }
 0x235   : > { %v2201_v23 = vpop.permute.xlu0 %2200 }
 0x236   : > { %v2602_v18 = vsel %vm6807_vm3, %v6110_v44, %v2201_v23  ;;  %v6816_v23 = vld [vmem:[#allocation9_spill] sm:$0xff]  ;;  %vm6824_vm3 = vmmov %vm6802_vm6 }
 0x237   : > { %v2637_v19 = vsel %vm2623_vm8, %v2602_v18, %v2283_v2  ;;  %vm6817_vm14 = vcmp.ne.s16.totalorder %v6816_v23, 0  ;;  %vm6825_vm12 = vmmov %vm6824_vm3 }
 0x238   : > { %v2111_v16 = vpop.permute.xlu1 %2110  ;;  %v2672_v50 = vsel %vm2658_vm10, %v2637_v19, %v2333_v33  ;;  %v1458_v21 = vsel %vm6817_vm14, %v5157_v17, 0  ;;  %v6822_v19 = vld [vmem:[#allocation27_spill] sm:$0xff] }
 0x239   : > { %v2026_v26 = vpop.permute.xlu0 %2025 }
 0x23a   : > { %v2491_v35 = vsel %vm2469_vm4, %v6811_v37, %v2026_v26 }
 0x23b   : > { %v2535_v13 = vsel %vm2519_vm9, %v2491_v35, %v2111_v16  ;;  %v6823_v35 = vld [vmem:[#allocation33_spill] sm:$0xff] }
 0x23c   : > { %v2285_v28 = vpop.permute.xlu1 %2284  ;;  %v2570_v26 = vsel %vm2554_vm15, %v2535_v13, %v2161_v8 }
 0x23d   : > { %v2217_v10 = vpop.permute.xlu0 %2216 }
 0x23e   : > { %v2618_v20 = vsel %vm6806_vm7, %v2584_v36, %v2217_v10  ;;  %vm6821_vm7 = vmmov %vm6802_vm6 }
 0x23f   : > { %v2653_v60 = vsel %vm2623_vm8, %v2618_v20, %v2299_v53 }
 0x240   : > { %v6178_v24 = vsel %vm2658_vm10, %v2653_v60, %v2349_v52  ;;  %v2366_v3 = vpop.permute.xlu1 %2365  ;;  %v6815_v52 = vld [vmem:[#allocation3_spill] sm:$0xff] }
 0x241   : > { %v2205_v54 = vpop.permute.xlu0 %2204  ;;  %v2705_v31 = vsel %vm2693_vm13, %v2670_v55, %v2366_v3  ;;  %v6814_v55 = vld [vmem:[#allocation24_spill] sm:$0xff] }
 0x242   : > { %v2740_v63 = vsel %vm2728_vm0, %v2705_v31, %v2446_v14  ;;  %v2844_v31 = vshll.u32 %v5978_v62, 16 }
 0x243   : > { %v2806_v40 = vshrl.u32 %v2740_v63, 16  ;;  %v2809_v25 = vshll.u32 %v2740_v63, 16 }
 0x244   : > { %v2382_v11 = vpop.permute.xlu1 %2381 }
 0x245   : > { %v2030_v56 = vpop.permute.xlu0 %2029  ;;  %v2808_v42 = vrot.slane %v2806_v40, 7 }
 0x246   : > { %v2497_v58 = vsel %vm2469_vm4, %v1459_v41, %v2030_v56  ;;  %v6820_v41 = vld [vmem:[#allocation30_spill] sm:$0xff] }
 0x247   : > { %v2539_v44 = vsel %vm2519_vm9, %v2497_v58, %v2115_v48  ;;  %v2811_v7 = vor.u32 %v2809_v25, %v2808_v42 }
 0x248   : > { %v2574_v36 = vsel %vm2554_vm15, %v2539_v44, %v6812_v32  ;;  %v2370_v6 = vpop.permute.xlu1 %2369 }
 0x249   : > { %v2608_v45 = vsel %vm6801_vm1, %v2574_v36, %v6813_v4  ;;  %v2368_v51 = vpop.permute.xlu0 %2367  ;;  %v2812_v15 = vsel %vm6802_vm6, %v6117_v22, %v2811_v7  ;;  %vm6826_vm1 = vmmov %vm6824_vm3 }
 0x24a   : > { %v2643_v49 = vsel %vm2623_vm8, %v2608_v45, %v6814_v55  ;;  %v2707_v47 = vsel %vm2693_vm13, %v2672_v50, %v2368_v51  ;;  %3980 = vmatprep.mubr.msk.bf16.mxu1 %vm2905_vm2, %v2812_v15  ;;  %vm6827_vm6 = vmmov %vm6826_vm1 }
 0x24b   : > { %v2678_v2 = vsel %vm2658_vm10, %v2643_v49, %v6815_v52  ;;  %v2742_v48 = vsel %vm2728_vm0, %v2707_v47, %v2448_v34  ;;  %vm6828_vm14 = vmmov %vm6826_vm1 }
 0x24c   : > { %v2813_v33 = vshrl.u32 %v2742_v48, 16  ;;  %v2713_v53 = vsel %vm2693_vm13, %v2678_v2, %v5972_v30  ;;  %v2816_v14 = vshll.u32 %v2742_v48, 16  ;;  %v2203_v22 = vpop.permute.xlu1 %2202 }
 0x24d   : > { %v2028_v29 = vpop.permute.xlu0 %2027  ;;  %v2748_v16 = vsel %vm2728_vm0, %v2713_v53, %v5909_v61  ;;  %v2604_v20 = vsel %vm6818_vm5, %v2570_v26, %v2203_v22  ;;  %v2721_v61 = vsel %vm2693_vm13, %v6162_v27, %v2382_v11  ;;  %v6829_v22 = vld [vmem:[#allocation22_spill] sm:$0xff] }
 0x24e   : > { %v2815_v10 = vrot.slane %v2813_v33, 7  ;;  %v2494_v34 = vsel %vm2469_vm4, %v1458_v21, %v2028_v29  ;;  %v2834_v60 = vshrl.u32 %v2748_v16, 16  ;;  %v2639_v3 = vsel %vm2623_vm8, %v2604_v20, %v2285_v28 }
 0x24f   : > { %v2537_v30 = vsel %vm2519_vm9, %v2494_v34, %v2113_v1  ;;  %v2674_v18 = vsel %vm2658_vm10, %v2639_v3, %v6164_v12  ;;  %v2846_v12 = vor.u32 %v2844_v31, %v6146_v9 }
 0x250   : > { %v2818_v17 = vor.u32 %v2816_v14, %v2815_v10  ;;  %v2572_v8 = vsel %vm2554_vm15, %v2537_v30, %v6135_v43  ;;  %v2709_v40 = vsel %vm2693_vm13, %v2674_v18, %v2370_v6  ;;  %v2462_v1 = vpop.permute.xlu1 %2461  ;;  %v2836_v39 = vrot.slane %v2834_v60, 7 }
 0x251   : > { %v2606_v63 = vsel %vm6819_vm11, %v2572_v8, %v2205_v54  ;;  %v2042_v57 = vpop.permute.xlu0 %2041  ;;  %v2744_v28 = vsel %vm2728_vm0, %v2709_v40, %v6168_v5  ;;  %v2756_v43 = vsel %vm2728_vm0, %v2721_v61, %v2462_v1  ;;  %vm6831_vm11 = vmmov %vm6818_vm5 }
 0x252   : > { %v2641_v62 = vsel %vm2623_vm8, %v2606_v63, %v6166_v46  ;;  %v2862_v56 = vshrl.u32 %v2756_v43, 16  ;;  %v2819_v54 = vsel %vm6821_vm7, %v2808_v42, %v2818_v17  ;;  %v2820_v11 = vshrl.u32 %v2744_v28, 16  ;;  %vm6832_vm7 = vmmov %vm6826_vm1 }
 0x253   : > { %v2676_v27 = vsel %vm2658_vm10, %v2641_v62, %v6820_v41  ;;  %3981 = vmatmul.mubr.msk.bf16.gmra.mrb[24].mxu1 %vm2905_vm2, %v2819_v54  ;;  %v2865_v58 = vshll.u32 %v2756_v43, 16  ;;  %v2847_v9 = vsel %vm6824_vm3, %v2836_v39, %v2846_v12  ;;  %v2823_v32 = vshll.u32 %v2744_v28, 16 }
 0x254   : > { %v2711_v25 = vsel %vm2693_vm13, %v2676_v27, %v6822_v19  ;;  %v2864_v46 = vrot.slane %v2862_v56, 7  ;;  %v2464_v5 = vpop.permute.xlu1 %2463  ;;  %v2822_v7 = vrot.slane %v2820_v11, 7  ;;  %v2837_v42 = vshll.u32 %v2748_v16, 16 }
 0x255   : > { %v2044_v37 = vpop.permute.xlu0 %2043  ;;  %v2746_v44 = vsel %vm2728_vm0, %v2711_v25, %v6823_v35  ;;  %v2515_v16 = vsel %vm2469_vm4, %v6829_v22, %v2042_v57 }
 0x256   : > { %v2827_v36 = vshrl.u32 %v2746_v44, 16  ;;  %v2867_v4 = vor.u32 %v2865_v58, %v2864_v46  ;;  %v2825_v45 = vor.u32 %v2823_v32, %v2822_v7  ;;  %v2830_v51 = vshll.u32 %v2746_v44, 16 }
 0x257   : > { %v2839_v55 = vor.u32 %v2837_v42, %v2836_v39 }
 0x258   : > { %v2829_v50 = vrot.slane %v2827_v36, 7  ;;  %v2127_v13 = vpop.permute.xlu1 %2126  ;;  %v2868_v49 = vsel %vm6825_vm12, %v6124_v38, %v2867_v4  ;;  %v2826_v47 = vsel %vm6826_vm1, %v2815_v10, %v2825_v45 }
 0x259   : > { %v2129_v6 = vpop.permute.xlu0 %2128  ;;  %3984 = vmatprep.mubr.msk.bf16.mxu1 %vm2905_vm2, %v2826_v47  ;;  %v2551_v34 = vsel %vm2519_vm9, %v2515_v16, %v2127_v13 }
 0x25a   : > { %v2832_v15 = vor.u32 %v2830_v51, %v2829_v50  ;;  %v2840_v52 = vsel %vm6827_vm6, %v2829_v50, %v2839_v55 }
 0x25c   : > { %v2833_v2 = vsel %vm6828_vm14, %v2822_v7, %v2832_v15  ;;  %v2177_v33 = vpop.permute.xlu1 %2176  ;;  %v6287_v7 = vld [vmem:[%s6469_s5] ss:$0 sm:$0xff] }
 0x25d   : > { %v2179_v48 = vpop.permute.xlu0 %2178  ;;  %3985 = vmatmul.mubr.msk.bf16.gmra.mrb[28].mxu1 %vm2905_vm2, %v2833_v2  ;;  %v2586_v60 = vsel %vm2554_vm15, %v2551_v34, %v2177_v33 }
 0x25e   : > { %3988 = vmatprep.mubr.msk.bf16.mxu1 %vm2905_vm2, %v2840_v52 }
 0x260   : > { %v2301_v14 = vpop.permute.xlu1 %2300 }
 0x261   : > { %v2221_v53 = vpop.permute.xlu0 %2220 }
 0x264   : > { %v2351_v21 = vpop.permute.xlu1 %2350 }
 0x265   : > { %v2303_v23 = vpop.permute.xlu0 %2302  ;;  %3989 = vmatmul.mubr.msk.bf16.gmra.mrb[32].mxu1 %vm2905_vm2, %v2847_v9 }
 0x266   : > { %3992 = vmatprep.mubr.msk.bf16.mxu1 %vm2905_vm2, %v6157_v0 }
 0x268   : > { %v2386_v29 = vpop.permute.xlu1 %2385 }
 0x269   : > { %v2384_v38 = vpop.permute.xlu0 %2383 }
 0x26a   : > { %v2723_v26 = vsel %vm2693_vm13, %v6178_v24, %v2384_v38  ;;  %v6830_v24 = vld [vmem:[#allocation31_spill] sm:$0xff] }
 0x26b   : > { %v2758_v10 = vsel %vm2728_vm0, %v2723_v26, %v2464_v5  ;;  %v2518_v8 = vsel %vm2469_vm4, %v6830_v24, %v2044_v37 }
 0x26c   : > { %v2869_v20 = vshrl.u32 %v2758_v10, 16  ;;  %v2219_v3 = vpop.permute.xlu1 %2218  ;;  %v2872_v31 = vshll.u32 %v2758_v10, 16  ;;  %v2553_v61 = vsel %vm2519_vm9, %v2518_v8, %v2129_v6  ;;  %vm6833_vm9 = vmmov %vm6826_vm1 }
 0x26d   : > { %v2353_v30 = vpop.permute.xlu0 %2352  ;;  %3993 = vmatmul.mubr.msk.bf16.gmra.mrb[36].mxu1 %vm2905_vm2, %v6152_v59  ;;  %v2620_v17 = vsel %vm6818_vm5, %v2586_v60, %v2219_v3  ;;  %v2588_v57 = vsel %vm2554_vm15, %v2553_v61, %v2179_v48  ;;  %vm6834_vm15 = vmmov %vm6826_vm1 }
 0x26e   : > { %v2871_v0 = vrot.slane %v2869_v20, 7  ;;  %3996 = vmatprep.mubr.msk.bf16.mxu1 %vm2905_vm2, %v2868_v49  ;;  %v2655_v18 = vsel %vm2623_vm8, %v2620_v17, %v2301_v14  ;;  %v2622_v62 = vsel %vm6831_vm11, %v2588_v57, %v2221_v53 }
 0x26f   : > { %v2690_v40 = vsel %vm2658_vm10, %v2655_v18, %v2351_v21  ;;  %v2657_v12 = vsel %vm2623_vm8, %v2622_v62, %v2303_v23 }
 0x270   : > { %v2874_v63 = vor.u32 %v2872_v31, %v2871_v0  ;;  %v2725_v59 = vsel %vm2693_vm13, %v2690_v40, %v2386_v29  ;;  %v2466_v39 = vpop.permute.xlu1 %2465  ;;  %v2692_v27 = vsel %vm2658_vm10, %v2657_v12, %v2353_v30 }
 0x271   : > { %v2388_v1 = vpop.permute.xlu0 %2387  ;;  %v2760_v28 = vsel %vm2728_vm0, %v2725_v59, %v2466_v39 }
 0x272   : > { %v2875_v43 = vsel %vm6832_vm7, %v2864_v46, %v2874_v63  ;;  %v2876_v41 = vshrl.u32 %v2760_v28, 16  ;;  %v2727_v56 = vsel %vm2693_vm13, %v2692_v27, %v2388_v1  ;;  %v2879_v11 = vshll.u32 %v2760_v28, 16 }
 0x274   : > { %v2878_v54 = vrot.slane %v2876_v41, 7 }
 0x275   : > { %v2468_v19 = vpop.permute.xlu0 %2467  ;;  %3997 = vmatmul.mubr.msk.bf16.gmra.mrb[40].mxu1 %vm2905_vm2, %v2875_v43 }
 0x276   : > { %v2762_v25 = vsel %vm2728_vm0, %v2727_v56, %v2468_v19  ;;  %v2881_v58 = vor.u32 %v2879_v11, %v2878_v54 }
 0x277   : > { %v2883_v37 = vshrl.u32 %v2762_v25, 16  ;;  %v2886_v35 = vshll.u32 %v2762_v25, 16 }
 0x278   : > { %v2882_v46 = vsel %vm6833_vm9, %v2871_v0, %v2881_v58 }
 0x279   : > { %v2885_v5 = vrot.slane %v2883_v37, 7  ;;  %4000 = vmatprep.mubr.msk.bf16.mxu1 %vm2905_vm2, %v2882_v46 }
 0x27b   : > { %v2888_v44 = vor.u32 %v2886_v35, %v2885_v5 }
 0x27d   : > { %v2889_v9 = vsel %vm6834_vm15, %v2878_v54, %v2888_v44 }
 0x27e   : > { %4001 = vmatmul.mubr.msk.bf16.gmra.mrb[44].mxu1 %vm2905_vm2, %v2889_v9 }
 0x2ac   : > { %v3974_v32 = vpop.f32.mrb[16].mxu1 }
 0x2ad   : > { %v3001_v36 = vadd.f32 %v3974_v32, %v6287_v7  ;;  %v2992_v4 = vpop.f32.mrb[17].mxu1 }
 0x2ae   : > { %v2993_v42 = vadd.f32 %v6287_v7, %v2992_v4  ;;  %v3975_v45 = vpop.f32.mrb[18].mxu1 }
 0x2af   : > { %v3004_v50 = vadd.f32 %v3975_v45, %v6287_v7  ;;  %v2995_v51 = vpop.f32.mrb[19].mxu1  ;;  %v3121_v13 = vmax.f32 %v3001_v36, 0.0 }
 0x2b0   : > { %v2996_v6 = vadd.f32 %v6287_v7, %v2995_v51  ;;  %v3119_v49 = vmax.f32 %v2993_v42, 0.0 }
 0x2b1   : > { %v3122_v55 = vmax.f32 %v3004_v50, 0.0 }
 0x2b2   : > { %v3120_v47 = vmax.f32 %v2996_v6, 0.0 }
 0x2b3   : > { %v3152_v15 = vpack.c.bf16 %v3122_v55, %v3121_v13 }
 0x2b4   : > { %v3151_v52 = vpack.c.bf16 %v3120_v47, %v3119_v49 }
 0x2b6   : > { %4006 = vmatprep.mubr.msk.bf16.mxu0 %vm2469_vm4, %v3151_v52 }
 0x2b7   : > { %4007 = vmatmul.mubr.msk.bf16.vlgmr.msra.gmra.mrb[16].mxu0 %vm2469_vm4, %v3152_v15 }
 0x2ee   : > { %v3978_v2 = vpop.f32.mrb[20].mxu1 }
 0x2ef   : > { %v3017_v48 = vadd.f32 %v3978_v2, %v6287_v7  ;;  %v3008_v33 = vpop.f32.mrb[21].mxu1 }
 0x2f0   : > { %v3009_v53 = vadd.f32 %v6287_v7, %v3008_v33  ;;  %v3979_v14 = vpop.f32.mrb[22].mxu1 }
 0x2f1   : > { %v3020_v23 = vadd.f32 %v3979_v14, %v6287_v7  ;;  %v3011_v21 = vpop.f32.mrb[23].mxu1  ;;  %v3125_v29 = vmax.f32 %v3017_v48, 0.0 }
 0x2f2   : > { %v3012_v38 = vadd.f32 %v6287_v7, %v3011_v21  ;;  %v3123_v22 = vmax.f32 %v3009_v53, 0.0 }
 0x2f3   : > { %v3126_v26 = vmax.f32 %v3020_v23, 0.0 }
 0x2f4   : > { %v3124_v16 = vmax.f32 %v3012_v38, 0.0 }
 0x2f5   : > { %v3154_v10 = vpack.c.bf16 %v3126_v26, %v3125_v29 }
 0x2f6   : > { %v3153_v34 = vpack.c.bf16 %v3124_v16, %v3123_v22 }
 0x2f8   : > { %4010 = vmatprep.mubr.msk.bf16.mxu0 %vm2469_vm4, %v3153_v34 }
 0x2f9   : > { %4011 = vmatmul.mubr.msk.bf16.gmra.mrb[20].mxu0 %vm2469_vm4, %v3154_v10 }
 0x326   : > { %v3982_v20 = vpop.f32.mrb[24].mxu1 }
 0x327   : > { %v3033_v60 = vadd.f32 %v3982_v20, %v6287_v7  ;;  %v3024_v30 = vpop.f32.mrb[25].mxu1 }
 0x328   : > { %v3025_v3 = vadd.f32 %v6287_v7, %v3024_v30  ;;  %v3983_v0 = vpop.f32.mrb[26].mxu1 }
 0x329   : > { %v3036_v31 = vadd.f32 %v3983_v0, %v6287_v7  ;;  %v3027_v17 = vpop.f32.mrb[27].mxu1  ;;  %v3129_v8 = vmax.f32 %v3033_v60, 0.0 }
 0x32a   : > { %v3028_v24 = vadd.f32 %v6287_v7, %v3027_v17  ;;  %v3127_v61 = vmax.f32 %v3025_v3, 0.0 }
 0x32b   : > { %v3130_v18 = vmax.f32 %v3036_v31, 0.0 }
 0x32c   : > { %v3128_v63 = vmax.f32 %v3028_v24, 0.0 }
 0x32d   : > { %v3156_v40 = vpack.c.bf16 %v3130_v18, %v3129_v8 }
 0x32e   : > { %v3155_v57 = vpack.c.bf16 %v3128_v63, %v3127_v61 }
 0x330   : > { %v3986_v1 = vpop.f32.mrb[28].mxu1  ;;  %4014 = vmatprep.mubr.msk.bf16.mxu0 %vm2469_vm4, %v3155_v57 }
 0x331   : > { %v3049_v59 = vadd.f32 %v3986_v1, %v6287_v7  ;;  %v3040_v39 = vpop.f32.mrb[29].mxu1  ;;  %4015 = vmatmul.mubr.msk.bf16.gmra.mrb[24].mxu0 %vm2469_vm4, %v3156_v40 }
 0x332   : > { %v3041_v62 = vadd.f32 %v6287_v7, %v3040_v39  ;;  %v3987_v28 = vpop.f32.mrb[30].mxu1 }
 0x333   : > { %v3052_v43 = vadd.f32 %v3987_v28, %v6287_v7  ;;  %v3043_v12 = vpop.f32.mrb[31].mxu1  ;;  %v3133_v27 = vmax.f32 %v3049_v59, 0.0 }
 0x334   : > { %v3044_v41 = vadd.f32 %v6287_v7, %v3043_v12  ;;  %v3131_v54 = vmax.f32 %v3041_v62, 0.0 }
 0x335   : > { %v3134_v56 = vmax.f32 %v3052_v43, 0.0 }
 0x336   : > { %v3132_v11 = vmax.f32 %v3044_v41, 0.0  ;;  %v6340_v41 = vld [vmem:[%s6470_s6] ss:$0 sm:$0xff] }
 0x337   : > { %v3158_v19 = vpack.c.bf16 %v3134_v56, %v3133_v27  ;;  %v4101_v27 = vld [vmem:[%s4194_s8 + $0x8] sm:$0xff]  }
 0x338   : > { %v3157_v25 = vpack.c.bf16 %v3132_v11, %v3131_v54  ;;  %v3990_v58 = vpop.f32.mrb[32].mxu1  ;;  %v3389_v56 = vunpack.c.l.bf16 %v4101_v27  ;;  %v4102_v54 = vld [vmem:[%s4194_s8] sm:$0xff]  }
 0x339   : > { %v3065_v37 = vadd.f32 %v3990_v58, %v6287_v7  ;;  %v3056_v5 = vpop.f32.mrb[33].mxu1  ;;  %v3390_v58 = vunpack.c.h.bf16 %v4101_v27 }
 0x33a   : > { %v3057_v35 = vadd.f32 %v6287_v7, %v3056_v5  ;;  %v3991_v46 = vpop.f32.mrb[34].mxu1  ;;  %4018 = vmatprep.mubr.msk.bf16.mxu0 %vm2469_vm4, %v3157_v25 }
 0x33b   : > { %v3068_v44 = vadd.f32 %v3991_v46, %v6287_v7  ;;  %v3059_v9 = vpop.f32.mrb[35].mxu1  ;;  %4019 = vmatmul.mubr.msk.bf16.gmra.mrb[28].mxu0 %vm2469_vm4, %v3158_v19  ;;  %v3137_v36 = vmax.f32 %v3065_v37, 0.0  ;;  %v3388_v37 = vunpack.c.h.bf16 %v4102_v54 }
 0x33c   : > { %v3060_v32 = vadd.f32 %v6287_v7, %v3059_v9  ;;  %v3135_v42 = vmax.f32 %v3057_v35, 0.0 }
 0x33d   : > { %v3138_v4 = vmax.f32 %v3068_v44, 0.0 }
 0x33e   : > { %v3136_v45 = vmax.f32 %v3060_v32, 0.0 }
 0x33f   : > { %v3160_v50 = vpack.c.bf16 %v3138_v4, %v3137_v36 }
 0x340   : > { %v3159_v51 = vpack.c.bf16 %v3136_v45, %v3135_v42  ;;  %v3994_v6 = vpop.f32.mrb[36].mxu1 }
 0x341   : > { %v3081_v13 = vadd.f32 %v3994_v6, %v6287_v7  ;;  %v3072_v55 = vpop.f32.mrb[37].mxu1 }
 0x342   : > { %v3073_v49 = vadd.f32 %v6287_v7, %v3072_v55  ;;  %v3995_v47 = vpop.f32.mrb[38].mxu1  ;;  %4022 = vmatprep.mubr.msk.bf16.mxu0 %vm2469_vm4, %v3159_v51 }
 0x343   : > { %v3084_v15 = vadd.f32 %v3995_v47, %v6287_v7  ;;  %v3075_v52 = vpop.f32.mrb[39].mxu1  ;;  %4023 = vmatmul.mubr.msk.bf16.gmra.mrb[32].mxu0 %vm2469_vm4, %v3160_v50  ;;  %v3141_v48 = vmax.f32 %v3081_v13, 0.0 }
 0x344   : > { %v3076_v2 = vadd.f32 %v6287_v7, %v3075_v52  ;;  %v3139_v53 = vmax.f32 %v3073_v49, 0.0 }
 0x345   : > { %v3142_v33 = vmax.f32 %v3084_v15, 0.0  ;;  %v4103_v15 = vld [vmem:[%s4194_s8 + $0x18] sm:$0xff]  }
 0x346   : > { %v3140_v14 = vmax.f32 %v3076_v2, 0.0  ;;  %v3393_v52 = vunpack.c.l.bf16 %v4103_v15 }
 0x347   : > { %v3162_v23 = vpack.c.bf16 %v3142_v33, %v3141_v48  ;;  %v4104_v48 = vld [vmem:[%s4194_s8 + $0x10] sm:$0xff]  }
 0x348   : > { %v3161_v21 = vpack.c.bf16 %v3140_v14, %v3139_v53  ;;  %v3998_v38 = vpop.f32.mrb[40].mxu1  ;;  %v3391_v33 = vunpack.c.l.bf16 %v4104_v48 }
 0x349   : > { %v3097_v29 = vadd.f32 %v3998_v38, %v6287_v7  ;;  %v3088_v26 = vpop.f32.mrb[41].mxu1 }
 0x34a   : > { %v3089_v22 = vadd.f32 %v6287_v7, %v3088_v26  ;;  %v3999_v16 = vpop.f32.mrb[42].mxu1  ;;  %4026 = vmatprep.mubr.msk.bf16.mxu0 %vm2469_vm4, %v3161_v21 }
 0x34b   : > { %v3100_v10 = vadd.f32 %v3999_v16, %v6287_v7  ;;  %v3091_v34 = vpop.f32.mrb[43].mxu1  ;;  %4027 = vmatmul.mubr.msk.bf16.gmra.mrb[36].mxu0 %vm2469_vm4, %v3162_v23  ;;  %v3145_v60 = vmax.f32 %v3097_v29, 0.0  ;;  %v3394_v23 = vunpack.c.h.bf16 %v4103_v15  ;;  %v3392_v29 = vunpack.c.h.bf16 %v4104_v48 }
 0x34c   : > { %v3092_v20 = vadd.f32 %v6287_v7, %v3091_v34  ;;  %v3143_v3 = vmax.f32 %v3089_v22, 0.0 }
 0x34d   : > { %v3146_v30 = vmax.f32 %v3100_v10, 0.0 }
 0x34e   : > { %v3144_v0 = vmax.f32 %v3092_v20, 0.0 }
 0x34f   : > { %v3164_v31 = vpack.c.bf16 %v3146_v30, %v3145_v60 }
 0x350   : > { %v3163_v17 = vpack.c.bf16 %v3144_v0, %v3143_v3 }
 0x351   : > { %v4002_v24 = vpop.f32.mrb[44].mxu1 }
 0x352   : > { %v3113_v8 = vadd.f32 %v4002_v24, %v6287_v7  ;;  %v3104_v18 = vpop.f32.mrb[45].mxu1  ;;  %4030 = vmatprep.mubr.msk.bf16.mxu0 %vm2469_vm4, %v3163_v17 }
 0x353   : > { %v3105_v61 = vadd.f32 %v6287_v7, %v3104_v18  ;;  %v4003_v63 = vpop.f32.mrb[46].mxu1  ;;  %4031 = vmatmul.mubr.msk.bf16.gmra.mrb[40].mxu0 %vm2469_vm4, %v3164_v31 }
 0x354   : > { %v3116_v40 = vadd.f32 %v4003_v63, %v6287_v7  ;;  %v3107_v57 = vpop.f32.mrb[47].mxu1  ;;  %v3149_v59 = vmax.f32 %v3113_v8, 0.0 }
 0x355   : > { %v3108_v1 = vadd.f32 %v6287_v7, %v3107_v57  ;;  %v3147_v62 = vmax.f32 %v3105_v61, 0.0  ;;  %v3387_v7 = vunpack.c.l.bf16 %v4102_v54  ;;  %v4105_v61 = vld [vmem:[%s4194_s8 + $0x28] sm:$0xff]   ;;  %v4106_v57 = vld [vmem:[%s4194_s8 + $0x20] sm:$0xff]  }
 0x356   : > { %v3150_v39 = vmax.f32 %v3116_v40, 0.0  ;;  %v3397_v63 = vunpack.c.l.bf16 %v4105_v61 }
 0x357   : > { %v3148_v28 = vmax.f32 %v3108_v1, 0.0  ;;  %v3395_v1 = vunpack.c.l.bf16 %v4106_v57 }
 0x358   : > { %v3166_v43 = vpack.c.bf16 %v3150_v39, %v3149_v59 }
 0x359   : > { %v3165_v12 = vpack.c.bf16 %v3148_v28, %v3147_v62  ;;  %v3398_v62 = vunpack.c.h.bf16 %v4105_v61 }
 0x35b   : > { %4034 = vmatprep.mubr.msk.bf16.mxu0 %vm2469_vm4, %v3165_v12  ;;  %v3396_v12 = vunpack.c.h.bf16 %v4106_v57 }
 0x35c   : > { %4035 = vmatmul.mubr.msk.bf16.gmra.mrb[44].mxu0 %vm2469_vm4, %v3166_v43  ;;  %vm3611_vm4 = vcmask 125952  }
 0x38a   : > { %v4008_v11 = vpop.f32.mrb[16].mxu0 }
 0x38b   : > { %v3269_v19 = vadd.f32 %v4008_v11, %v6340_v41  ;;  %v3260_v25 = vpop.f32.mrb[17].mxu0 }
 0x38c   : > { %v3261_v5 = vadd.f32 %v6340_v41, %v3260_v25  ;;  %v4009_v35 = vpop.f32.mrb[18].mxu0 }
 0x38d   : > { %v3421_v46 = vadd.f32 %v3389_v56, %v3269_v19  ;;  %v3272_v44 = vadd.f32 %v4009_v35, %v6340_v41  ;;  %v3263_v9 = vpop.f32.mrb[19].mxu0 }
 0x38e   : > { %v3419_v32 = vadd.f32 %v3387_v7, %v3261_v5  ;;  %v3264_v36 = vadd.f32 %v6340_v41, %v3263_v9  ;;  %v4107_v9 = vld [vmem:[%s4194_s8 + $0x38] sm:$0xff]  }
 0x38f   : > { %v3453_v4 = vmax.f32 %v3421_v46, 0.0  ;;  %v3422_v42 = vadd.f32 %v3390_v58, %v3272_v44 }
 0x390   : > { %v3451_v45 = vmax.f32 %v3419_v32, 0.0  ;;  %v3420_v50 = vadd.f32 %v3388_v37, %v3264_v36  ;;  %v3401_v32 = vunpack.c.l.bf16 %v4107_v9 }
 0x391   : > { %v3849_v51 = vpack.c.bf16 %v3453_v4, %v3453_v4  ;;  %v3454_v6 = vmax.f32 %v3422_v42, 0.0  ;;  %v4108_v42 = vld [vmem:[%s4194_s8 + $0x30] sm:$0xff]  }
 0x392   : > { %v3847_v13 = vpack.c.bf16 %v3451_v45, %v3451_v45  ;;  %v3452_v55 = vmax.f32 %v3420_v50, 0.0  ;;  %v3399_v45 = vunpack.c.l.bf16 %v4108_v42 }
 0x393   : > { %3614 = vst.msk [vmem:[%s6353_s14 + $0x8] sm:$0xf] %vm3611_vm4, %v3849_v51  ;;  %v3850_v49 = vpack.c.bf16 %v3454_v6, %v3454_v6 }
 0x394   : > { %3612 = vst.msk [vmem:[%s6353_s14] sm:$0xf] %vm3611_vm4, %v3847_v13  ;;  %v3848_v47 = vpack.c.bf16 %v3452_v55, %v3452_v55  ;;  %v3402_v13 = vunpack.c.h.bf16 %v4107_v9 }
 0x395   : > { %3615 = vst.msk [vmem:[%s6353_s14 + $0xc] sm:$0xf] %vm3611_vm4, %v3850_v49 }
 0x396   : > { %3613 = vst.msk [vmem:[%s6353_s14 + $0x4] sm:$0xf] %vm3611_vm4, %v3848_v47  ;;  %v3400_v47 = vunpack.c.h.bf16 %v4108_v42 }
 0x3cc   : > { %v4012_v2 = vpop.f32.mrb[20].mxu0 }
 0x3cd   : > { %v3285_v53 = vadd.f32 %v4012_v2, %v6340_v41  ;;  %v3276_v14 = vpop.f32.mrb[21].mxu0 }
 0x3ce   : > { %v3277_v21 = vadd.f32 %v6340_v41, %v3276_v14  ;;  %v4013_v38 = vpop.f32.mrb[22].mxu0 }
 0x3cf   : > { %v3425_v26 = vadd.f32 %v3393_v52, %v3285_v53  ;;  %v3288_v22 = vadd.f32 %v4013_v38, %v6340_v41  ;;  %v3279_v16 = vpop.f32.mrb[23].mxu0 }
 0x3d0   : > { %v3423_v10 = vadd.f32 %v3391_v33, %v3277_v21  ;;  %v3280_v34 = vadd.f32 %v6340_v41, %v3279_v16  ;;  %v4110_v16 = vld [vmem:[%s4194_s8 + $0x40] sm:$0xff]  }
 0x3d1   : > { %v3457_v20 = vmax.f32 %v3425_v26, 0.0  ;;  %v3426_v60 = vadd.f32 %v3394_v23, %v3288_v22  ;;  %v4109_v26 = vld [vmem:[%s4194_s8 + $0x48] sm:$0xff]  }
 0x3d2   : > { %v3455_v30 = vmax.f32 %v3423_v10, 0.0  ;;  %v3424_v3 = vadd.f32 %v3392_v29, %v3280_v34  ;;  %v3405_v22 = vunpack.c.l.bf16 %v4109_v26  ;;  %v3403_v10 = vunpack.c.l.bf16 %v4110_v16 }
 0x3d3   : > { %v3853_v0 = vpack.c.bf16 %v3457_v20, %v3457_v20  ;;  %v3458_v31 = vmax.f32 %v3426_v60, 0.0 }
 0x3d4   : > { %v3851_v17 = vpack.c.bf16 %v3455_v30, %v3455_v30  ;;  %v3456_v24 = vmax.f32 %v3424_v3, 0.0 }
 0x3d5   : > { %3618 = vst.msk [vmem:[%s6353_s14 + $0x18] sm:$0xf] %vm3611_vm4, %v3853_v0  ;;  %v3854_v8 = vpack.c.bf16 %v3458_v31, %v3458_v31  ;;  %v3406_v31 = vunpack.c.h.bf16 %v4109_v26 }
 0x3d6   : > { %3616 = vst.msk [vmem:[%s6353_s14 + $0x10] sm:$0xf] %vm3611_vm4, %v3851_v17  ;;  %v3852_v18 = vpack.c.bf16 %v3456_v24, %v3456_v24  ;;  %v3404_v17 = vunpack.c.h.bf16 %v4110_v16 }
 0x3d7   : > { %3619 = vst.msk [vmem:[%s6353_s14 + $0x1c] sm:$0xf] %vm3611_vm4, %v3854_v8 }
 0x3d8   : > { %3617 = vst.msk [vmem:[%s6353_s14 + $0x14] sm:$0xf] %vm3611_vm4, %v3852_v18 }
 0x404   : > { %v4016_v40 = vpop.f32.mrb[24].mxu0 }
 0x405   : > { %v3301_v59 = vadd.f32 %v4016_v40, %v6340_v41  ;;  %v3292_v39 = vpop.f32.mrb[25].mxu0 }
 0x406   : > { %v3293_v28 = vadd.f32 %v6340_v41, %v3292_v39  ;;  %v4017_v43 = vpop.f32.mrb[26].mxu0 }
 0x407   : > { %v3429_v27 = vadd.f32 %v3397_v63, %v3301_v59  ;;  %v3304_v56 = vadd.f32 %v4017_v43, %v6340_v41  ;;  %v3295_v54 = vpop.f32.mrb[27].mxu0 }
 0x408   : > { %v3427_v7 = vadd.f32 %v3395_v1, %v3293_v28  ;;  %v3296_v11 = vadd.f32 %v6340_v41, %v3295_v54 }
 0x409   : > { %v3461_v19 = vmax.f32 %v3429_v27, 0.0  ;;  %v3430_v25 = vadd.f32 %v3398_v62, %v3304_v56  ;;  %v4111_v27 = vld [vmem:[%s4194_s8 + $0x58] sm:$0xff]  }
 0x40a   : > { %v3459_v58 = vmax.f32 %v3427_v7, 0.0  ;;  %v3428_v37 = vadd.f32 %v3396_v12, %v3296_v11  ;;  %v3409_v56 = vunpack.c.l.bf16 %v4111_v27 }
 0x40b   : > { %v3857_v5 = vpack.c.bf16 %v3461_v19, %v3461_v19  ;;  %v3462_v35 = vmax.f32 %v3430_v25, 0.0  ;;  %v4112_v19 = vld [vmem:[%s4194_s8 + $0x50] sm:$0xff]  }
 0x40c   : > { %v3855_v46 = vpack.c.bf16 %v3459_v58, %v3459_v58  ;;  %v3460_v44 = vmax.f32 %v3428_v37, 0.0  ;;  %v3407_v25 = vunpack.c.l.bf16 %v4112_v19 }
 0x40d   : > { %3622 = vst.msk [vmem:[%s6353_s14 + $0x28] sm:$0xf] %vm3611_vm4, %v3857_v5  ;;  %v3858_v36 = vpack.c.bf16 %v3462_v35, %v3462_v35  ;;  %v3410_v35 = vunpack.c.h.bf16 %v4111_v27 }
 0x40e   : > { %v4020_v4 = vpop.f32.mrb[28].mxu0  ;;  %3620 = vst.msk [vmem:[%s6353_s14 + $0x20] sm:$0xf] %vm3611_vm4, %v3855_v46  ;;  %v3856_v50 = vpack.c.bf16 %v3460_v44, %v3460_v44 }
 0x40f   : > { %v3317_v51 = vadd.f32 %v4020_v4, %v6340_v41  ;;  %v3308_v6 = vpop.f32.mrb[29].mxu0  ;;  %3623 = vst.msk [vmem:[%s6353_s14 + $0x2c] sm:$0xf] %vm3611_vm4, %v3858_v36 }
 0x410   : > { %v3309_v55 = vadd.f32 %v6340_v41, %v3308_v6  ;;  %v4021_v49 = vpop.f32.mrb[30].mxu0  ;;  %3621 = vst.msk [vmem:[%s6353_s14 + $0x24] sm:$0xf] %vm3611_vm4, %v3856_v50 }
 0x411   : > { %v3433_v15 = vadd.f32 %v3401_v32, %v3317_v51  ;;  %v3320_v52 = vadd.f32 %v4021_v49, %v6340_v41  ;;  %v3311_v2 = vpop.f32.mrb[31].mxu0  ;;  %v3408_v32 = vunpack.c.h.bf16 %v4112_v19 }
 0x412   : > { %v3431_v48 = vadd.f32 %v3399_v45, %v3309_v55  ;;  %v3312_v33 = vadd.f32 %v6340_v41, %v3311_v2 }
 0x413   : > { %v3465_v53 = vmax.f32 %v3433_v15, 0.0  ;;  %v3434_v14 = vadd.f32 %v3402_v13, %v3320_v52  ;;  %v4113_v15 = vld [vmem:[%s4194_s8 + $0x68] sm:$0xff]  }
 0x414   : > { %v3463_v23 = vmax.f32 %v3431_v48, 0.0  ;;  %v3432_v21 = vadd.f32 %v3400_v47, %v3312_v33  ;;  %v3413_v52 = vunpack.c.l.bf16 %v4113_v15 }
 0x415   : > { %v3861_v38 = vpack.c.bf16 %v3465_v53, %v3465_v53  ;;  %v3466_v29 = vmax.f32 %v3434_v14, 0.0  ;;  %v4114_v53 = vld [vmem:[%s4194_s8 + $0x60] sm:$0xff]  }
 0x416   : > { %v3859_v34 = vpack.c.bf16 %v3463_v23, %v3463_v23  ;;  %v3464_v20 = vmax.f32 %v3432_v21, 0.0  ;;  %v4024_v60 = vpop.f32.mrb[32].mxu0  ;;  %v3411_v14 = vunpack.c.l.bf16 %v4114_v53 }
 0x417   : > { %3626 = vst.msk [vmem:[%s6353_s14 + $0x38] sm:$0xf] %vm3611_vm4, %v3861_v38  ;;  %v3862_v30 = vpack.c.bf16 %v3466_v29, %v3466_v29  ;;  %v3333_v3 = vadd.f32 %v4024_v60, %v6340_v41  ;;  %v3324_v0 = vpop.f32.mrb[33].mxu0  ;;  %v3414_v29 = vunpack.c.h.bf16 %v4113_v15 }
 0x418   : > { %3624 = vst.msk [vmem:[%s6353_s14 + $0x30] sm:$0xf] %vm3611_vm4, %v3859_v34  ;;  %v3860_v24 = vpack.c.bf16 %v3464_v20, %v3464_v20  ;;  %v3325_v8 = vadd.f32 %v6340_v41, %v3324_v0  ;;  %v4025_v18 = vpop.f32.mrb[34].mxu0 }
 0x419   : > { %3627 = vst.msk [vmem:[%s6353_s14 + $0x3c] sm:$0xf] %vm3611_vm4, %v3862_v30  ;;  %v3437_v61 = vadd.f32 %v3405_v22, %v3333_v3  ;;  %v3336_v63 = vadd.f32 %v4025_v18, %v6340_v41  ;;  %v3327_v40 = vpop.f32.mrb[35].mxu0 }
 0x41a   : > { %3625 = vst.msk [vmem:[%s6353_s14 + $0x34] sm:$0xf] %vm3611_vm4, %v3860_v24  ;;  %v3435_v57 = vadd.f32 %v3403_v10, %v3325_v8  ;;  %v3328_v1 = vadd.f32 %v6340_v41, %v3327_v40  ;;  %v3412_v10 = vunpack.c.h.bf16 %v4114_v53  ;;  %v4115_v40 = vld [vmem:[%s4194_s8 + $0x78] sm:$0xff]  }
 0x41b   : > { %v3469_v59 = vmax.f32 %v3437_v61, 0.0  ;;  %v3438_v39 = vadd.f32 %v3406_v31, %v3336_v63  ;;  %v3418_v27 = vunpack.c.h.bf16 %v4115_v40 }
 0x41c   : > { %v3467_v62 = vmax.f32 %v3435_v57, 0.0  ;;  %v3436_v28 = vadd.f32 %v3404_v17, %v3328_v1  ;;  %v3417_v57 = vunpack.c.l.bf16 %v4115_v40 }
 0x41d   : > { %v3865_v43 = vpack.c.bf16 %v3469_v59, %v3469_v59  ;;  %v3470_v12 = vmax.f32 %v3438_v39, 0.0  ;;  %v4116_v39 = vld [vmem:[%s4194_s8 + $0x70] sm:$0xff]  }
 0x41e   : > { %v3863_v54 = vpack.c.bf16 %v3467_v62, %v3467_v62  ;;  %v3468_v7 = vmax.f32 %v3436_v28, 0.0  ;;  %v4028_v11 = vpop.f32.mrb[36].mxu0  ;;  %v3415_v62 = vunpack.c.l.bf16 %v4116_v39 }
 0x41f   : > { %3630 = vst.msk [vmem:[%s6353_s14 + $0x48] sm:$0xf] %vm3611_vm4, %v3865_v43  ;;  %v3866_v58 = vpack.c.bf16 %v3470_v12, %v3470_v12  ;;  %v3349_v37 = vadd.f32 %v4028_v11, %v6340_v41  ;;  %v3340_v5 = vpop.f32.mrb[37].mxu0 }
 0x420   : > { %3628 = vst.msk [vmem:[%s6353_s14 + $0x40] sm:$0xf] %vm3611_vm4, %v3863_v54  ;;  %v3864_v46 = vpack.c.bf16 %v3468_v7, %v3468_v7  ;;  %v3341_v44 = vadd.f32 %v6340_v41, %v3340_v5  ;;  %v4029_v9 = vpop.f32.mrb[38].mxu0  ;;  %v3416_v7 = vunpack.c.h.bf16 %v4116_v39 }
 0x421   : > { %3631 = vst.msk [vmem:[%s6353_s14 + $0x4c] sm:$0xf] %vm3611_vm4, %v3866_v58  ;;  %v3441_v36 = vadd.f32 %v3409_v56, %v3349_v37  ;;  %v3352_v4 = vadd.f32 %v4029_v9, %v6340_v41  ;;  %v3343_v42 = vpop.f32.mrb[39].mxu0 }
 0x422   : > { %3629 = vst.msk [vmem:[%s6353_s14 + $0x44] sm:$0xf] %vm3611_vm4, %v3864_v46  ;;  %v3439_v45 = vadd.f32 %v3407_v25, %v3341_v44  ;;  %v3344_v50 = vadd.f32 %v6340_v41, %v3343_v42 }
 0x423   : > { %v3473_v51 = vmax.f32 %v3441_v36, 0.0  ;;  %v3442_v6 = vadd.f32 %v3410_v35, %v3352_v4 }
 0x424   : > { %v3471_v13 = vmax.f32 %v3439_v45, 0.0  ;;  %v3440_v55 = vadd.f32 %v3408_v32, %v3344_v50 }
 0x425   : > { %v3869_v49 = vpack.c.bf16 %v3473_v51, %v3473_v51  ;;  %v3474_v47 = vmax.f32 %v3442_v6, 0.0 }
 0x426   : > { %v3867_v2 = vpack.c.bf16 %v3471_v13, %v3471_v13  ;;  %v3472_v48 = vmax.f32 %v3440_v55, 0.0  ;;  %v4032_v33 = vpop.f32.mrb[40].mxu0 }
 0x427   : > { %3634 = vst.msk [vmem:[%s6353_s14 + $0x58] sm:$0xf] %vm3611_vm4, %v3869_v49  ;;  %v3870_v23 = vpack.c.bf16 %v3474_v47, %v3474_v47  ;;  %v3365_v21 = vadd.f32 %v4032_v33, %v6340_v41  ;;  %v3356_v38 = vpop.f32.mrb[41].mxu0 }
 0x428   : > { %3632 = vst.msk [vmem:[%s6353_s14 + $0x50] sm:$0xf] %vm3611_vm4, %v3867_v2  ;;  %v3868_v26 = vpack.c.bf16 %v3472_v48, %v3472_v48  ;;  %v3357_v22 = vadd.f32 %v6340_v41, %v3356_v38  ;;  %v4033_v16 = vpop.f32.mrb[42].mxu0 }
 0x429   : > { %3635 = vst.msk [vmem:[%s6353_s14 + $0x5c] sm:$0xf] %vm3611_vm4, %v3870_v23  ;;  %v3445_v34 = vadd.f32 %v3413_v52, %v3365_v21  ;;  %v3368_v20 = vadd.f32 %v4033_v16, %v6340_v41  ;;  %v3359_v60 = vpop.f32.mrb[43].mxu0 }
 0x42a   : > { %3633 = vst.msk [vmem:[%s6353_s14 + $0x54] sm:$0xf] %vm3611_vm4, %v3868_v26  ;;  %v3443_v30 = vadd.f32 %v3411_v14, %v3357_v22  ;;  %v3360_v3 = vadd.f32 %v6340_v41, %v3359_v60 }
 0x42b   : > { %v3477_v0 = vmax.f32 %v3445_v34, 0.0  ;;  %v3446_v31 = vadd.f32 %v3414_v29, %v3368_v20 }
 0x42c   : > { %v3475_v17 = vmax.f32 %v3443_v30, 0.0  ;;  %v3444_v24 = vadd.f32 %v3412_v10, %v3360_v3 }
 0x42d   : > { %v3873_v8 = vpack.c.bf16 %v3477_v0, %v3477_v0  ;;  %v3478_v18 = vmax.f32 %v3446_v31, 0.0 }
 0x42e   : > { %v3871_v61 = vpack.c.bf16 %v3475_v17, %v3475_v17  ;;  %v3476_v63 = vmax.f32 %v3444_v24, 0.0 }
 0x42f   : > { %3638 = vst.msk [vmem:[%s6353_s14 + $0x68] sm:$0xf] %vm3611_vm4, %v3873_v8  ;;  %v3874_v1 = vpack.c.bf16 %v3478_v18, %v3478_v18  ;;  %v4036_v59 = vpop.f32.mrb[44].mxu0 }
 0x430   : > { %3636 = vst.msk [vmem:[%s6353_s14 + $0x60] sm:$0xf] %vm3611_vm4, %v3871_v61  ;;  %v3872_v28 = vpack.c.bf16 %v3476_v63, %v3476_v63  ;;  %v3381_v43 = vadd.f32 %v4036_v59, %v6340_v41  ;;  %v3372_v12 = vpop.f32.mrb[45].mxu0 }
 0x431   : > { %3639 = vst.msk [vmem:[%s6353_s14 + $0x6c] sm:$0xf] %vm3611_vm4, %v3874_v1  ;;  %v3373_v56 = vadd.f32 %v6340_v41, %v3372_v12  ;;  %v4037_v54 = vpop.f32.mrb[46].mxu0 }
 0x432   : > { %3637 = vst.msk [vmem:[%s6353_s14 + $0x64] sm:$0xf] %vm3611_vm4, %v3872_v28  ;;  %v3449_v11 = vadd.f32 %v3417_v57, %v3381_v43  ;;  %v3384_v19 = vadd.f32 %v4037_v54, %v6340_v41  ;;  %v3375_v25 = vpop.f32.mrb[47].mxu0 }
 0x433   : > { %v3447_v58 = vadd.f32 %v3415_v62, %v3373_v56  ;;  %v3376_v37 = vadd.f32 %v6340_v41, %v3375_v25 }
 0x434   : > { %v3481_v5 = vmax.f32 %v3449_v11, 0.0  ;;  %v3450_v35 = vadd.f32 %v3418_v27, %v3384_v19 }
 0x435   : > { %v3479_v46 = vmax.f32 %v3447_v58, 0.0  ;;  %v3448_v44 = vadd.f32 %v3416_v7, %v3376_v37 }
 0x436   : > { %v3877_v9 = vpack.c.bf16 %v3481_v5, %v3481_v5  ;;  %v3482_v32 = vmax.f32 %v3450_v35, 0.0 }
 0x437   : > { %v3875_v36 = vpack.c.bf16 %v3479_v46, %v3479_v46  ;;  %v3480_v4 = vmax.f32 %v3448_v44, 0.0 }
 0x438   : > { %3642 = vst.msk [vmem:[%s6353_s14 + $0x78] sm:$0xf] %vm3611_vm4, %v3877_v9  ;;  %v3878_v42 = vpack.c.bf16 %v3482_v32, %v3482_v32 }
 0x439   : > { %3640 = vst.msk [vmem:[%s6353_s14 + $0x70] sm:$0xf] %vm3611_vm4, %v3875_v36  ;;  %v3876_v45 = vpack.c.bf16 %v3480_v4, %v3480_v4 }
 0x43a   : > { %3643 = vst.msk [vmem:[%s6353_s14 + $0x7c] sm:$0xf] %vm3611_vm4, %v3878_v42 }
 0x43b   : > { %3641 = vst.msk [vmem:[%s6353_s14 + $0x74] sm:$0xf] %vm3611_vm4, %v3876_v45 }
 0x43c PF: > { %s17_s24 = sadd.s32 1, %s4123_s24  }
 0x43d   : > { %p14_p4 = scmp.ge.s32.totalorder %s17_s24, 4  }
 0x43f   :  { %16 = sbr.rel (!%p14_p4) target bundleno = 1 (0x1), region = 78 }

</bundles_post_ra>
